<compile_context>
chip_gen: v7x
topology: tpu7x:2x2x1
jax: 0.10.0
libtpu: 0.0.40
codegen_flags: <defaults>
</compile_context>

<pallas_src>
import functools
import math

import jax
import jax.numpy as jnp
from jax.experimental import pallas as pl
from jax.experimental.pallas import tpu as pltpu  # noqa: F401  (TPU backend)

# ----------------------------- configuration -----------------------------
B        = 2                 # batch
S        = 8                 # sequence length fed to the sentence encoder
NUM_FILE = 4                 # number of code files per commit
DIM      = 32                # args.embedding_dim == encoder hidden size
N_HEAD   = 4
D_HEAD   = DIM // N_HEAD
N_LAYER  = 1                 # tiny deterministic GPT-2 stand-in
VOCAB    = 64                # encoder vocab
MAX_POS  = 16
CO       = 8                 # args.num_filters
KS       = (1, 2, 3)         # args.filter_sizes (len==3 so fc3 / fc1 dims line up)
HIDDEN   = 16                # args.hidden_units
N_CLASS  = 1                 # args.class_num


# ----------------------------- fused encoder kernel -----------------------------
def _encoder_kernel(h_ref, bias_ref, *rest, n_layer, n_head, d_head):
    """Full GPT-2-style encoder over all sequences at once; writes last-token hidden.

    h_ref   : (BT, S, D)   token+pos embeddings (BT = B*(1+NUM_FILE))
    bias_ref: (BT, S, S)   additive attention bias (causal + padding)
    rest    : 12*n_layer layer-weight refs, lnf_g, lnf_b, out_ref(BT, D)
    """
    out_ref = rest[-1]
    lnf_g = rest[-3][...]
    lnf_b = rest[-2][...]
    layer_refs = rest[:12 * n_layer]

    BT, Sx, Dx = h_ref.shape
    scale = 1.0 / math.sqrt(d_head)

    def layernorm(x, g, b):
        mean = jnp.mean(x, axis=-1, keepdims=True)
        var = jnp.mean((x - mean) ** 2, axis=-1, keepdims=True)
        return (x - mean) * jax.lax.rsqrt(var + 1e-5) * g + b

    def gelu_new(x):
        return 0.5 * x * (1.0 + jnp.tanh(0.7978845608028654 *
                                         (x + 0.044715 * x * x * x)))

    def get_layer(l):
        return [r[...].astype(jnp.float32) for r in layer_refs[12 * l:12 * (l + 1)]]

    h2 = h_ref[...].astype(jnp.float32).reshape(BT * Sx, Dx)      # (BT*S, D)
    bias = bias_ref[...].astype(jnp.float32)                      # (BT, S, S)

    # ---- all layers except the last: full-sequence computation ----
    for l in range(n_layer - 1):
        (ln1_g, ln1_b, attn_w, attn_b, proj_w, proj_b,
         ln2_g, ln2_b, fc_w, fc_b, mproj_w, mproj_b) = get_layer(l)

        ln1 = layernorm(h2, ln1_g, ln1_b)
        qkv = jnp.dot(ln1, attn_w, preferred_element_type=jnp.float32) + attn_b  # (BT*S, 3D)

        head_outs = []
        for hh in range(n_head):
            lo = hh * d_head
            qh = qkv[:, lo:lo + d_head].reshape(BT, Sx, d_head)
            kh = qkv[:, Dx + lo:Dx + lo + d_head].reshape(BT, Sx, d_head)
            vh = qkv[:, 2 * Dx + lo:2 * Dx + lo + d_head].reshape(BT, Sx, d_head)
            s = jnp.einsum('bqd,bkd->bqk', qh, kh,
                           preferred_element_type=jnp.float32) * scale + bias
            m = jnp.max(s, axis=-1, keepdims=True)
            p = jnp.exp(s - m)
            p = p * pl.reciprocal(jnp.sum(p, axis=-1, keepdims=True), approx=True)
            o = jnp.einsum('bqk,bkd->bqd', p, vh,
                           preferred_element_type=jnp.float32)
            head_outs.append(o.reshape(BT * Sx, d_head))
        attn = jnp.concatenate(head_outs, axis=-1)                               # (BT*S, D)
        attn = jnp.dot(attn, proj_w, preferred_element_type=jnp.float32) + proj_b
        h2 = h2 + attn

        ln2 = layernorm(h2, ln2_g, ln2_b)
        m1 = gelu_new(jnp.dot(ln2, fc_w, preferred_element_type=jnp.float32) + fc_b)
        m2 = jnp.dot(m1, mproj_w, preferred_element_type=jnp.float32) + mproj_b
        h2 = h2 + m2

    # ---- final layer: only the last-token query matters for the output ----
    (ln1_g, ln1_b, attn_w, attn_b, proj_w, proj_b,
     ln2_g, ln2_b, fc_w, fc_b, mproj_w, mproj_b) = get_layer(n_layer - 1)

    ln1 = layernorm(h2, ln1_g, ln1_b)                                            # (BT*S, D)
    # K,V over all tokens; Q over last token only.
    kv = jnp.dot(ln1, attn_w[:, Dx:], preferred_element_type=jnp.float32) \
        + attn_b[:, Dx:]                                                         # (BT*S, 2D)
    ln1_last = ln1.reshape(BT, Sx, Dx)[:, Sx - 1, :]                             # (BT, D)
    q_last = jnp.dot(ln1_last, attn_w[:, :Dx],
                     preferred_element_type=jnp.float32) + attn_b[:, :Dx]        # (BT, D)
    h_last = h2.reshape(BT, Sx, Dx)[:, Sx - 1, :]                                # (BT, D)
    bias_last = bias[:, Sx - 1:Sx, :]                                            # (BT, 1, S)

    head_outs = []
    for hh in range(n_head):
        lo = hh * d_head
        qh = q_last[:, lo:lo + d_head].reshape(BT, 1, d_head)
        kh = kv[:, lo:lo + d_head].reshape(BT, Sx, d_head)
        vh = kv[:, Dx + lo:Dx + lo + d_head].reshape(BT, Sx, d_head)
        s = jnp.einsum('bqd,bkd->bqk', qh, kh,
                       preferred_element_type=jnp.float32) * scale + bias_last   # (BT,1,S)
        m = jnp.max(s, axis=-1, keepdims=True)
        p = jnp.exp(s - m)
        p = p * pl.reciprocal(jnp.sum(p, axis=-1, keepdims=True), approx=True)
        o = jnp.einsum('bqk,bkd->bqd', p, vh,
                       preferred_element_type=jnp.float32)                       # (BT,1,Dh)
        head_outs.append(o.reshape(BT, d_head))
    attn = jnp.concatenate(head_outs, axis=-1)                                   # (BT, D)
    attn = jnp.dot(attn, proj_w, preferred_element_type=jnp.float32) + proj_b
    h_last = h_last + attn

    ln2 = layernorm(h_last, ln2_g, ln2_b)
    m1 = gelu_new(jnp.dot(ln2, fc_w, preferred_element_type=jnp.float32) + fc_b)
    m2 = jnp.dot(m1, mproj_w, preferred_element_type=jnp.float32) + mproj_b
    h_last = h_last + m2

    out_ref[...] = layernorm(h_last, lnf_g, lnf_b)                               # (BT, D)


def fused_gpt2_encode_last(p, h0, bias):
    """h0:(BT,S,D) f32, bias:(BT,S,S) f32 -> last-token hidden state (BT,D) f32."""
    BT, Sx, Dx = h0.shape
    layer_inputs = []
    for layer in p["layers"]:
        layer_inputs += [layer["ln1_g"], layer["ln1_b"],
                         layer["attn_w"], layer["attn_b"],
                         layer["proj_w"], layer["proj_b"],
                         layer["ln2_g"], layer["ln2_b"],
                         layer["fc_w"], layer["fc_b"],
                         layer["mproj_w"], layer["mproj_b"]]
    kern = functools.partial(_encoder_kernel, n_layer=len(p["layers"]),
                             n_head=N_HEAD, d_head=D_HEAD)
    return pl.pallas_call(
        kern,
        out_shape=jax.ShapeDtypeStruct((BT, Dx), jnp.float32),
    )(h0, bias, *layer_inputs, p["lnf_g"], p["lnf_b"])


# ----------------------------- fused classifier-head kernel -----------------------------
def _head_kernel(msg_ref, code_ref, fc3_w_ref, fc3_b_ref, *rest, ks):
    """fc3(msg) || (conv+ReLU+maxpool over code files, all filter sizes) -> fc1+ReLU -> fc2+sigmoid.

    msg_ref : (B, D)      code_ref : (B, NUM_FILE, D)
    rest    : [convK_w(K,D,CO), convK_b(1,CO)] * len(ks), fc1_w, fc1_b, fc2_w, fc2_b, out_ref(B,1)
    """
    out_ref = rest[-1]
    fc1_w = rest[-5][...]
    fc1_b = rest[-4][...]
    fc2_w = rest[-3][...]
    fc2_b = rest[-2][...]
    conv_refs = rest[:2 * len(ks)]

    msg = msg_ref[...].astype(jnp.float32)        # (B, D)
    code = code_ref[...].astype(jnp.float32)      # (B, NF, D)
    NF = code.shape[1]

    x_msg = jnp.dot(msg, fc3_w_ref[...], preferred_element_type=jnp.float32) + fc3_b_ref[...]

    pooled = []
    for idx, K in enumerate(ks):
        w = conv_refs[2 * idx][...]               # (K, D, CO)
        b = conv_refs[2 * idx + 1][...]           # (1, CO)
        acc = None
        for t in range(NF - K + 1):               # valid 1-D conv over the file axis
            y = b
            for kk in range(K):
                y = y + jnp.dot(code[:, t + kk, :], w[kk],
                                preferred_element_type=jnp.float32)
            y = jnp.maximum(y, 0.0)               # ReLU
            acc = y if acc is None else jnp.maximum(acc, y)   # global max-pool
        pooled.append(acc)
    x_code = jnp.concatenate(pooled, axis=-1)     # (B, len(ks)*CO)

    xc = jnp.concatenate([x_msg, x_code], axis=-1)                                # (B, 2*len(ks)*CO)
    o1 = jnp.maximum(jnp.dot(xc, fc1_w, preferred_element_type=jnp.float32) + fc1_b, 0.0)
    o2 = jnp.dot(o1, fc2_w, preferred_element_type=jnp.float32) + fc2_b
    out_ref[...] = jax.nn.sigmoid(o2)


# ----------------------------- BART4JIT forward -----------------------------
def bart4jit_forward(params, msg_input_ids, msg_input_mask, code_input_ids, code_input_mask):
    Bx, Sx = msg_input_ids.shape
    NF = code_input_ids.shape[1]
    gpt2 = params["gpt2"]

    # Batch the 1 msg + NF code-file encoder invocations into one pass (rows:
    # [msg_0..msg_{B-1}, code_{b=0,f=0}, code_{b=0,f=1}, ..., code_{b=B-1,f=NF-1}]).
    ids_all = jnp.concatenate(
        [msg_input_ids, code_input_ids.reshape(Bx * NF, Sx)], axis=0)            # (BT, S)
    mask_all = jnp.concatenate(
        [msg_input_mask, code_input_mask.reshape(Bx * NF, Sx)], axis=0)          # (BT, S)

    # glue: embedding gather + additive attention bias
    h0 = gpt2["wte"][ids_all] + gpt2["wpe"][jnp.arange(Sx)][None]                # (BT, S, D)
    causal = jnp.tril(jnp.ones((Sx, Sx), jnp.float32))
    bias = (jnp.where(causal[None] > 0, 0.0, -1e9)
            + (1.0 - mask_all.astype(jnp.float32))[:, None, :] * -1e9)           # (BT, S, S)

    last = fused_gpt2_encode_last(gpt2, h0.astype(jnp.float32), bias)            # (BT, D)

    msg_feat = last[:Bx]                                                         # (B, D)
    code_feat = last[Bx:].reshape(Bx, NF, DIM)                                   # (B, NF, D)

    conv_inputs = []
    for K in KS:
        conv_inputs += [params["conv_w"][K], params["conv_b"][K]]

    # TODO(synk): nn.Dropout is identity at inference; training-mode dropout not modeled.
    out = pl.pallas_call(
        functools.partial(_head_kernel, ks=KS),
        out_shape=jax.ShapeDtypeStruct((Bx, N_CLASS), jnp.float32),
    )(msg_feat, code_feat, params["fc3_w"], params["fc3_b"],
      *conv_inputs,
      params["fc1_w"], params["fc1_b"], params["fc2_w"], params["fc2_b"])
    return jnp.squeeze(out, axis=1)                                              # (B,)


# ----------------------------- deterministic parameter init -----------------------------
def init_params(seed=0):
    keys = iter(jax.random.split(jax.random.PRNGKey(seed), 128))
    nrm = lambda shape: 0.02 * jax.random.normal(next(keys), shape, jnp.float32)
    ones = lambda shape: jnp.ones(shape, jnp.float32)
    zeros = lambda shape: jnp.zeros(shape, jnp.float32)

    gpt2 = {"wte": nrm((VOCAB, DIM)), "wpe": nrm((MAX_POS, DIM)),
            "lnf_g": ones((1, DIM)), "lnf_b": zeros((1, DIM)), "layers": []}
    for _ in range(N_LAYER):
        gpt2["layers"].append({
            "ln1_g": ones((1, DIM)), "ln1_b": zeros((1, DIM)),
            "attn_w": nrm((DIM, 3 * DIM)), "attn_b": zeros((1, 3 * DIM)),
            "proj_w": nrm((DIM, DIM)), "proj_b": zeros((1, DIM)),
            "ln2_g": ones((1, DIM)), "ln2_b": zeros((1, DIM)),
            "fc_w": nrm((DIM, 4 * DIM)), "fc_b": zeros((1, 4 * DIM)),
            "mproj_w": nrm((4 * DIM, DIM)), "mproj_b": zeros((1, DIM)),
        })

    params = {
        "gpt2": gpt2,
        # PyTorch Linear(out,in) weights stored transposed as (in,out) for x@W.
        "fc3_w": nrm((DIM, 3 * CO)), "fc3_b": zeros((1, 3 * CO)),
        "fc1_w": nrm((2 * len(KS) * CO, HIDDEN)), "fc1_b": zeros((1, HIDDEN)),
        "fc2_w": nrm((HIDDEN, N_CLASS)), "fc2_b": zeros((1, N_CLASS)),
        # Conv2d(1,Co,(K,DIM)) weights stored as (K, DIM, Co).
        "conv_w": {K: nrm((K, DIM, CO)) for K in KS},
        "conv_b": {K: zeros((1, CO)) for K in KS},
    }
    return params


# ----------------------------- main -----------------------------
if __name__ == "__main__":
    params = init_params(0)

    key = jax.random.PRNGKey(0)
    k1, k2, k3, k4 = jax.random.split(key, 4)
    msg_input_ids = jax.random.randint(k1, (B, S), 0, VOCAB, dtype=jnp.int32)
    code_input_ids = jax.random.randint(k2, (B, NUM_FILE, S), 0, VOCAB, dtype=jnp.int32)
    # attention masks: a few leading pad positions zeroed, rest ones
    msg_pad = jax.random.randint(k3, (B,), 0, 3)
    msg_input_mask = (jnp.arange(S)[None, :] >= msg_pad[:, None]).astype(jnp.int32)
    code_pad = jax.random.randint(k4, (B, NUM_FILE), 0, 3)
    code_input_mask = (jnp.arange(S)[None, None, :] >= code_pad[:, :, None]).astype(jnp.int32)

    fwd = jax.jit(bart4jit_forward)
    out = fwd(params, msg_input_ids, msg_input_mask, code_input_ids, code_input_mask)
    out = jax.block_until_ready(out)
    assert out.shape == (B,) and out.dtype == jnp.float32
    assert bool(jnp.all(jnp.isfinite(out)))
    print("KERNEL_OK")
</pallas_src>

<mosaic_0001>
module attributes {stable_mosaic.version = 11 : i64} {
  func.func @_encoder_kernel(%arg0: memref<10x8x32xf32, #tpu.memory_space<vmem>>, %arg1: memref<10x8x8xf32, #tpu.memory_space<vmem>>, %arg2: memref<1x32xf32, #tpu.memory_space<vmem>>, %arg3: memref<1x32xf32, #tpu.memory_space<vmem>>, %arg4: memref<32x96xf32, #tpu.memory_space<vmem>>, %arg5: memref<1x96xf32, #tpu.memory_space<vmem>>, %arg6: memref<32x32xf32, #tpu.memory_space<vmem>>, %arg7: memref<1x32xf32, #tpu.memory_space<vmem>>, %arg8: memref<1x32xf32, #tpu.memory_space<vmem>>, %arg9: memref<1x32xf32, #tpu.memory_space<vmem>>, %arg10: memref<32x128xf32, #tpu.memory_space<vmem>>, %arg11: memref<1x128xf32, #tpu.memory_space<vmem>>, %arg12: memref<128x32xf32, #tpu.memory_space<vmem>>, %arg13: memref<1x32xf32, #tpu.memory_space<vmem>>, %arg14: memref<1x32xf32, #tpu.memory_space<vmem>>, %arg15: memref<1x32xf32, #tpu.memory_space<vmem>>, %arg16: memref<10x32xf32, #tpu.memory_space<vmem>>) attributes {dimension_semantics = [], scalar_prefetch = 0 : i64, scratch_operands = 0 : i64, tpu.core_type = #tpu.core_type<tc>} {
    %c0 = arith.constant 0 : index
    %c0_0 = arith.constant 0 : index
    %0 = vector.load %arg14[%c0, %c0_0] : memref<1x32xf32, #tpu.memory_space<vmem>>, vector<1x32xf32>
    %c0_1 = arith.constant 0 : index
    %c0_2 = arith.constant 0 : index
    %1 = vector.load %arg15[%c0_1, %c0_2] : memref<1x32xf32, #tpu.memory_space<vmem>>, vector<1x32xf32>
    %c0_3 = arith.constant 0 : index
    %c0_4 = arith.constant 0 : index
    %c0_5 = arith.constant 0 : index
    %2 = vector.load %arg0[%c0_3, %c0_4, %c0_5] : memref<10x8x32xf32, #tpu.memory_space<vmem>>, vector<10x8x32xf32>
    %3 = vector.shape_cast %2 : vector<10x8x32xf32> to vector<80x32xf32>
    %c0_6 = arith.constant 0 : index
    %c0_7 = arith.constant 0 : index
    %c0_8 = arith.constant 0 : index
    %4 = vector.load %arg1[%c0_6, %c0_7, %c0_8] : memref<10x8x8xf32, #tpu.memory_space<vmem>>, vector<10x8x8xf32>
    %c0_9 = arith.constant 0 : index
    %c0_10 = arith.constant 0 : index
    %5 = vector.load %arg2[%c0_9, %c0_10] : memref<1x32xf32, #tpu.memory_space<vmem>>, vector<1x32xf32>
    %c0_11 = arith.constant 0 : index
    %c0_12 = arith.constant 0 : index
    %6 = vector.load %arg3[%c0_11, %c0_12] : memref<1x32xf32, #tpu.memory_space<vmem>>, vector<1x32xf32>
    %c0_13 = arith.constant 0 : index
    %c0_14 = arith.constant 0 : index
    %7 = vector.load %arg4[%c0_13, %c0_14] : memref<32x96xf32, #tpu.memory_space<vmem>>, vector<32x96xf32>
    %c0_15 = arith.constant 0 : index
    %c0_16 = arith.constant 0 : index
    %8 = vector.load %arg5[%c0_15, %c0_16] : memref<1x96xf32, #tpu.memory_space<vmem>>, vector<1x96xf32>
    %c0_17 = arith.constant 0 : index
    %c0_18 = arith.constant 0 : index
    %9 = vector.load %arg6[%c0_17, %c0_18] : memref<32x32xf32, #tpu.memory_space<vmem>>, vector<32x32xf32>
    %c0_19 = arith.constant 0 : index
    %c0_20 = arith.constant 0 : index
    %10 = vector.load %arg7[%c0_19, %c0_20] : memref<1x32xf32, #tpu.memory_space<vmem>>, vector<1x32xf32>
    %c0_21 = arith.constant 0 : index
    %c0_22 = arith.constant 0 : index
    %11 = vector.load %arg8[%c0_21, %c0_22] : memref<1x32xf32, #tpu.memory_space<vmem>>, vector<1x32xf32>
    %c0_23 = arith.constant 0 : index
    %c0_24 = arith.constant 0 : index
    %12 = vector.load %arg9[%c0_23, %c0_24] : memref<1x32xf32, #tpu.memory_space<vmem>>, vector<1x32xf32>
    %c0_25 = arith.constant 0 : index
    %c0_26 = arith.constant 0 : index
    %13 = vector.load %arg10[%c0_25, %c0_26] : memref<32x128xf32, #tpu.memory_space<vmem>>, vector<32x128xf32>
    %c0_27 = arith.constant 0 : index
    %c0_28 = arith.constant 0 : index
    %14 = vector.load %arg11[%c0_27, %c0_28] : memref<1x128xf32, #tpu.memory_space<vmem>>, vector<1x128xf32>
    %c0_29 = arith.constant 0 : index
    %c0_30 = arith.constant 0 : index
    %15 = vector.load %arg12[%c0_29, %c0_30] : memref<128x32xf32, #tpu.memory_space<vmem>>, vector<128x32xf32>
    %c0_31 = arith.constant 0 : index
    %c0_32 = arith.constant 0 : index
    %16 = vector.load %arg13[%c0_31, %c0_32] : memref<1x32xf32, #tpu.memory_space<vmem>>, vector<1x32xf32>
    %cst = arith.constant dense<0.000000e+00> : vector<80xf32>
    %17 = vector.multi_reduction <add>, %3, %cst [1] : vector<80x32xf32> to vector<80xf32>
    %18 = vector.shape_cast %17 : vector<80xf32> to vector<80x1xf32>
    %cst_33 = arith.constant 3.200000e+01 : f32
    %19 = vector.broadcast %cst_33 : f32 to vector<80x1xf32>
    %20 = arith.divf %18, %19 : vector<80x1xf32>
    %21 = vector.broadcast %20 : vector<80x1xf32> to vector<80x32xf32>
    %22 = arith.subf %3, %21 : vector<80x32xf32>
    %23 = arith.mulf %22, %22 : vector<80x32xf32>
    %cst_34 = arith.constant dense<0.000000e+00> : vector<80xf32>
    %24 = vector.multi_reduction <add>, %23, %cst_34 [1] : vector<80x32xf32> to vector<80xf32>
    %25 = vector.shape_cast %24 : vector<80xf32> to vector<80x1xf32>
    %cst_35 = arith.constant 3.200000e+01 : f32
    %26 = vector.broadcast %cst_35 : f32 to vector<80x1xf32>
    %27 = arith.divf %25, %26 : vector<80x1xf32>
    %28 = vector.broadcast %20 : vector<80x1xf32> to vector<80x32xf32>
    %29 = arith.subf %3, %28 : vector<80x32xf32>
    %cst_36 = arith.constant 9.99999974E-6 : f32
    %30 = vector.broadcast %cst_36 : f32 to vector<80x1xf32>
    %31 = arith.addf %27, %30 : vector<80x1xf32>
    %32 = math.rsqrt %31 : vector<80x1xf32>
    %33 = vector.broadcast %32 : vector<80x1xf32> to vector<80x32xf32>
    %34 = arith.mulf %29, %33 : vector<80x32xf32>
    %35 = vector.broadcast %5 : vector<1x32xf32> to vector<80x32xf32>
    %36 = arith.mulf %34, %35 : vector<80x32xf32>
    %37 = vector.broadcast %6 : vector<1x32xf32> to vector<80x32xf32>
    %38 = arith.addf %36, %37 : vector<80x32xf32>
    %39 = vector.extract_strided_slice %7 {offsets = [0, 32], sizes = [32, 64], strides = [1, 1]} : vector<32x96xf32> to vector<32x64xf32>
    %cst_37 = arith.constant dense<0.000000e+00> : vector<80x64xf32>
    %40 = tpu.matmul %38, %39, %cst_37 {dimension_numbers = #tpu.dot_dimension_numbers<[1], [0], [0], [1], [0, 0, 1, 1], [], []>} : vector<80x32xf32>, vector<32x64xf32>, vector<80x64xf32> -> vector<80x64xf32>
    %41 = vector.extract_strided_slice %8 {offsets = [0, 32], sizes = [1, 64], strides = [1, 1]} : vector<1x96xf32> to vector<1x64xf32>
    %42 = vector.broadcast %41 : vector<1x64xf32> to vector<80x64xf32>
    %43 = arith.addf %40, %42 : vector<80x64xf32>
    %44 = vector.shape_cast %38 : vector<80x32xf32> to vector<10x8x32xf32>
    %45 = vector.extract_strided_slice %44 {offsets = [0, 7, 0], sizes = [10, 1, 32], strides = [1, 1, 1]} : vector<10x8x32xf32> to vector<10x1x32xf32>
    %46 = vector.shape_cast %45 : vector<10x1x32xf32> to vector<10x32xf32>
    %47 = vector.extract_strided_slice %7 {offsets = [0, 0], sizes = [32, 32], strides = [1, 1]} : vector<32x96xf32> to vector<32x32xf32>
    %cst_38 = arith.constant dense<0.000000e+00> : vector<10x32xf32>
    %48 = tpu.matmul %46, %47, %cst_38 {dimension_numbers = #tpu.dot_dimension_numbers<[1], [0], [0], [1], [0, 0, 1, 1], [], []>} : vector<10x32xf32>, vector<32x32xf32>, vector<10x32xf32> -> vector<10x32xf32>
    %49 = vector.extract_strided_slice %8 {offsets = [0, 0], sizes = [1, 32], strides = [1, 1]} : vector<1x96xf32> to vector<1x32xf32>
    %50 = vector.broadcast %49 : vector<1x32xf32> to vector<10x32xf32>
    %51 = arith.addf %48, %50 : vector<10x32xf32>
    %52 = vector.shape_cast %3 : vector<80x32xf32> to vector<10x8x32xf32>
    %53 = vector.extract_strided_slice %52 {offsets = [0, 7, 0], sizes = [10, 1, 32], strides = [1, 1, 1]} : vector<10x8x32xf32> to vector<10x1x32xf32>
    %54 = vector.shape_cast %53 : vector<10x1x32xf32> to vector<10x32xf32>
    %55 = vector.extract_strided_slice %4 {offsets = [0, 7, 0], sizes = [10, 1, 8], strides = [1, 1, 1]} : vector<10x8x8xf32> to vector<10x1x8xf32>
    %56 = vector.extract_strided_slice %51 {offsets = [0, 0], sizes = [10, 8], strides = [1, 1]} : vector<10x32xf32> to vector<10x8xf32>
    %57 = vector.shape_cast %56 : vector<10x8xf32> to vector<10x1x8xf32>
    %58 = vector.extract_strided_slice %43 {offsets = [0, 0], sizes = [80, 8], strides = [1, 1]} : vector<80x64xf32> to vector<80x8xf32>
    %59 = vector.shape_cast %58 : vector<80x8xf32> to vector<10x8x8xf32>
    %60 = vector.extract_strided_slice %43 {offsets = [0, 32], sizes = [80, 8], strides = [1, 1]} : vector<80x64xf32> to vector<80x8xf32>
    %61 = vector.shape_cast %60 : vector<80x8xf32> to vector<10x8x8xf32>
    "tpu.trace_start"() <{level = 10 : i32, message = "bqd,bkd->bqk"}> : () -> ()
    %cst_39 = arith.constant dense<0.000000e+00> : vector<10x1x8xf32>
    %62 = tpu.matmul %57, %59, %cst_39 {dimension_numbers = #tpu.dot_dimension_numbers<[2], [2], [1], [1], [0, 0, 0, 1, 1, 1], [0], [0]>} : vector<10x1x8xf32>, vector<10x8x8xf32>, vector<10x1x8xf32> -> vector<10x1x8xf32>
    "tpu.trace_stop"() : () -> ()
    %cst_40 = arith.constant 0.353553385 : f32
    %63 = vector.broadcast %cst_40 : f32 to vector<10x1x8xf32>
    %64 = arith.mulf %62, %63 : vector<10x1x8xf32>
    %65 = arith.addf %64, %55 : vector<10x1x8xf32>
    %cst_41 = arith.constant dense<0xFF800000> : vector<10x1xf32>
    %66 = vector.multi_reduction <maximumf>, %65, %cst_41 [2] : vector<10x1x8xf32> to vector<10x1xf32>
    %67 = vector.shape_cast %66 : vector<10x1xf32> to vector<10x1x1xf32>
    %68 = vector.broadcast %67 : vector<10x1x1xf32> to vector<10x1x8xf32>
    %69 = arith.subf %65, %68 : vector<10x1x8xf32>
    %70 = math.exp %69 : vector<10x1x8xf32>
    %cst_42 = arith.constant dense<0.000000e+00> : vector<10x1xf32>
    %71 = vector.multi_reduction <add>, %70, %cst_42 [2] : vector<10x1x8xf32> to vector<10x1xf32>
    %72 = vector.shape_cast %71 : vector<10x1xf32> to vector<10x1x1xf32>
    %73 = tpu.reciprocal %72 {approx = true} : vector<10x1x1xf32> -> vector<10x1x1xf32>
    %74 = vector.broadcast %73 : vector<10x1x1xf32> to vector<10x1x8xf32>
    %75 = arith.mulf %70, %74 : vector<10x1x8xf32>
    "tpu.trace_start"() <{level = 10 : i32, message = "bqk,bkd->bqd"}> : () -> ()
    %cst_43 = arith.constant dense<0.000000e+00> : vector<10x1x8xf32>
    %76 = tpu.matmul %75, %61, %cst_43 {dimension_numbers = #tpu.dot_dimension_numbers<[2], [1], [1], [2], [0, 0, 0, 1, 1, 2], [0], [0]>} : vector<10x1x8xf32>, vector<10x8x8xf32>, vector<10x1x8xf32> -> vector<10x1x8xf32>
    "tpu.trace_stop"() : () -> ()
    %77 = vector.shape_cast %76 : vector<10x1x8xf32> to vector<10x8xf32>
    %78 = vector.extract_strided_slice %51 {offsets = [0, 8], sizes = [10, 8], strides = [1, 1]} : vector<10x32xf32> to vector<10x8xf32>
    %79 = vector.shape_cast %78 : vector<10x8xf32> to vector<10x1x8xf32>
    %80 = vector.extract_strided_slice %43 {offsets = [0, 8], sizes = [80, 8], strides = [1, 1]} : vector<80x64xf32> to vector<80x8xf32>
    %81 = vector.shape_cast %80 : vector<80x8xf32> to vector<10x8x8xf32>
    %82 = vector.extract_strided_slice %43 {offsets = [0, 40], sizes = [80, 8], strides = [1, 1]} : vector<80x64xf32> to vector<80x8xf32>
    %83 = vector.shape_cast %82 : vector<80x8xf32> to vector<10x8x8xf32>
    "tpu.trace_start"() <{level = 10 : i32, message = "bqd,bkd->bqk"}> : () -> ()
    %cst_44 = arith.constant dense<0.000000e+00> : vector<10x1x8xf32>
    %84 = tpu.matmul %79, %81, %cst_44 {dimension_numbers = #tpu.dot_dimension_numbers<[2], [2], [1], [1], [0, 0, 0, 1, 1, 1], [0], [0]>} : vector<10x1x8xf32>, vector<10x8x8xf32>, vector<10x1x8xf32> -> vector<10x1x8xf32>
    "tpu.trace_stop"() : () -> ()
    %cst_45 = arith.constant 0.353553385 : f32
    %85 = vector.broadcast %cst_45 : f32 to vector<10x1x8xf32>
    %86 = arith.mulf %84, %85 : vector<10x1x8xf32>
    %87 = arith.addf %86, %55 : vector<10x1x8xf32>
    %cst_46 = arith.constant dense<0xFF800000> : vector<10x1xf32>
    %88 = vector.multi_reduction <maximumf>, %87, %cst_46 [2] : vector<10x1x8xf32> to vector<10x1xf32>
    %89 = vector.shape_cast %88 : vector<10x1xf32> to vector<10x1x1xf32>
    %90 = vector.broadcast %89 : vector<10x1x1xf32> to vector<10x1x8xf32>
    %91 = arith.subf %87, %90 : vector<10x1x8xf32>
    %92 = math.exp %91 : vector<10x1x8xf32>
    %cst_47 = arith.constant dense<0.000000e+00> : vector<10x1xf32>
    %93 = vector.multi_reduction <add>, %92, %cst_47 [2] : vector<10x1x8xf32> to vector<10x1xf32>
    %94 = vector.shape_cast %93 : vector<10x1xf32> to vector<10x1x1xf32>
    %95 = tpu.reciprocal %94 {approx = true} : vector<10x1x1xf32> -> vector<10x1x1xf32>
    %96 = vector.broadcast %95 : vector<10x1x1xf32> to vector<10x1x8xf32>
    %97 = arith.mulf %92, %96 : vector<10x1x8xf32>
    "tpu.trace_start"() <{level = 10 : i32, message = "bqk,bkd->bqd"}> : () -> ()
    %cst_48 = arith.constant dense<0.000000e+00> : vector<10x1x8xf32>
    %98 = tpu.matmul %97, %83, %cst_48 {dimension_numbers = #tpu.dot_dimension_numbers<[2], [1], [1], [2], [0, 0, 0, 1, 1, 2], [0], [0]>} : vector<10x1x8xf32>, vector<10x8x8xf32>, vector<10x1x8xf32> -> vector<10x1x8xf32>
    "tpu.trace_stop"() : () -> ()
    %99 = vector.shape_cast %98 : vector<10x1x8xf32> to vector<10x8xf32>
    %100 = vector.extract_strided_slice %51 {offsets = [0, 16], sizes = [10, 8], strides = [1, 1]} : vector<10x32xf32> to vector<10x8xf32>
    %101 = vector.shape_cast %100 : vector<10x8xf32> to vector<10x1x8xf32>
    %102 = vector.extract_strided_slice %43 {offsets = [0, 16], sizes = [80, 8], strides = [1, 1]} : vector<80x64xf32> to vector<80x8xf32>
    %103 = vector.shape_cast %102 : vector<80x8xf32> to vector<10x8x8xf32>
    %104 = vector.extract_strided_slice %43 {offsets = [0, 48], sizes = [80, 8], strides = [1, 1]} : vector<80x64xf32> to vector<80x8xf32>
    %105 = vector.shape_cast %104 : vector<80x8xf32> to vector<10x8x8xf32>
    "tpu.trace_start"() <{level = 10 : i32, message = "bqd,bkd->bqk"}> : () -> ()
    %cst_49 = arith.constant dense<0.000000e+00> : vector<10x1x8xf32>
    %106 = tpu.matmul %101, %103, %cst_49 {dimension_numbers = #tpu.dot_dimension_numbers<[2], [2], [1], [1], [0, 0, 0, 1, 1, 1], [0], [0]>} : vector<10x1x8xf32>, vector<10x8x8xf32>, vector<10x1x8xf32> -> vector<10x1x8xf32>
    "tpu.trace_stop"() : () -> ()
    %cst_50 = arith.constant 0.353553385 : f32
    %107 = vector.broadcast %cst_50 : f32 to vector<10x1x8xf32>
    %108 = arith.mulf %106, %107 : vector<10x1x8xf32>
    %109 = arith.addf %108, %55 : vector<10x1x8xf32>
    %cst_51 = arith.constant dense<0xFF800000> : vector<10x1xf32>
    %110 = vector.multi_reduction <maximumf>, %109, %cst_51 [2] : vector<10x1x8xf32> to vector<10x1xf32>
    %111 = vector.shape_cast %110 : vector<10x1xf32> to vector<10x1x1xf32>
    %112 = vector.broadcast %111 : vector<10x1x1xf32> to vector<10x1x8xf32>
    %113 = arith.subf %109, %112 : vector<10x1x8xf32>
    %114 = math.exp %113 : vector<10x1x8xf32>
    %cst_52 = arith.constant dense<0.000000e+00> : vector<10x1xf32>
    %115 = vector.multi_reduction <add>, %114, %cst_52 [2] : vector<10x1x8xf32> to vector<10x1xf32>
    %116 = vector.shape_cast %115 : vector<10x1xf32> to vector<10x1x1xf32>
    %117 = tpu.reciprocal %116 {approx = true} : vector<10x1x1xf32> -> vector<10x1x1xf32>
    %118 = vector.broadcast %117 : vector<10x1x1xf32> to vector<10x1x8xf32>
    %119 = arith.mulf %114, %118 : vector<10x1x8xf32>
    "tpu.trace_start"() <{level = 10 : i32, message = "bqk,bkd->bqd"}> : () -> ()
    %cst_53 = arith.constant dense<0.000000e+00> : vector<10x1x8xf32>
    %120 = tpu.matmul %119, %105, %cst_53 {dimension_numbers = #tpu.dot_dimension_numbers<[2], [1], [1], [2], [0, 0, 0, 1, 1, 2], [0], [0]>} : vector<10x1x8xf32>, vector<10x8x8xf32>, vector<10x1x8xf32> -> vector<10x1x8xf32>
    "tpu.trace_stop"() : () -> ()
    %121 = vector.shape_cast %120 : vector<10x1x8xf32> to vector<10x8xf32>
    %122 = vector.extract_strided_slice %51 {offsets = [0, 24], sizes = [10, 8], strides = [1, 1]} : vector<10x32xf32> to vector<10x8xf32>
    %123 = vector.shape_cast %122 : vector<10x8xf32> to vector<10x1x8xf32>
    %124 = vector.extract_strided_slice %43 {offsets = [0, 24], sizes = [80, 8], strides = [1, 1]} : vector<80x64xf32> to vector<80x8xf32>
    %125 = vector.shape_cast %124 : vector<80x8xf32> to vector<10x8x8xf32>
    %126 = vector.extract_strided_slice %43 {offsets = [0, 56], sizes = [80, 8], strides = [1, 1]} : vector<80x64xf32> to vector<80x8xf32>
    %127 = vector.shape_cast %126 : vector<80x8xf32> to vector<10x8x8xf32>
    "tpu.trace_start"() <{level = 10 : i32, message = "bqd,bkd->bqk"}> : () -> ()
    %cst_54 = arith.constant dense<0.000000e+00> : vector<10x1x8xf32>
    %128 = tpu.matmul %123, %125, %cst_54 {dimension_numbers = #tpu.dot_dimension_numbers<[2], [2], [1], [1], [0, 0, 0, 1, 1, 1], [0], [0]>} : vector<10x1x8xf32>, vector<10x8x8xf32>, vector<10x1x8xf32> -> vector<10x1x8xf32>
    "tpu.trace_stop"() : () -> ()
    %cst_55 = arith.constant 0.353553385 : f32
    %129 = vector.broadcast %cst_55 : f32 to vector<10x1x8xf32>
    %130 = arith.mulf %128, %129 : vector<10x1x8xf32>
    %131 = arith.addf %130, %55 : vector<10x1x8xf32>
    %cst_56 = arith.constant dense<0xFF800000> : vector<10x1xf32>
    %132 = vector.multi_reduction <maximumf>, %131, %cst_56 [2] : vector<10x1x8xf32> to vector<10x1xf32>
    %133 = vector.shape_cast %132 : vector<10x1xf32> to vector<10x1x1xf32>
    %134 = vector.broadcast %133 : vector<10x1x1xf32> to vector<10x1x8xf32>
    %135 = arith.subf %131, %134 : vector<10x1x8xf32>
    %136 = math.exp %135 : vector<10x1x8xf32>
    %cst_57 = arith.constant dense<0.000000e+00> : vector<10x1xf32>
    %137 = vector.multi_reduction <add>, %136, %cst_57 [2] : vector<10x1x8xf32> to vector<10x1xf32>
    %138 = vector.shape_cast %137 : vector<10x1xf32> to vector<10x1x1xf32>
    %139 = tpu.reciprocal %138 {approx = true} : vector<10x1x1xf32> -> vector<10x1x1xf32>
    %140 = vector.broadcast %139 : vector<10x1x1xf32> to vector<10x1x8xf32>
    %141 = arith.mulf %136, %140 : vector<10x1x8xf32>
    "tpu.trace_start"() <{level = 10 : i32, message = "bqk,bkd->bqd"}> : () -> ()
    %cst_58 = arith.constant dense<0.000000e+00> : vector<10x1x8xf32>
    %142 = tpu.matmul %141, %127, %cst_58 {dimension_numbers = #tpu.dot_dimension_numbers<[2], [1], [1], [2], [0, 0, 0, 1, 1, 2], [0], [0]>} : vector<10x1x8xf32>, vector<10x8x8xf32>, vector<10x1x8xf32> -> vector<10x1x8xf32>
    "tpu.trace_stop"() : () -> ()
    %143 = vector.shape_cast %142 : vector<10x1x8xf32> to vector<10x8xf32>
    %144 = tpu.concatenate %77, %99, %121, %143 in 1 : vector<10x8xf32>, vector<10x8xf32>, vector<10x8xf32>, vector<10x8xf32> -> vector<10x32xf32>
    %cst_59 = arith.constant dense<0.000000e+00> : vector<10x32xf32>
    %145 = tpu.matmul %144, %9, %cst_59 {dimension_numbers = #tpu.dot_dimension_numbers<[1], [0], [0], [1], [0, 0, 1, 1], [], []>} : vector<10x32xf32>, vector<32x32xf32>, vector<10x32xf32> -> vector<10x32xf32>
    %146 = vector.broadcast %10 : vector<1x32xf32> to vector<10x32xf32>
    %147 = arith.addf %145, %146 : vector<10x32xf32>
    %148 = arith.addf %54, %147 : vector<10x32xf32>
    %cst_60 = arith.constant dense<0.000000e+00> : vector<10xf32>
    %149 = vector.multi_reduction <add>, %148, %cst_60 [1] : vector<10x32xf32> to vector<10xf32>
    %150 = vector.shape_cast %149 : vector<10xf32> to vector<10x1xf32>
    %cst_61 = arith.constant 3.200000e+01 : f32
    %151 = vector.broadcast %cst_61 : f32 to vector<10x1xf32>
    %152 = arith.divf %150, %151 : vector<10x1xf32>
    %153 = vector.broadcast %152 : vector<10x1xf32> to vector<10x32xf32>
    %154 = arith.subf %148, %153 : vector<10x32xf32>
    %155 = arith.mulf %154, %154 : vector<10x32xf32>
    %cst_62 = arith.constant dense<0.000000e+00> : vector<10xf32>
    %156 = vector.multi_reduction <add>, %155, %cst_62 [1] : vector<10x32xf32> to vector<10xf32>
    %157 = vector.shape_cast %156 : vector<10xf32> to vector<10x1xf32>
    %cst_63 = arith.constant 3.200000e+01 : f32
    %158 = vector.broadcast %cst_63 : f32 to vector<10x1xf32>
    %159 = arith.divf %157, %158 : vector<10x1xf32>
    %160 = vector.broadcast %152 : vector<10x1xf32> to vector<10x32xf32>
    %161 = arith.subf %148, %160 : vector<10x32xf32>
    %cst_64 = arith.constant 9.99999974E-6 : f32
    %162 = vector.broadcast %cst_64 : f32 to vector<10x1xf32>
    %163 = arith.addf %159, %162 : vector<10x1xf32>
    %164 = math.rsqrt %163 : vector<10x1xf32>
    %165 = vector.broadcast %164 : vector<10x1xf32> to vector<10x32xf32>
    %166 = arith.mulf %161, %165 : vector<10x32xf32>
    %167 = vector.broadcast %11 : vector<1x32xf32> to vector<10x32xf32>
    %168 = arith.mulf %166, %167 : vector<10x32xf32>
    %169 = vector.broadcast %12 : vector<1x32xf32> to vector<10x32xf32>
    %170 = arith.addf %168, %169 : vector<10x32xf32>
    %cst_65 = arith.constant dense<0.000000e+00> : vector<10x128xf32>
    %171 = tpu.matmul %170, %13, %cst_65 {dimension_numbers = #tpu.dot_dimension_numbers<[1], [0], [0], [1], [0, 0, 1, 1], [], []>} : vector<10x32xf32>, vector<32x128xf32>, vector<10x128xf32> -> vector<10x128xf32>
    %172 = vector.broadcast %14 : vector<1x128xf32> to vector<10x128xf32>
    %173 = arith.addf %171, %172 : vector<10x128xf32>
    %cst_66 = arith.constant 5.000000e-01 : f32
    %174 = vector.broadcast %cst_66 : f32 to vector<10x128xf32>
    %175 = arith.mulf %174, %173 : vector<10x128xf32>
    %cst_67 = arith.constant 4.471500e-02 : f32
    %176 = vector.broadcast %cst_67 : f32 to vector<10x128xf32>
    %177 = arith.mulf %176, %173 : vector<10x128xf32>
    %178 = arith.mulf %177, %173 : vector<10x128xf32>
    %179 = arith.mulf %178, %173 : vector<10x128xf32>
    %180 = arith.addf %173, %179 : vector<10x128xf32>
    %cst_68 = arith.constant 0.797884583 : f32
    %181 = vector.broadcast %cst_68 : f32 to vector<10x128xf32>
    %182 = arith.mulf %181, %180 : vector<10x128xf32>
    %183 = math.tanh %182 : vector<10x128xf32>
    %cst_69 = arith.constant 1.000000e+00 : f32
    %184 = vector.broadcast %cst_69 : f32 to vector<10x128xf32>
    %185 = arith.addf %184, %183 : vector<10x128xf32>
    %186 = arith.mulf %175, %185 : vector<10x128xf32>
    %cst_70 = arith.constant dense<0.000000e+00> : vector<10x32xf32>
    %187 = tpu.matmul %186, %15, %cst_70 {dimension_numbers = #tpu.dot_dimension_numbers<[1], [0], [0], [1], [0, 0, 1, 1], [], []>} : vector<10x128xf32>, vector<128x32xf32>, vector<10x32xf32> -> vector<10x32xf32>
    %188 = vector.broadcast %16 : vector<1x32xf32> to vector<10x32xf32>
    %189 = arith.addf %187, %188 : vector<10x32xf32>
    %190 = arith.addf %148, %189 : vector<10x32xf32>
    %cst_71 = arith.constant dense<0.000000e+00> : vector<10xf32>
    %191 = vector.multi_reduction <add>, %190, %cst_71 [1] : vector<10x32xf32> to vector<10xf32>
    %192 = vector.shape_cast %191 : vector<10xf32> to vector<10x1xf32>
    %cst_72 = arith.constant 3.200000e+01 : f32
    %193 = vector.broadcast %cst_72 : f32 to vector<10x1xf32>
    %194 = arith.divf %192, %193 : vector<10x1xf32>
    %195 = vector.broadcast %194 : vector<10x1xf32> to vector<10x32xf32>
    %196 = arith.subf %190, %195 : vector<10x32xf32>
    %197 = arith.mulf %196, %196 : vector<10x32xf32>
    %cst_73 = arith.constant dense<0.000000e+00> : vector<10xf32>
    %198 = vector.multi_reduction <add>, %197, %cst_73 [1] : vector<10x32xf32> to vector<10xf32>
    %199 = vector.shape_cast %198 : vector<10xf32> to vector<10x1xf32>
    %cst_74 = arith.constant 3.200000e+01 : f32
    %200 = vector.broadcast %cst_74 : f32 to vector<10x1xf32>
    %201 = arith.divf %199, %200 : vector<10x1xf32>
    %202 = vector.broadcast %194 : vector<10x1xf32> to vector<10x32xf32>
    %203 = arith.subf %190, %202 : vector<10x32xf32>
    %cst_75 = arith.constant 9.99999974E-6 : f32
    %204 = vector.broadcast %cst_75 : f32 to vector<10x1xf32>
    %205 = arith.addf %201, %204 : vector<10x1xf32>
    %206 = math.rsqrt %205 : vector<10x1xf32>
    %207 = vector.broadcast %206 : vector<10x1xf32> to vector<10x32xf32>
    %208 = arith.mulf %203, %207 : vector<10x32xf32>
    %209 = vector.broadcast %0 : vector<1x32xf32> to vector<10x32xf32>
    %210 = arith.mulf %208, %209 : vector<10x32xf32>
    %211 = vector.broadcast %1 : vector<1x32xf32> to vector<10x32xf32>
    %212 = arith.addf %210, %211 : vector<10x32xf32>
    %c0_76 = arith.constant 0 : index
    %c0_77 = arith.constant 0 : index
    %213 = vector.load %arg16[%c0_76, %c0_77] : memref<10x32xf32, #tpu.memory_space<vmem>>, vector<10x32xf32>
    tpu.vector_store %arg16[%c0_76, %c0_77], %212 {strides = array<i32>} : memref<10x32xf32, #tpu.memory_space<vmem>>, vector<10x32xf32>,
    return
  }
}

module attributes {stable_mosaic.version = 11 : i64} {
  func.func @_head_kernel(%arg0: memref<2x32xf32, #tpu.memory_space<vmem>>, %arg1: memref<2x4x32xf32, #tpu.memory_space<vmem>>, %arg2: memref<32x24xf32, #tpu.memory_space<vmem>>, %arg3: memref<1x24xf32, #tpu.memory_space<vmem>>, %arg4: memref<1x32x8xf32, #tpu.memory_space<vmem>>, %arg5: memref<1x8xf32, #tpu.memory_space<vmem>>, %arg6: memref<2x32x8xf32, #tpu.memory_space<vmem>>, %arg7: memref<1x8xf32, #tpu.memory_space<vmem>>, %arg8: memref<3x32x8xf32, #tpu.memory_space<vmem>>, %arg9: memref<1x8xf32, #tpu.memory_space<vmem>>, %arg10: memref<48x16xf32, #tpu.memory_space<vmem>>, %arg11: memref<1x16xf32, #tpu.memory_space<vmem>>, %arg12: memref<16x1xf32, #tpu.memory_space<vmem>>, %arg13: memref<1x1xf32, #tpu.memory_space<vmem>>, %arg14: memref<2x1xf32, #tpu.memory_space<vmem>>) attributes {dimension_semantics = [], scalar_prefetch = 0 : i64, scratch_operands = 0 : i64, tpu.core_type = #tpu.core_type<tc>} {
    %c0 = arith.constant 0 : index
    %c0_0 = arith.constant 0 : index
    %0 = vector.load %arg10[%c0, %c0_0] : memref<48x16xf32, #tpu.memory_space<vmem>>, vector<48x16xf32>
    %c0_1 = arith.constant 0 : index
    %c0_2 = arith.constant 0 : index
    %1 = vector.load %arg11[%c0_1, %c0_2] : memref<1x16xf32, #tpu.memory_space<vmem>>, vector<1x16xf32>
    %c0_3 = arith.constant 0 : index
    %c0_4 = arith.constant 0 : index
    %2 = vector.load %arg12[%c0_3, %c0_4] : memref<16x1xf32, #tpu.memory_space<vmem>>, vector<16x1xf32>
    %c0_5 = arith.constant 0 : index
    %c0_6 = arith.constant 0 : index
    %3 = vector.load %arg13[%c0_5, %c0_6] : memref<1x1xf32, #tpu.memory_space<vmem>>, vector<1x1xf32>
    %c0_7 = arith.constant 0 : index
    %c0_8 = arith.constant 0 : index
    %4 = vector.load %arg0[%c0_7, %c0_8] : memref<2x32xf32, #tpu.memory_space<vmem>>, vector<2x32xf32>
    %c0_9 = arith.constant 0 : index
    %c0_10 = arith.constant 0 : index
    %c0_11 = arith.constant 0 : index
    %5 = vector.load %arg1[%c0_9, %c0_10, %c0_11] : memref<2x4x32xf32, #tpu.memory_space<vmem>>, vector<2x4x32xf32>
    %c0_12 = arith.constant 0 : index
    %c0_13 = arith.constant 0 : index
    %6 = vector.load %arg2[%c0_12, %c0_13] : memref<32x24xf32, #tpu.memory_space<vmem>>, vector<32x24xf32>
    %cst = arith.constant dense<0.000000e+00> : vector<2x24xf32>
    %7 = tpu.matmul %4, %6, %cst {dimension_numbers = #tpu.dot_dimension_numbers<[1], [0], [0], [1], [0, 0, 1, 1], [], []>} : vector<2x32xf32>, vector<32x24xf32>, vector<2x24xf32> -> vector<2x24xf32>
    %c0_14 = arith.constant 0 : index
    %c0_15 = arith.constant 0 : index
    %8 = vector.load %arg3[%c0_14, %c0_15] : memref<1x24xf32, #tpu.memory_space<vmem>>, vector<1x24xf32>
    %9 = vector.broadcast %8 : vector<1x24xf32> to vector<2x24xf32>
    %10 = arith.addf %7, %9 : vector<2x24xf32>
    %c0_16 = arith.constant 0 : index
    %c0_17 = arith.constant 0 : index
    %c0_18 = arith.constant 0 : index
    %11 = vector.load %arg4[%c0_16, %c0_17, %c0_18] : memref<1x32x8xf32, #tpu.memory_space<vmem>>, vector<1x32x8xf32>
    %c0_19 = arith.constant 0 : index
    %c0_20 = arith.constant 0 : index
    %12 = vector.load %arg5[%c0_19, %c0_20] : memref<1x8xf32, #tpu.memory_space<vmem>>, vector<1x8xf32>
    %13 = vector.extract_strided_slice %5 {offsets = [0, 0, 0], sizes = [2, 1, 32], strides = [1, 1, 1]} : vector<2x4x32xf32> to vector<2x1x32xf32>
    %14 = vector.shape_cast %13 : vector<2x1x32xf32> to vector<2x32xf32>
    %15 = vector.shape_cast %11 : vector<1x32x8xf32> to vector<32x8xf32>
    %cst_21 = arith.constant dense<0.000000e+00> : vector<2x8xf32>
    %16 = tpu.matmul %14, %15, %cst_21 {dimension_numbers = #tpu.dot_dimension_numbers<[1], [0], [0], [1], [0, 0, 1, 1], [], []>} : vector<2x32xf32>, vector<32x8xf32>, vector<2x8xf32> -> vector<2x8xf32>
    %17 = vector.broadcast %12 : vector<1x8xf32> to vector<2x8xf32>
    %18 = arith.addf %17, %16 : vector<2x8xf32>
    %cst_22 = arith.constant 0.000000e+00 : f32
    %19 = vector.broadcast %cst_22 : f32 to vector<2x8xf32>
    %20 = arith.maximumf %18, %19 : vector<2x8xf32>
    %21 = vector.extract_strided_slice %5 {offsets = [0, 1, 0], sizes = [2, 1, 32], strides = [1, 1, 1]} : vector<2x4x32xf32> to vector<2x1x32xf32>
    %22 = vector.shape_cast %21 : vector<2x1x32xf32> to vector<2x32xf32>
    %23 = vector.shape_cast %11 : vector<1x32x8xf32> to vector<32x8xf32>
    %cst_23 = arith.constant dense<0.000000e+00> : vector<2x8xf32>
    %24 = tpu.matmul %22, %23, %cst_23 {dimension_numbers = #tpu.dot_dimension_numbers<[1], [0], [0], [1], [0, 0, 1, 1], [], []>} : vector<2x32xf32>, vector<32x8xf32>, vector<2x8xf32> -> vector<2x8xf32>
    %25 = vector.broadcast %12 : vector<1x8xf32> to vector<2x8xf32>
    %26 = arith.addf %25, %24 : vector<2x8xf32>
    %cst_24 = arith.constant 0.000000e+00 : f32
    %27 = vector.broadcast %cst_24 : f32 to vector<2x8xf32>
    %28 = arith.maximumf %26, %27 : vector<2x8xf32>
    %29 = arith.maximumf %20, %28 : vector<2x8xf32>
    %30 = vector.extract_strided_slice %5 {offsets = [0, 2, 0], sizes = [2, 1, 32], strides = [1, 1, 1]} : vector<2x4x32xf32> to vector<2x1x32xf32>
    %31 = vector.shape_cast %30 : vector<2x1x32xf32> to vector<2x32xf32>
    %32 = vector.shape_cast %11 : vector<1x32x8xf32> to vector<32x8xf32>
    %cst_25 = arith.constant dense<0.000000e+00> : vector<2x8xf32>
    %33 = tpu.matmul %31, %32, %cst_25 {dimension_numbers = #tpu.dot_dimension_numbers<[1], [0], [0], [1], [0, 0, 1, 1], [], []>} : vector<2x32xf32>, vector<32x8xf32>, vector<2x8xf32> -> vector<2x8xf32>
    %34 = vector.broadcast %12 : vector<1x8xf32> to vector<2x8xf32>
    %35 = arith.addf %34, %33 : vector<2x8xf32>
    %cst_26 = arith.constant 0.000000e+00 : f32
    %36 = vector.broadcast %cst_26 : f32 to vector<2x8xf32>
    %37 = arith.maximumf %35, %36 : vector<2x8xf32>
    %38 = arith.maximumf %29, %37 : vector<2x8xf32>
    %39 = vector.extract_strided_slice %5 {offsets = [0, 3, 0], sizes = [2, 1, 32], strides = [1, 1, 1]} : vector<2x4x32xf32> to vector<2x1x32xf32>
    %40 = vector.shape_cast %39 : vector<2x1x32xf32> to vector<2x32xf32>
    %41 = vector.shape_cast %11 : vector<1x32x8xf32> to vector<32x8xf32>
    %cst_27 = arith.constant dense<0.000000e+00> : vector<2x8xf32>
    %42 = tpu.matmul %40, %41, %cst_27 {dimension_numbers = #tpu.dot_dimension_numbers<[1], [0], [0], [1], [0, 0, 1, 1], [], []>} : vector<2x32xf32>, vector<32x8xf32>, vector<2x8xf32> -> vector<2x8xf32>
    %43 = vector.broadcast %12 : vector<1x8xf32> to vector<2x8xf32>
    %44 = arith.addf %43, %42 : vector<2x8xf32>
    %cst_28 = arith.constant 0.000000e+00 : f32
    %45 = vector.broadcast %cst_28 : f32 to vector<2x8xf32>
    %46 = arith.maximumf %44, %45 : vector<2x8xf32>
    %47 = arith.maximumf %38, %46 : vector<2x8xf32>
    %c0_29 = arith.constant 0 : index
    %c0_30 = arith.constant 0 : index
    %c0_31 = arith.constant 0 : index
    %48 = vector.load %arg6[%c0_29, %c0_30, %c0_31] : memref<2x32x8xf32, #tpu.memory_space<vmem>>, vector<2x32x8xf32>
    %c0_32 = arith.constant 0 : index
    %c0_33 = arith.constant 0 : index
    %49 = vector.load %arg7[%c0_32, %c0_33] : memref<1x8xf32, #tpu.memory_space<vmem>>, vector<1x8xf32>
    %50 = vector.extract_strided_slice %5 {offsets = [0, 0, 0], sizes = [2, 1, 32], strides = [1, 1, 1]} : vector<2x4x32xf32> to vector<2x1x32xf32>
    %51 = vector.shape_cast %50 : vector<2x1x32xf32> to vector<2x32xf32>
    %52 = vector.extract_strided_slice %48 {offsets = [0, 0, 0], sizes = [1, 32, 8], strides = [1, 1, 1]} : vector<2x32x8xf32> to vector<1x32x8xf32>
    %53 = vector.shape_cast %52 : vector<1x32x8xf32> to vector<32x8xf32>
    %cst_34 = arith.constant dense<0.000000e+00> : vector<2x8xf32>
    %54 = tpu.matmul %51, %53, %cst_34 {dimension_numbers = #tpu.dot_dimension_numbers<[1], [0], [0], [1], [0, 0, 1, 1], [], []>} : vector<2x32xf32>, vector<32x8xf32>, vector<2x8xf32> -> vector<2x8xf32>
    %55 = vector.broadcast %49 : vector<1x8xf32> to vector<2x8xf32>
    %56 = arith.addf %55, %54 : vector<2x8xf32>
    %57 = vector.extract_strided_slice %5 {offsets = [0, 1, 0], sizes = [2, 1, 32], strides = [1, 1, 1]} : vector<2x4x32xf32> to vector<2x1x32xf32>
    %58 = vector.shape_cast %57 : vector<2x1x32xf32> to vector<2x32xf32>
    %59 = vector.extract_strided_slice %48 {offsets = [1, 0, 0], sizes = [1, 32, 8], strides = [1, 1, 1]} : vector<2x32x8xf32> to vector<1x32x8xf32>
    %60 = vector.shape_cast %59 : vector<1x32x8xf32> to vector<32x8xf32>
    %cst_35 = arith.constant dense<0.000000e+00> : vector<2x8xf32>
    %61 = tpu.matmul %58, %60, %cst_35 {dimension_numbers = #tpu.dot_dimension_numbers<[1], [0], [0], [1], [0, 0, 1, 1], [], []>} : vector<2x32xf32>, vector<32x8xf32>, vector<2x8xf32> -> vector<2x8xf32>
    %62 = arith.addf %56, %61 : vector<2x8xf32>
    %cst_36 = arith.constant 0.000000e+00 : f32
    %63 = vector.broadcast %cst_36 : f32 to vector<2x8xf32>
    %64 = arith.maximumf %62, %63 : vector<2x8xf32>
    %65 = vector.extract_strided_slice %5 {offsets = [0, 1, 0], sizes = [2, 1, 32], strides = [1, 1, 1]} : vector<2x4x32xf32> to vector<2x1x32xf32>
    %66 = vector.shape_cast %65 : vector<2x1x32xf32> to vector<2x32xf32>
    %67 = vector.extract_strided_slice %48 {offsets = [0, 0, 0], sizes = [1, 32, 8], strides = [1, 1, 1]} : vector<2x32x8xf32> to vector<1x32x8xf32>
    %68 = vector.shape_cast %67 : vector<1x32x8xf32> to vector<32x8xf32>
    %cst_37 = arith.constant dense<0.000000e+00> : vector<2x8xf32>
    %69 = tpu.matmul %66, %68, %cst_37 {dimension_numbers = #tpu.dot_dimension_numbers<[1], [0], [0], [1], [0, 0, 1, 1], [], []>} : vector<2x32xf32>, vector<32x8xf32>, vector<2x8xf32> -> vector<2x8xf32>
    %70 = vector.broadcast %49 : vector<1x8xf32> to vector<2x8xf32>
    %71 = arith.addf %70, %69 : vector<2x8xf32>
    %72 = vector.extract_strided_slice %5 {offsets = [0, 2, 0], sizes = [2, 1, 32], strides = [1, 1, 1]} : vector<2x4x32xf32> to vector<2x1x32xf32>
    %73 = vector.shape_cast %72 : vector<2x1x32xf32> to vector<2x32xf32>
    %74 = vector.extract_strided_slice %48 {offsets = [1, 0, 0], sizes = [1, 32, 8], strides = [1, 1, 1]} : vector<2x32x8xf32> to vector<1x32x8xf32>
    %75 = vector.shape_cast %74 : vector<1x32x8xf32> to vector<32x8xf32>
    %cst_38 = arith.constant dense<0.000000e+00> : vector<2x8xf32>
    %76 = tpu.matmul %73, %75, %cst_38 {dimension_numbers = #tpu.dot_dimension_numbers<[1], [0], [0], [1], [0, 0, 1, 1], [], []>} : vector<2x32xf32>, vector<32x8xf32>, vector<2x8xf32> -> vector<2x8xf32>
    %77 = arith.addf %71, %76 : vector<2x8xf32>
    %cst_39 = arith.constant 0.000000e+00 : f32
    %78 = vector.broadcast %cst_39 : f32 to vector<2x8xf32>
    %79 = arith.maximumf %77, %78 : vector<2x8xf32>
    %80 = arith.maximumf %64, %79 : vector<2x8xf32>
    %81 = vector.extract_strided_slice %5 {offsets = [0, 2, 0], sizes = [2, 1, 32], strides = [1, 1, 1]} : vector<2x4x32xf32> to vector<2x1x32xf32>
    %82 = vector.shape_cast %81 : vector<2x1x32xf32> to vector<2x32xf32>
    %83 = vector.extract_strided_slice %48 {offsets = [0, 0, 0], sizes = [1, 32, 8], strides = [1, 1, 1]} : vector<2x32x8xf32> to vector<1x32x8xf32>
    %84 = vector.shape_cast %83 : vector<1x32x8xf32> to vector<32x8xf32>
    %cst_40 = arith.constant dense<0.000000e+00> : vector<2x8xf32>
    %85 = tpu.matmul %82, %84, %cst_40 {dimension_numbers = #tpu.dot_dimension_numbers<[1], [0], [0], [1], [0, 0, 1, 1], [], []>} : vector<2x32xf32>, vector<32x8xf32>, vector<2x8xf32> -> vector<2x8xf32>
    %86 = vector.broadcast %49 : vector<1x8xf32> to vector<2x8xf32>
    %87 = arith.addf %86, %85 : vector<2x8xf32>
    %88 = vector.extract_strided_slice %5 {offsets = [0, 3, 0], sizes = [2, 1, 32], strides = [1, 1, 1]} : vector<2x4x32xf32> to vector<2x1x32xf32>
    %89 = vector.shape_cast %88 : vector<2x1x32xf32> to vector<2x32xf32>
    %90 = vector.extract_strided_slice %48 {offsets = [1, 0, 0], sizes = [1, 32, 8], strides = [1, 1, 1]} : vector<2x32x8xf32> to vector<1x32x8xf32>
    %91 = vector.shape_cast %90 : vector<1x32x8xf32> to vector<32x8xf32>
    %cst_41 = arith.constant dense<0.000000e+00> : vector<2x8xf32>
    %92 = tpu.matmul %89, %91, %cst_41 {dimension_numbers = #tpu.dot_dimension_numbers<[1], [0], [0], [1], [0, 0, 1, 1], [], []>} : vector<2x32xf32>, vector<32x8xf32>, vector<2x8xf32> -> vector<2x8xf32>
    %93 = arith.addf %87, %92 : vector<2x8xf32>
    %cst_42 = arith.constant 0.000000e+00 : f32
    %94 = vector.broadcast %cst_42 : f32 to vector<2x8xf32>
    %95 = arith.maximumf %93, %94 : vector<2x8xf32>
    %96 = arith.maximumf %80, %95 : vector<2x8xf32>
    %c0_43 = arith.constant 0 : index
    %c0_44 = arith.constant 0 : index
    %c0_45 = arith.constant 0 : index
    %97 = vector.load %arg8[%c0_43, %c0_44, %c0_45] : memref<3x32x8xf32, #tpu.memory_space<vmem>>, vector<3x32x8xf32>
    %c0_46 = arith.constant 0 : index
    %c0_47 = arith.constant 0 : index
    %98 = vector.load %arg9[%c0_46, %c0_47] : memref<1x8xf32, #tpu.memory_space<vmem>>, vector<1x8xf32>
    %99 = vector.extract_strided_slice %5 {offsets = [0, 0, 0], sizes = [2, 1, 32], strides = [1, 1, 1]} : vector<2x4x32xf32> to vector<2x1x32xf32>
    %100 = vector.shape_cast %99 : vector<2x1x32xf32> to vector<2x32xf32>
    %101 = vector.extract_strided_slice %97 {offsets = [0, 0, 0], sizes = [1, 32, 8], strides = [1, 1, 1]} : vector<3x32x8xf32> to vector<1x32x8xf32>
    %102 = vector.shape_cast %101 : vector<1x32x8xf32> to vector<32x8xf32>
    %cst_48 = arith.constant dense<0.000000e+00> : vector<2x8xf32>
    %103 = tpu.matmul %100, %102, %cst_48 {dimension_numbers = #tpu.dot_dimension_numbers<[1], [0], [0], [1], [0, 0, 1, 1], [], []>} : vector<2x32xf32>, vector<32x8xf32>, vector<2x8xf32> -> vector<2x8xf32>
    %104 = vector.broadcast %98 : vector<1x8xf32> to vector<2x8xf32>
    %105 = arith.addf %104, %103 : vector<2x8xf32>
    %106 = vector.extract_strided_slice %5 {offsets = [0, 1, 0], sizes = [2, 1, 32], strides = [1, 1, 1]} : vector<2x4x32xf32> to vector<2x1x32xf32>
    %107 = vector.shape_cast %106 : vector<2x1x32xf32> to vector<2x32xf32>
    %108 = vector.extract_strided_slice %97 {offsets = [1, 0, 0], sizes = [1, 32, 8], strides = [1, 1, 1]} : vector<3x32x8xf32> to vector<1x32x8xf32>
    %109 = vector.shape_cast %108 : vector<1x32x8xf32> to vector<32x8xf32>
    %cst_49 = arith.constant dense<0.000000e+00> : vector<2x8xf32>
    %110 = tpu.matmul %107, %109, %cst_49 {dimension_numbers = #tpu.dot_dimension_numbers<[1], [0], [0], [1], [0, 0, 1, 1], [], []>} : vector<2x32xf32>, vector<32x8xf32>, vector<2x8xf32> -> vector<2x8xf32>
    %111 = arith.addf %105, %110 : vector<2x8xf32>
    %112 = vector.extract_strided_slice %5 {offsets = [0, 2, 0], sizes = [2, 1, 32], strides = [1, 1, 1]} : vector<2x4x32xf32> to vector<2x1x32xf32>
    %113 = vector.shape_cast %112 : vector<2x1x32xf32> to vector<2x32xf32>
    %114 = vector.extract_strided_slice %97 {offsets = [2, 0, 0], sizes = [1, 32, 8], strides = [1, 1, 1]} : vector<3x32x8xf32> to vector<1x32x8xf32>
    %115 = vector.shape_cast %114 : vector<1x32x8xf32> to vector<32x8xf32>
    %cst_50 = arith.constant dense<0.000000e+00> : vector<2x8xf32>
    %116 = tpu.matmul %113, %115, %cst_50 {dimension_numbers = #tpu.dot_dimension_numbers<[1], [0], [0], [1], [0, 0, 1, 1], [], []>} : vector<2x32xf32>, vector<32x8xf32>, vector<2x8xf32> -> vector<2x8xf32>
    %117 = arith.addf %111, %116 : vector<2x8xf32>
    %cst_51 = arith.constant 0.000000e+00 : f32
    %118 = vector.broadcast %cst_51 : f32 to vector<2x8xf32>
    %119 = arith.maximumf %117, %118 : vector<2x8xf32>
    %120 = vector.extract_strided_slice %5 {offsets = [0, 1, 0], sizes = [2, 1, 32], strides = [1, 1, 1]} : vector<2x4x32xf32> to vector<2x1x32xf32>
    %121 = vector.shape_cast %120 : vector<2x1x32xf32> to vector<2x32xf32>
    %122 = vector.extract_strided_slice %97 {offsets = [0, 0, 0], sizes = [1, 32, 8], strides = [1, 1, 1]} : vector<3x32x8xf32> to vector<1x32x8xf32>
    %123 = vector.shape_cast %122 : vector<1x32x8xf32> to vector<32x8xf32>
    %cst_52 = arith.constant dense<0.000000e+00> : vector<2x8xf32>
    %124 = tpu.matmul %121, %123, %cst_52 {dimension_numbers = #tpu.dot_dimension_numbers<[1], [0], [0], [1], [0, 0, 1, 1], [], []>} : vector<2x32xf32>, vector<32x8xf32>, vector<2x8xf32> -> vector<2x8xf32>
    %125 = vector.broadcast %98 : vector<1x8xf32> to vector<2x8xf32>
    %126 = arith.addf %125, %124 : vector<2x8xf32>
    %127 = vector.extract_strided_slice %5 {offsets = [0, 2, 0], sizes = [2, 1, 32], strides = [1, 1, 1]} : vector<2x4x32xf32> to vector<2x1x32xf32>
    %128 = vector.shape_cast %127 : vector<2x1x32xf32> to vector<2x32xf32>
    %129 = vector.extract_strided_slice %97 {offsets = [1, 0, 0], sizes = [1, 32, 8], strides = [1, 1, 1]} : vector<3x32x8xf32> to vector<1x32x8xf32>
    %130 = vector.shape_cast %129 : vector<1x32x8xf32> to vector<32x8xf32>
    %cst_53 = arith.constant dense<0.000000e+00> : vector<2x8xf32>
    %131 = tpu.matmul %128, %130, %cst_53 {dimension_numbers = #tpu.dot_dimension_numbers<[1], [0], [0], [1], [0, 0, 1, 1], [], []>} : vector<2x32xf32>, vector<32x8xf32>, vector<2x8xf32> -> vector<2x8xf32>
    %132 = arith.addf %126, %131 : vector<2x8xf32>
    %133 = vector.extract_strided_slice %5 {offsets = [0, 3, 0], sizes = [2, 1, 32], strides = [1, 1, 1]} : vector<2x4x32xf32> to vector<2x1x32xf32>
    %134 = vector.shape_cast %133 : vector<2x1x32xf32> to vector<2x32xf32>
    %135 = vector.extract_strided_slice %97 {offsets = [2, 0, 0], sizes = [1, 32, 8], strides = [1, 1, 1]} : vector<3x32x8xf32> to vector<1x32x8xf32>
    %136 = vector.shape_cast %135 : vector<1x32x8xf32> to vector<32x8xf32>
    %cst_54 = arith.constant dense<0.000000e+00> : vector<2x8xf32>
    %137 = tpu.matmul %134, %136, %cst_54 {dimension_numbers = #tpu.dot_dimension_numbers<[1], [0], [0], [1], [0, 0, 1, 1], [], []>} : vector<2x32xf32>, vector<32x8xf32>, vector<2x8xf32> -> vector<2x8xf32>
    %138 = arith.addf %132, %137 : vector<2x8xf32>
    %cst_55 = arith.constant 0.000000e+00 : f32
    %139 = vector.broadcast %cst_55 : f32 to vector<2x8xf32>
    %140 = arith.maximumf %138, %139 : vector<2x8xf32>
    %141 = arith.maximumf %119, %140 : vector<2x8xf32>
    %142 = tpu.concatenate %47, %96, %141 in 1 : vector<2x8xf32>, vector<2x8xf32>, vector<2x8xf32> -> vector<2x24xf32>
    %143 = tpu.concatenate %10, %142 in 1 : vector<2x24xf32>, vector<2x24xf32> -> vector<2x48xf32>
    %cst_56 = arith.constant dense<0.000000e+00> : vector<2x16xf32>
    %144 = tpu.matmul %143, %0, %cst_56 {dimension_numbers = #tpu.dot_dimension_numbers<[1], [0], [0], [1], [0, 0, 1, 1], [], []>} : vector<2x48xf32>, vector<48x16xf32>, vector<2x16xf32> -> vector<2x16xf32>
    %145 = vector.broadcast %1 : vector<1x16xf32> to vector<2x16xf32>
    %146 = arith.addf %144, %145 : vector<2x16xf32>
    %cst_57 = arith.constant 0.000000e+00 : f32
    %147 = vector.broadcast %cst_57 : f32 to vector<2x16xf32>
    %148 = arith.maximumf %146, %147 : vector<2x16xf32>
    %cst_58 = arith.constant dense<0.000000e+00> : vector<2x1xf32>
    %149 = tpu.matmul %148, %2, %cst_58 {dimension_numbers = #tpu.dot_dimension_numbers<[1], [0], [0], [1], [0, 0, 1, 1], [], []>} : vector<2x16xf32>, vector<16x1xf32>, vector<2x1xf32> -> vector<2x1xf32>
    %150 = vector.broadcast %3 : vector<1x1xf32> to vector<2x1xf32>
    %151 = arith.addf %149, %150 : vector<2x1xf32>
    %152 = arith.negf %151 : vector<2x1xf32>
    %153 = math.exp %152 : vector<2x1xf32>
    %cst_59 = arith.constant 1.000000e+00 : f32
    %154 = vector.broadcast %cst_59 : f32 to vector<2x1xf32>
    %155 = arith.addf %154, %153 : vector<2x1xf32>
    %156 = arith.divf %154, %155 : vector<2x1xf32>
    %c0_60 = arith.constant 0 : index
    %c0_61 = arith.constant 0 : index
    %157 = vector.load %arg14[%c0_60, %c0_61] : memref<2x1xf32, #tpu.memory_space<vmem>>, vector<2x1xf32>
    tpu.vector_store %arg14[%c0_60, %c0_61], %156 {strides = array<i32>} : memref<2x1xf32, #tpu.memory_space<vmem>>, vector<2x1xf32>,
    return
  }
}

</mosaic_0001>

<bundles_post_ra>
// kernel: bart4jit_forward.3
= control target key start
LH: loop header
LB: loop body
LE: loop exit
PB: predicated region body
PF: predicated region fallthrough
CT: control target
= control target key end

     0   :  { %v2027_v0 = vmov 0.0|0.0   ;;  %vm2028_vm0 = vmmov 0   ;;  %v2029_v8 = vmov 0.0   ;;  %vm155_vm1 = vcmask 1041409   ;;  %s2031_s28 = smov 16   ;;  %s2372_s2 = inlined_call_operand.vmem [shape: f32[32,24], index: 2, kind: input, shape index: {}]   ;;  %s2373_s4 = inlined_call_operand.vmem [shape: f32[1,32,8], index: 4, kind: input, shape index: {}]   ;;  %s2374_s1 = inlined_call_operand.vmem [shape: f32[2,4,32], index: 1, kind: input, shape index: {}]   ;;  %s2375_s0 = inlined_call_operand.vmem [shape: f32[2,32], index: 0, kind: input, shape index: {}]   ;;  %s2376_s6 = inlined_call_operand.vmem [shape: f32[2,32,8], index: 6, kind: input, shape index: {}]   ;;  %s2377_s8 = inlined_call_operand.vmem [shape: f32[3,32,8], index: 8, kind: input, shape index: {}]   ;;  %s2378_s5 = inlined_call_operand.vmem [shape: f32[1,8], index: 5, kind: input, shape index: {}]   ;;  %s2379_s7 = inlined_call_operand.vmem [shape: f32[1,8], index: 7, kind: input, shape index: {}]   ;;  %s2380_s9 = inlined_call_operand.vmem [shape: f32[1,8], index: 9, kind: input, shape index: {}]   ;;  %s2381_s10 = inlined_call_operand.vmem [shape: f32[48,16], index: 10, kind: input, shape index: {}]   ;;  %s2382_s3 = inlined_call_operand.vmem [shape: f32[1,24], index: 3, kind: input, shape index: {}]   ;;  %s2383_s12 = inlined_call_operand.vmem [shape: f32[16,1], index: 12, kind: input, shape index: {}]   ;;  %s2384_s13 = inlined_call_operand.<no memory space> [shape: f32[1,1], index: 13, kind: input, shape index: {}]   ;;  %s2385_s11 = inlined_call_operand.vmem [shape: f32[1,16], index: 11, kind: input, shape index: {}]   ;;  %s2386_s14 = inlined_call_operand.vmem [shape: f32[2,1], index: 14, kind: output, shape index: {}]  }
   0x1   :  { %1884 = vmatprep.subr.bf16.mxu0 %v2027_v0  ;;  %1890 = vmatprep.subr.bf16.mxu1 %v2027_v0  ;;  %v62_v1 = vld [vmem:[%s2372_s2] sm:$0xff]  ;;  %v63_v2 = vld [vmem:[%s2372_s2 + $0x8] sm:$0xff]  ;;  %v64_v6 = vld [vmem:[%s2372_s2 + $0x10] sm:$0xff]  ;;  %vm73_vm2 = vcmask 261120   ;;  %vm1372_vm3 = vcmask 64512   ;;  %vm1374_vm4 = vcmask 130048  }
   0x2   :  { %v147_v3 = vld [vmem:[%s2373_s4] sm:$0xff]  ;;  %v1885_v4 = vpack.c.bf16 %v63_v2, %v62_v1  ;;  %v148_v5 = vld [vmem:[%s2373_s4 + $0x8] sm:$0xff]  ;;  %v65_v7 = vld [vmem:[%s2372_s2 + $0x18] sm:$0xff]  ;;  %1694 = vmatprep.mubr.msk.f32.mxu1 %vm2028_vm0, %v2029_v8  ;;  %1683 = vmatprep.mubr.msk.f32.mxu0 %vm2028_vm0, %v2029_v8  ;;  %vm1380_vm5 = vcmask 195584   ;;  %vm1388_vm6 = vcmask 392192   ;;  %vm1548_vm7 = vcmask 1024  }
   0x3   :  { %v1891_v9 = vpack.c.bf16 %v148_v5, %v147_v3  ;;  %v149_v10 = vld [vmem:[%s2373_s4 + $0x10] sm:$0xff]  ;;  %v150_v11 = vld [vmem:[%s2373_s4 + $0x18] sm:$0xff]  ;;  %v1888_v12 = vpack.c.bf16 %v65_v7, %v64_v6  ;;  %v61_v13 = vld [vmem:[%s2374_s1 + $0x4] sm:$0xf] }
   0x4   :  { %1886 = vmatpush3.bf16.msra.mxu0 %v1885_v4  ;;  %v1894_v14 = vpack.c.bf16 %v150_v11, %v149_v10  ;;  %v154_v15 = vrot.slane %v61_v13, 7  ;;  %v60_v16 = vld [vmem:[%s2374_s1] sm:$0xf]  ;;  %v315_v21 = vrot.slane %v61_v13, 1  ;;  %v471_v23 = vld [vmem:[%s2376_s6 + $0x8] sm:$0xff]  ;;  %v472_v27 = vld [vmem:[%s2376_s6 + $0x10] sm:$0xff] }
   0x5   :  { %1892 = vmatpush3.bf16.msra.mxu1 %v1891_v9  ;;  %1887 = vmatprep.subr.bf16.mxu0 %v2027_v0  ;;  %v59_v17 = vld [vmem:[%s2375_s0] sm:$0x3]  ;;  %v237_v19 = vrot.slane %v60_v16, 1  ;;  %v314_v20 = vrot.slane %v60_v16, 2  ;;  %v473_v28 = vld [vmem:[%s2376_s6 + $0x18] sm:$0xff]  ;;  %v392_v29 = vrot.slane %v60_v16, 3 }
   0x6   :  { %1893 = vmatprep.subr.bf16.mxu1 %v2027_v0  ;;  %v2150_v18 = vsel %vm155_vm1, %v154_v15, %v60_v16  ;;  %v470_v22 = vld [vmem:[%s2376_s6] sm:$0xff]  ;;  %v393_v30 = vrot.slane %v61_v13, 2  ;;  %v1918_v31 = vpack.c.bf16 %v473_v28, %v472_v27  ;;  %v475_v33 = vld [vmem:[%s2376_s6 + $0x28] sm:$0xff]  ;;  %v476_v36 = vld [vmem:[%s2376_s6 + $0x30] sm:$0xff]  ;;  %s2030_s0 = smov 8  }
   0x7   :  { %v2170_v24 = vsel %vm155_vm1, %v61_v13, %v237_v19  ;;  %v2173_v25 = vsel %vm155_vm1, %v315_v21, %v314_v20  ;;  %v1915_v26 = vpack.c.bf16 %v471_v23, %v470_v22  ;;  %v474_v32 = vld [vmem:[%s2376_s6 + $0x20] sm:$0xff]  ;;  %v477_v37 = vld [vmem:[%s2376_s6 + $0x38] sm:$0xff]  ;;  %v917_v40 = vld [vmem:[%s2377_s8 + $0x8] sm:$0xff] }
   0x8   :  { %1889 = vmatpush3.bf16.msra.mxu0 %v1888_v12  ;;  %v2200_v34 = vsel %vm155_vm1, %v393_v30, %v392_v29  ;;  %v1921_v35 = vpack.c.bf16 %v475_v33, %v474_v32  ;;  %v1924_v38 = vpack.c.bf16 %v477_v37, %v476_v36  ;;  %v916_v39 = vld [vmem:[%s2377_s8] sm:$0xff]  ;;  %v918_v42 = vld [vmem:[%s2377_s8 + $0x10] sm:$0xff]  ;;  %v919_v43 = vld [vmem:[%s2377_s8 + $0x18] sm:$0xff] }
   0x9   :  { %1895 = vmatpush3.bf16.msra.mxu1 %v1894_v14  ;;  %1896 = vmatprep.subr.bf16.mxu0 %v2027_v0  ;;  %v1951_v41 = vpack.c.bf16 %v917_v40, %v916_v39  ;;  %v1954_v44 = vpack.c.bf16 %v919_v43, %v918_v42  ;;  %v920_v45 = vld [vmem:[%s2377_s8 + $0x20] sm:$0xff]  ;;  %v921_v46 = vld [vmem:[%s2377_s8 + $0x28] sm:$0xff]  ;;  %v922_v48 = vld [vmem:[%s2377_s8 + $0x30] sm:$0xff] }
   0xa   :  { %1902 = vmatprep.subr.bf16.mxu1 %v2027_v0  ;;  %v1957_v47 = vpack.c.bf16 %v921_v46, %v920_v45  ;;  %v923_v49 = vld [vmem:[%s2377_s8 + $0x38] sm:$0xff]  ;;  %v924_v51 = vld [vmem:[%s2377_s8 + $0x40] sm:$0xff]  ;;  %v925_v52 = vld [vmem:[%s2377_s8 + $0x48] sm:$0xff] }
   0xb   :  { %1684 = vmatmul.mubr.msk.f32.vlgmr.msra.gmra.mrb[0].mxu0 %vm73_vm2, %v59_v17  ;;  %v1960_v50 = vpack.c.bf16 %v923_v49, %v922_v48  ;;  %v1963_v53 = vpack.c.bf16 %v925_v52, %v924_v51  ;;  %v926_v54 = vld [vmem:[%s2377_s8 + $0x50] sm:$0xff]  ;;  %v927_v55 = vld [vmem:[%s2377_s8 + $0x58] sm:$0xff]  ;;  %v1557_v61 = vld [vmem:[%s2378_s5] ss:$0 sm:$0xff] }
   0xc   :  { %1695 = vmatmul.mubr.msk.f32.vlgmr.msra.gmra.mrb[0].mxu1 %vm73_vm2, %v2150_v18  ;;  %1898 = vmatpush3.bf16.msra.mxu0 %v1891_v9  ;;  %v1966_v56 = vpack.c.bf16 %v927_v55, %v926_v54  ;;  %v1569_v33 = vld [vmem:[%s2380_s9] ss:$0 sm:$0xff]  ;;  %v51_v36 = vld [vmem:[%s2381_s10 + $0x10] sm:$0xff]  ;;  %v54_v43 = vld [vmem:[%s2381_s10 + $0x28] sm:$0xff] }
   0xd   :  { %1904 = vmatpush3.bf16.msra.mxu1 %v1891_v9  ;;  %1899 = vmatprep.subr.bf16.mxu0 %v2027_v0  ;;  %v53_v42 = vld [vmem:[%s2381_s10 + $0x20] sm:$0xff] }
   0xe   :  { %1905 = vmatprep.subr.bf16.mxu1 %v2027_v0  ;;  %1705 = vmatprep.mubr.msk.f32.mxu0 %vm2028_vm0, %v2029_v8  ;;  %v1993_v48 = vpack.c.bf16 %v54_v43, %v53_v42  ;;  %v1554_v54 = vld [vmem:[%s2382_s3] ss:$0 sm:$0xff] }
   0xf   :  { %1716 = vmatprep.mubr.msk.f32.mxu1 %vm2028_vm0, %v2029_v8 }
  0x10   :  { %1901 = vmatpush3.bf16.msra.mxu0 %v1894_v14 }
  0x11   :  { %1907 = vmatpush3.bf16.msra.mxu1 %v1894_v14  ;;  %1908 = vmatprep.subr.bf16.mxu0 %v2027_v0 }
  0x12   :  { %1914 = vmatprep.subr.bf16.mxu1 %v2027_v0 }
  0x13   :  { %1706 = vmatmul.mubr.msk.f32.vlgmr.msra.gmra.mrb[2].mxu0 %vm73_vm2, %v2170_v24 }
  0x14   :  { %1717 = vmatmul.mubr.msk.f32.vlgmr.msra.gmra.mrb[2].mxu1 %vm73_vm2, %v2173_v25  ;;  %1910 = vmatpush3.bf16.msra.mxu0 %v1891_v9 }
  0x15   :  { %1916 = vmatpush3.bf16.msra.mxu1 %v1915_v26  ;;  %1911 = vmatprep.subr.bf16.mxu0 %v2027_v0 }
  0x16   :  { %1917 = vmatprep.subr.bf16.mxu1 %v2027_v0  ;;  %1727 = vmatprep.mubr.msk.f32.mxu0 %vm2028_vm0, %v2029_v8 }
  0x17   :  { %1738 = vmatprep.mubr.msk.f32.mxu1 %vm2028_vm0, %v2029_v8 }
  0x18   :  { %1913 = vmatpush3.bf16.msra.mxu0 %v1894_v14 }
  0x19   :  { %1919 = vmatpush3.bf16.msra.mxu1 %v1918_v31  ;;  %1926 = vmatprep.subr.bf16.mxu0 %v2027_v0 }
  0x1a   :  { %1920 = vmatprep.subr.bf16.mxu1 %v2027_v0 }
  0x1b   :  { %1728 = vmatmul.mubr.msk.f32.vlgmr.msra.gmra.mrb[4].mxu0 %vm73_vm2, %v2200_v34 }
  0x1c   :  { %1739 = vmatmul.mubr.msk.f32.vlgmr.msra.gmra.mrb[4].mxu1 %vm73_vm2, %v2150_v18  ;;  %1928 = vmatpush3.bf16.msra.mxu0 %v1915_v26 }
  0x1d   :  { %1922 = vmatpush3.bf16.msra.mxu1 %v1921_v35  ;;  %1929 = vmatprep.subr.bf16.mxu0 %v2027_v0 }
  0x1e   :  { %1923 = vmatprep.subr.bf16.mxu1 %v2027_v0  ;;  %1749 = vmatprep.mubr.msk.f32.mxu1 %vm2028_vm0, %v2029_v8 }
  0x1f   :  { %1760 = vmatprep.mubr.msk.f32.mxu0 %vm2028_vm0, %v2029_v8 }
  0x20   :  { %1931 = vmatpush3.bf16.msra.mxu0 %v1918_v31 }
  0x21   :  { %1925 = vmatpush3.bf16.msra.mxu1 %v1924_v38  ;;  %1932 = vmatprep.subr.bf16.mxu0 %v2027_v0 }
  0x22   :  { %1938 = vmatprep.subr.bf16.mxu1 %v2027_v0 }
  0x23   :  { %1761 = vmatmul.mubr.msk.f32.vlgmr.msra.gmra.mrb[6].mxu0 %vm73_vm2, %v2170_v24 }
  0x24   :  { %1750 = vmatmul.mubr.msk.f32.vlgmr.msra.gmra.mrb[4].mxu1 %vm73_vm2, %v2170_v24  ;;  %1934 = vmatpush3.bf16.msra.mxu0 %v1921_v35 }
  0x25   :  { %1940 = vmatpush3.bf16.msra.mxu1 %v1915_v26  ;;  %1935 = vmatprep.subr.bf16.mxu0 %v2027_v0 }
  0x26   :  { %1941 = vmatprep.subr.bf16.mxu1 %v2027_v0  ;;  %1771 = vmatprep.mubr.msk.f32.mxu0 %vm2028_vm0, %v2029_v8 }
  0x27   :  { %1782 = vmatprep.mubr.msk.f32.mxu1 %vm2028_vm0, %v2029_v8 }
  0x28   :  { %1937 = vmatpush3.bf16.msra.mxu0 %v1924_v38 }
  0x29   :  { %1943 = vmatpush3.bf16.msra.mxu1 %v1918_v31  ;;  %1950 = vmatprep.subr.bf16.mxu0 %v2027_v0 }
  0x2a   :  { %1944 = vmatprep.subr.bf16.mxu1 %v2027_v0 }
  0x2b   :  { %1772 = vmatmul.mubr.msk.f32.vlgmr.msra.gmra.mrb[6].mxu0 %vm73_vm2, %v2173_v25 }
  0x2c   :  { %1783 = vmatmul.mubr.msk.f32.vlgmr.msra.gmra.mrb[6].mxu1 %vm73_vm2, %v2173_v25  ;;  %1952 = vmatpush3.bf16.msra.mxu0 %v1951_v41 }
  0x2d   :  { %1946 = vmatpush3.bf16.msra.mxu1 %v1921_v35  ;;  %1953 = vmatprep.subr.bf16.mxu0 %v2027_v0  ;;  %v50_v35 = vld [vmem:[%s2381_s10 + $0x8] sm:$0xff] }
  0x2e   :  { %1947 = vmatprep.subr.bf16.mxu1 %v2027_v0  ;;  %1793 = vmatprep.mubr.msk.f32.mxu1 %vm2028_vm0, %v2029_v8 }
  0x2f   :  { %1804 = vmatprep.mubr.msk.f32.mxu0 %vm2028_vm0, %v2029_v8 }
  0x30   :  { %1955 = vmatpush3.bf16.msra.mxu0 %v1954_v44 }
  0x31   :  { %1949 = vmatpush3.bf16.msra.mxu1 %v1924_v38  ;;  %1956 = vmatprep.subr.bf16.mxu0 %v2027_v0  ;;  %v52_v38 = vld [vmem:[%s2381_s10 + $0x18] sm:$0xff] }
  0x32   :  { %1968 = vmatprep.subr.bf16.mxu1 %v2027_v0  ;;  %v1990_v40 = vpack.c.bf16 %v52_v38, %v51_v36 }
  0x33   :  { %1805 = vmatmul.mubr.msk.f32.vlgmr.msra.gmra.mrb[8].mxu0 %vm73_vm2, %v2150_v18  ;;  %v1562_v18 = vld [vmem:[%s2379_s7] ss:$0 sm:$0xff] }
  0x34   :  { %1794 = vmatmul.mubr.msk.f32.vlgmr.msra.gmra.mrb[6].mxu1 %vm73_vm2, %v2200_v34  ;;  %1958 = vmatpush3.bf16.msra.mxu0 %v1957_v47 }
  0x35   :  { %1970 = vmatpush3.bf16.msra.mxu1 %v1951_v41  ;;  %1959 = vmatprep.subr.bf16.mxu0 %v2027_v0 }
  0x36   :  { %1971 = vmatprep.subr.bf16.mxu1 %v2027_v0  ;;  %1815 = vmatprep.mubr.msk.f32.mxu0 %vm2028_vm0, %v2029_v8 }
  0x37   :  { %1837 = vmatprep.mubr.msk.f32.mxu1 %vm2028_vm0, %v2029_v8 }
  0x38   :  { %1961 = vmatpush3.bf16.msra.mxu0 %v1960_v50 }
  0x39   :  { %1973 = vmatpush3.bf16.msra.mxu1 %v1954_v44  ;;  %1962 = vmatprep.subr.bf16.mxu0 %v2027_v0 }
  0x3a   :  { %1974 = vmatprep.subr.bf16.mxu1 %v2027_v0 }
  0x3b   :  { %1816 = vmatmul.mubr.msk.f32.vlgmr.msra.gmra.mrb[8].mxu0 %vm73_vm2, %v2170_v24 }
  0x3c   :  { %1838 = vmatmul.mubr.msk.f32.vlgmr.msra.gmra.mrb[8].mxu1 %vm73_vm2, %v2170_v24  ;;  %1964 = vmatpush3.bf16.msra.mxu0 %v1963_v53 }
  0x3d   :  { %1976 = vmatpush3.bf16.msra.mxu1 %v1957_v47  ;;  %1965 = vmatprep.subr.bf16.mxu0 %v2027_v0 }
  0x3e   :  { %1977 = vmatprep.subr.bf16.mxu1 %v2027_v0  ;;  %1826 = vmatprep.mubr.msk.f32.mxu0 %vm2028_vm0, %v2029_v8 }
  0x3f   :  { %1848 = vmatprep.mubr.msk.f32.mxu1 %vm2028_vm0, %v2029_v8 }
  0x40   :  { %1967 = vmatpush3.bf16.msra.mxu0 %v1966_v56 }
  0x41   :  { %1979 = vmatpush3.bf16.msra.mxu1 %v1960_v50  ;;  %1986 = vmatprep.subr.bf16.mxu0 %v2027_v0 }
  0x42   :  { %1980 = vmatprep.subr.bf16.mxu1 %v2027_v0 }
  0x43   :  { %1827 = vmatmul.mubr.msk.f32.vlgmr.msra.gmra.mrb[8].mxu0 %vm73_vm2, %v2173_v25 }
  0x44   :  { %1849 = vmatmul.mubr.msk.f32.vlgmr.msra.gmra.mrb[8].mxu1 %vm73_vm2, %v2173_v25  ;;  %1874 = vmatprep.mubr.msk.f32.mxu0 %vm2028_vm0, %v2029_v8 }
  0x45   :  { %1982 = vmatpush3.bf16.msra.mxu1 %v1963_v53  ;;  %1859 = vmatprep.mubr.msk.f32.mxu1 %vm2028_vm0, %v2029_v8 }
  0x46   :  { %1983 = vmatprep.subr.bf16.mxu1 %v2027_v0 }
  0x49   :  { %1985 = vmatpush3.bf16.msra.mxu1 %v1966_v56 }
  0x4a   :  { %1995 = vmatprep.subr.bf16.mxu1 %v2027_v0 }
  0x4c   :  { %1860 = vmatmul.mubr.msk.f32.vlgmr.msra.gmra.mrb[8].mxu1 %vm73_vm2, %v2200_v34  ;;  %v49_v34 = vld [vmem:[%s2381_s10] sm:$0xff]  ;;  %s2032_s10 = smov 24  }
  0x4d   :  { %1881 = vmatprep.mubr.msk.f32.mxu1 %vm2028_vm0, %v2029_v8  ;;  %v1987_v37 = vpack.c.bf16 %v50_v35, %v49_v34 }
  0x4f   :  { %1988 = vmatpush3.bf16.msra.mxu0 %v1987_v37 }
  0x50   :  { %1989 = vmatprep.subr.bf16.mxu0 %v2027_v0 }
  0x53   :  { %1991 = vmatpush3.bf16.msra.mxu0 %v1990_v40 }
  0x54   :  { %1992 = vmatprep.subr.bf16.mxu0 %v2027_v0 }
  0x57   :  { %1994 = vmatpush3.bf16.msra.mxu0 %v1993_v48 }
  0xde   :  { %v2320_v57 = vpop.f32.mrb[0].mxu0 }
  0xdf   :  { %v225_v58 = vpop.f32.mrb[0].mxu1  ;;  %v1685_v59 = vpop.f32.mrb[1].mxu0  ;;  %v144_v0 = vadd.f32 %v1554_v54, %v2320_v57  ;;  %v1575_v57 = vld [vmem:[%s2385_s11] ss:$0 sm:$0xff] }
  0xe0   :  { %v1696_v60 = vpop.f32.mrb[1].mxu1  ;;  %v235_v62 = vadd.f32 %v1557_v61, %v225_v58  ;;  %v56_v58 = vld [vmem:[%s2383_s12] sm:$0xff]  ;;  %v57_v59 = vld [vmem:[%s2383_s12 + $0x8] sm:$0xff] }
  0xe1   :  { %v1996_v60 = vpack.c.bf16 %v57_v59, %v56_v58 }
  0xe2   :  { %v236_v6 = vmax.f32 %v235_v62, 0.0 }
  0xe3   :  { %1997 = vmatpush3.bf16.msra.mxu1 %v1996_v60 }
  0xe6   :  { %v307_v63 = vpop.f32.mrb[2].mxu0 }
  0xe7   :  { %v311_v1 = vadd.f32 %v1557_v61, %v307_v63  ;;  %v385_v2 = vpop.f32.mrb[2].mxu1  ;;  %v1707_v3 = vpop.f32.mrb[3].mxu0 }
  0xe8   :  { %v389_v4 = vadd.f32 %v1557_v61, %v385_v2  ;;  %v1718_v5 = vpop.f32.mrb[3].mxu1 }
  0xe9   :  { %v312_v7 = vmax.f32 %v311_v1, 0.0 }
  0xea   :  { %v390_v9 = vmax.f32 %v389_v4, 0.0 }
  0xeb   :  { %v313_v8 = vmax.f32 %v236_v6, %v312_v7 }
  0xed   :  { %v391_v10 = vmax.f32 %v313_v8, %v390_v9 }
  0xee   :  { %v463_v11 = vpop.f32.mrb[4].mxu0 }
  0xef   :  { %v467_v12 = vadd.f32 %v1557_v61, %v463_v11  ;;  %v1729_v13 = vpop.f32.mrb[5].mxu0  ;;  %v19_v61 = vstv %s2384_s13 }
  0xf0   :  { %20 = vst [vmem:[#allocation2] sm:$0x1] %v19_v61 }
  0xf1   :  { %v468_v14 = vmax.f32 %v467_v12, 0.0 }
  0xf3   :  { %v469_v15 = vmax.f32 %v391_v10, %v468_v14 }
  0xf7   :  { %v622_v16 = vpop.f32.mrb[4].mxu1  ;;  %v1577_v3 = vld [vmem:[#allocation2] ss:$0 sm:$0xff] }
  0xf8   :  { %v1751_v17 = vpop.f32.mrb[5].mxu1  ;;  %v1998_v19 = vadd.f32 %v1562_v18, %v622_v16 }
  0xfa   :  { %v627_v23 = vmax.f32 %v1998_v19, 0.0 }
  0xfe   :  { %v765_v20 = vpop.f32.mrb[6].mxu0 }
  0xff   :  { %v1999_v21 = vadd.f32 %v1562_v18, %v765_v20  ;;  %v1773_v22 = vpop.f32.mrb[7].mxu0 }
 0x101   :  { %v770_v24 = vmax.f32 %v1999_v21, 0.0 }
 0x103   :  { %v771_v25 = vmax.f32 %v627_v23, %v770_v24 }
 0x107   :  { %v909_v26 = vpop.f32.mrb[6].mxu1 }
 0x108   :  { %v2000_v27 = vadd.f32 %v1562_v18, %v909_v26  ;;  %v1795_v28 = vpop.f32.mrb[7].mxu1 }
 0x10a   :  { %v914_v29 = vmax.f32 %v2000_v27, 0.0 }
 0x10c   :  { %v915_v30 = vmax.f32 %v771_v25, %v914_v29 }
 0x10e   :  { %1365 = vrot.lane.b32.xlu0 %v915_v30, %s2030_s0 }
 0x116   :  { %v1143_v31 = vpop.f32.mrb[8].mxu0 }
 0x117   :  { %v1828_v32 = vpop.f32.mrb[9].mxu0  ;;  %v2001_v39 = vadd.f32 %v1569_v33, %v1143_v31 }
 0x119   :  { %v1148_v46 = vmax.f32 %v2001_v39, 0.0 }
 0x11f   :  { %v1357_v41 = vpop.f32.mrb[8].mxu1 }
 0x120   :  { %v2002_v44 = vadd.f32 %v1569_v33, %v1357_v41  ;;  %v1861_v45 = vpop.f32.mrb[9].mxu1 }
 0x122   :  { %v1362_v47 = vmax.f32 %v2002_v44, 0.0 }
 0x124   :  { %v1363_v49 = vmax.f32 %v1148_v46, %v1362_v47 }
 0x126   :  { %1369 = vrot.lane.b32.xlu0 %v1363_v49, %s2031_s28 }
 0x180   :  { %v1366_v50 = vpop.permute.xlu0 %1365 }
 0x181   :  { %v1373_v51 = vsel %vm1372_vm3, %v469_v15, %v1366_v50 }
 0x198   :  { %v1370_v52 = vpop.permute.xlu0 %1369 }
 0x199   :  { %v1375_v53 = vsel %vm1374_vm4, %v1373_v51, %v1370_v52 }
 0x19a   :  { %1377 = vrot.lane.b32.xlu1 %v1375_v53, %s2032_s10 }
 0x20c   :  { %v1378_v55 = vpop.permute.xlu1 %1377 }
 0x20d   :  { %v1381_v56 = vsel %vm1380_vm5, %v144_v0, %v1378_v55 }
 0x20e   :  { %1875 = vmatmul.mubr.msk.f32.vlgmr.msra.gmra.mrb[10].mxu0 %vm1388_vm6, %v1381_v56 }
 0x2e1   :  { %v1458_v62 = vpop.f32.mrb[10].mxu0 }
 0x2e2   :  { %v1459_v63 = vadd.f32 %v1575_v57, %v1458_v62  ;;  %v1876_v1 = vpop.f32.mrb[11].mxu0 }
 0x2e4   :  { %v1462_v2 = vmax.f32 %v1459_v63, 0.0 }
 0x2e6   :  { %1882 = vmatmul.mubr.msk.f32.vlgmr.msra.gmra.mrb[10].mxu1 %vm1374_vm4, %v1462_v2 }
 0x3b9   :  { %v1538_v4 = vpop.f32.mrb[10].mxu1 }
 0x3ba   :  { %v1539_v5 = vadd.f32 %v1577_v3, %v1538_v4  ;;  %v1883_v6 = vpop.f32.mrb[11].mxu1 }
 0x3bc   :  { %v1579_v7 = vmul.f32 -1.442695, %v1539_v5 }
 0x3be   :  { %2023 = vpow2.f32 %v1579_v7 }
 0x3c8   :  { %v2024_v9 = vpop.eup %2023 }
 0x3c9   :  { %v1545_v8 = vadd.f32 1.0, %v2024_v9 }
 0x3cb   :  { %2025 = vrcp.f32 %v1545_v8 }
 0x3d5   :  { %v2026_v10 = vpop.eup %2025 }
 0x3d6   :  { %1549 = vst.msk [vmem:[%s2386_s14] sm:$0x3] %vm1548_vm7, %v2026_v10 }

// kernel: bart4jit_forward.2
= control target key start
LH: loop header
LB: loop body
LE: loop exit
PB: predicated region body
PF: predicated region fallthrough
CT: control target
= control target key end

     0   :  { %vm111_vm0 = vcmask 261120   ;;  %s9396_s21 = smov 96   ;;  %vm447_vm1 = vcmask 1041409   ;;  %vm450_vm2 = vcmask 1042434   ;;  %vm453_vm3 = vcmask 1043459   ;;  %s9403_s29 = smov 80   ;;  %s11329_s0 = inlined_call_operand.vmem [shape: f32[10,8,32], index: 0, kind: input, shape index: {}]   ;;  %s11330_s4 = inlined_call_operand.vmem [shape: f32[32,96], index: 4, kind: input, shape index: {}]   ;;  %s11331_s5 = inlined_call_operand.vmem [shape: f32[1,96], index: 5, kind: input, shape index: {}]   ;;  %s11332_s2 = inlined_call_operand.vmem [shape: f32[1,32], index: 2, kind: input, shape index: {}]   ;;  %s11333_s3 = inlined_call_operand.vmem [shape: f32[1,32], index: 3, kind: input, shape index: {}]   ;;  %s11334_s1 = inlined_call_operand.vmem [shape: f32[10,8,8], index: 1, kind: input, shape index: {}]   ;;  %s11335_s6 = inlined_call_operand.vmem [shape: f32[32,32], index: 6, kind: input, shape index: {}]   ;;  %s11336_s7 = inlined_call_operand.vmem [shape: f32[1,32], index: 7, kind: input, shape index: {}]   ;;  %s11337_s10 = inlined_call_operand.vmem [shape: f32[32,128], index: 10, kind: input, shape index: {}]   ;;  %s11338_s12 = inlined_call_operand.vmem [shape: f32[128,32], index: 12, kind: input, shape index: {}]   ;;  %s11339_s8 = inlined_call_operand.vmem [shape: f32[1,32], index: 8, kind: input, shape index: {}]   ;;  %s11340_s9 = inlined_call_operand.vmem [shape: f32[1,32], index: 9, kind: input, shape index: {}]   ;;  %s11341_s11 = inlined_call_operand.vmem [shape: f32[1,128], index: 11, kind: input, shape index: {}]   ;;  %s11342_s13 = inlined_call_operand.vmem [shape: f32[1,32], index: 13, kind: input, shape index: {}]   ;;  %s11343_s14 = inlined_call_operand.vmem [shape: f32[1,32], index: 14, kind: input, shape index: {}]   ;;  %s11344_s15 = inlined_call_operand.vmem [shape: f32[1,32], index: 15, kind: input, shape index: {}]   ;;  %s11345_s16 = inlined_call_operand.vmem [shape: f32[10,32], index: 16, kind: output, shape index: {}]  }
   0x1   :  { %11359 = sst [smem:[#allocation10_spill]] %s11329_s0  ;;  %vm456_vm4 = vcmask 1044484   ;;  %vm459_vm5 = vcmask 1045509   ;;  %vm462_vm6 = vcmask 1046534   ;;  %vm464_vm7 = vcmask 1047559   ;;  %s9404_s30 = smov 104  }
   0x2   :  { %s11360_s23 = sld [smem:[#allocation10_spill]]  ;;  %vm9398_vm8 = vmmov 0   ;;  %vm621_vm9 = vcmask 64512   ;;  %vm1422_vm10 = vcmask 57344   ;;  %s9405_s0 = smov 72   ;;  %vm7472_vm11 = vcmask 195584  }
   0x3   :  { %s9406_s17 = smov 8   ;;  %s9407_s18 = smov 16   ;;  %vm7469_vm12 = vcmask 130048   ;;  %vm7621_vm13 = vcmask 261127   ;;  %vm7628_vm14 = vcmask 253952  }
   0x8   :  { %v57_v0 = vld [vmem:[%s11360_s23 + $0x10] sm:$0xff]  ;;  %v59_v1 = vld [vmem:[%s11360_s23 + $0x20] sm:$0xff]  ;;  %v58_v2 = vld [vmem:[%s11360_s23 + $0x18] sm:$0xff] }
   0x9   :  { %v118_v3 = vsel %vm111_vm0, %v57_v0, 0.0  ;;  %v124_v4 = vsel %vm111_vm0, %v59_v1, 0.0  ;;  %v60_v5 = vld [vmem:[%s11360_s23 + $0x28] sm:$0xff]  ;;  %v121_v6 = vsel %vm111_vm0, %v58_v2, 0.0  ;;  %v55_v8 = vld [vmem:[%s11360_s23] sm:$0xff]  ;;  %v61_v12 = vld [vmem:[%s11360_s23 + $0x30] sm:$0xff] }
   0xa   :  { %119 = vadd.xlane.f32.xlu0 %v118_v3  ;;  %125 = vadd.xlane.f32.xlu1 %v124_v4  ;;  %v127_v7 = vsel %vm111_vm0, %v60_v5, 0.0  ;;  %v56_v9 = vld [vmem:[%s11360_s23 + $0x8] sm:$0xff]  ;;  %v112_v10 = vsel %vm111_vm0, %v55_v8, 0.0  ;;  %v62_v13 = vld [vmem:[%s11360_s23 + $0x38] sm:$0xff]  ;;  %v130_v14 = vsel %vm111_vm0, %v61_v12, 0.0  ;;  %v63_v16 = vld [vmem:[%s11360_s23 + $0x40] sm:$0xff] }
   0xb   :  { %v115_v11 = vsel %vm111_vm0, %v56_v9, 0.0  ;;  %v133_v15 = vsel %vm111_vm0, %v62_v13, 0.0  ;;  %v64_v17 = vld [vmem:[%s11360_s23 + $0x48] sm:$0xff]  ;;  %v136_v18 = vsel %vm111_vm0, %v63_v16, 0.0 }
   0xc   :  { %v139_v19 = vsel %vm111_vm0, %v64_v17, 0.0 }
   0xe   :  { %122 = vadd.xlane.f32.xlu0 %v121_v6  ;;  %128 = vadd.xlane.f32.xlu1 %v127_v7  ;;  %v9587_v6 = vld [vmem:[%s11330_s4 + $0x10] sm:$0xff]  ;;  %v9592_v7 = vld [vmem:[%s11330_s4 + $0x18] sm:$0xff] }
  0x12   :  { %113 = vadd.xlane.f32.xlu0 %v112_v10  ;;  %116 = vadd.xlane.f32.xlu1 %v115_v11  ;;  %v9185_v10 = vpack.i.bf16 %v9592_v7, %v9587_v6 }
  0x16   :  { %131 = vadd.xlane.f32.xlu0 %v130_v14  ;;  %134 = vadd.xlane.f32.xlu1 %v133_v15 }
  0x1a   :  { %137 = vadd.xlane.f32.xlu0 %v136_v18  ;;  %140 = vadd.xlane.f32.xlu1 %v139_v19 }
  0x97   :  { %v120_v20 = vpop.xlane.xlu0 %119  ;;  %v126_v21 = vpop.xlane.xlu1 %125 }
  0x98   :  { %v145_v22 = vmul.f32 0.03125, %v120_v20  ;;  %v147_v23 = vmul.f32 0.03125, %v126_v21 }
  0x9a   :  { %v9534_v24 = vsub.f32 %v57_v0, %v145_v22  ;;  %v9536_v25 = vsub.f32 %v59_v1, %v147_v23 }
  0x9b   :  { %v123_v26 = vpop.xlane.xlu0 %122  ;;  %v129_v27 = vpop.xlane.xlu1 %128 }
  0x9c   :  { %v146_v28 = vmul.f32 0.03125, %v123_v26  ;;  %v148_v29 = vmul.f32 0.03125, %v129_v27  ;;  %v165_v30 = vmul.f32 %v9534_v24, %v9534_v24  ;;  %v167_v31 = vmul.f32 %v9536_v25, %v9536_v25 }
  0x9e   :  { %v9542_v32 = vsub.f32 %v58_v2, %v146_v28  ;;  %v9544_v33 = vsub.f32 %v60_v5, %v148_v29  ;;  %v179_v34 = vsel %vm111_vm0, %v165_v30, 0.0  ;;  %v185_v37 = vsel %vm111_vm0, %v167_v31, 0.0 }
  0x9f   :  { %180 = vadd.xlane.f32.xlu0 %v179_v34  ;;  %v114_v35 = vpop.xlane.xlu0 %113  ;;  %v117_v36 = vpop.xlane.xlu1 %116 }
  0xa0   :  { %v143_v38 = vmul.f32 0.03125, %v114_v35  ;;  %v166_v39 = vmul.f32 %v9542_v32, %v9542_v32  ;;  %v144_v40 = vmul.f32 0.03125, %v117_v36  ;;  %v168_v41 = vmul.f32 %v9544_v33, %v9544_v33 }
  0xa2   :  { %v9552_v42 = vsub.f32 %v55_v8, %v143_v38  ;;  %v182_v43 = vsel %vm111_vm0, %v166_v39, 0.0  ;;  %v9555_v44 = vsub.f32 %v56_v9, %v144_v40  ;;  %v188_v46 = vsel %vm111_vm0, %v168_v41, 0.0  ;;  %v9597_v8 = vld [vmem:[%s11330_s4] sm:$0xff]  ;;  %v9602_v9 = vld [vmem:[%s11330_s4 + $0x8] sm:$0xff] }
  0xa3   :  { %183 = vadd.xlane.f32.xlu1 %v182_v43  ;;  %186 = vadd.xlane.f32.xlu0 %v185_v37  ;;  %v132_v45 = vpop.xlane.xlu0 %131  ;;  %v135_v47 = vpop.xlane.xlu1 %134  ;;  %v9180_v11 = vpack.i.bf16 %v9602_v9, %v9597_v8  ;;  %v9620_v39 = vld [vmem:[%s11332_s2] ss:$0 sm:$0xff]  ;;  %s9399_s2 = smov 120  }
  0xa4   :  { %v149_v48 = vmul.f32 0.03125, %v132_v45  ;;  %v150_v49 = vmul.f32 0.03125, %v135_v47  ;;  %v163_v50 = vmul.f32 %v9552_v42, %v9552_v42  ;;  %v164_v51 = vmul.f32 %v9555_v44, %v9555_v44  ;;  %v9626_v47 = vld [vmem:[%s11333_s3] ss:$0 sm:$0xff] }
  0xa6   :  { %v9562_v52 = vsub.f32 %v61_v12, %v149_v48  ;;  %v9564_v53 = vsub.f32 %v62_v13, %v150_v49  ;;  %v173_v54 = vsel %vm111_vm0, %v163_v50, 0.0  ;;  %v176_v56 = vsel %vm111_vm0, %v164_v51, 0.0  ;;  %v9613_v12 = vld [vmem:[%s11331_s5] ss:$0 sm:$0xff] }
  0xa7   :  { %189 = vadd.xlane.f32.xlu1 %v188_v46  ;;  %174 = vadd.xlane.f32.xlu0 %v173_v54  ;;  %v138_v55 = vpop.xlane.xlu0 %137  ;;  %v141_v57 = vpop.xlane.xlu1 %140 }
  0xa8   :  { %v151_v58 = vmul.f32 0.03125, %v138_v55  ;;  %v152_v59 = vmul.f32 0.03125, %v141_v57  ;;  %v169_v60 = vmul.f32 %v9562_v52, %v9562_v52  ;;  %v170_v61 = vmul.f32 %v9564_v53, %v9564_v53 }
  0xaa   :  { %v9572_v62 = vsub.f32 %v63_v16, %v151_v58  ;;  %v9574_v63 = vsub.f32 %v64_v17, %v152_v59  ;;  %v191_v0 = vsel %vm111_vm0, %v169_v60, 0.0  ;;  %v194_v1 = vsel %vm111_vm0, %v170_v61, 0.0 }
  0xab   :  { %177 = vadd.xlane.f32.xlu1 %v176_v56  ;;  %192 = vadd.xlane.f32.xlu0 %v191_v0 }
  0xac   :  { %v171_v2 = vmul.f32 %v9572_v62, %v9572_v62  ;;  %v172_v3 = vmul.f32 %v9574_v63, %v9574_v63 }
  0xae   :  { %v197_v4 = vsel %vm111_vm0, %v171_v2, 0.0  ;;  %v200_v5 = vsel %vm111_vm0, %v172_v3, 0.0 }
  0xaf   :  { %195 = vadd.xlane.f32.xlu1 %v194_v1  ;;  %198 = vadd.xlane.f32.xlu0 %v197_v4 }
  0xb3   :  { %201 = vadd.xlane.f32.xlu1 %v200_v5 }
  0xc4   :  { %9186 = vrot.lane.b32.xlu1 %v9185_v10, %s9396_s21 }
  0xc5   :  { %9181 = vrot.lane.b32.xlu0 %v9180_v11, %s9396_s21 }
  0xc8   :  { %296 = vrot.lane.b32.xlu1 %v9613_v12, %s9396_s21 }
 0x12c   :  { %v181_v13 = vpop.xlane.xlu0 %180 }
 0x12d   :  { %v205_v14 = vmul.f32 0.03125, %v181_v13 }
 0x12f   :  { %v215_v15 = vadd.f32 1e-05, %v205_v14 }
 0x130   :  { %v184_v16 = vpop.xlane.xlu1 %183  ;;  %v187_v17 = vpop.xlane.xlu0 %186 }
 0x131   :  { %9190 = vrsqrt.f32 %v215_v15  ;;  %v206_v18 = vmul.f32 0.03125, %v184_v16  ;;  %v207_v19 = vmul.f32 0.03125, %v187_v17 }
 0x133   :  { %v216_v20 = vadd.f32 1e-05, %v206_v18  ;;  %v217_v21 = vadd.f32 1e-05, %v207_v19 }
 0x134   :  { %v190_v22 = vpop.xlane.xlu1 %189  ;;  %v175_v23 = vpop.xlane.xlu0 %174 }
 0x135   :  { %v208_v26 = vmul.f32 0.03125, %v190_v22  ;;  %v203_v27 = vmul.f32 0.03125, %v175_v23  ;;  %9192 = vrsqrt.f32 %v216_v20 }
 0x136   :  { %9194 = vrsqrt.f32 %v217_v21 }
 0x137   :  { %v218_v28 = vadd.f32 1e-05, %v208_v26  ;;  %v213_v29 = vadd.f32 1e-05, %v203_v27 }
 0x138   :  { %v178_v30 = vpop.xlane.xlu1 %177  ;;  %v193_v31 = vpop.xlane.xlu0 %192 }
 0x139   :  { %9196 = vrsqrt.f32 %v218_v28  ;;  %v204_v34 = vmul.f32 0.03125, %v178_v30  ;;  %v209_v35 = vmul.f32 0.03125, %v193_v31 }
 0x13a   :  { %9198 = vrsqrt.f32 %v213_v29 }
 0x13b   :  { %v9191_v36 = vpop.eup %9190  ;;  %v214_v37 = vadd.f32 1e-05, %v204_v34  ;;  %v219_v38 = vadd.f32 1e-05, %v209_v35 }
 0x13c   :  { %v196_v40 = vpop.xlane.xlu1 %195  ;;  %v199_v41 = vpop.xlane.xlu0 %198  ;;  %v235_v43 = vmul.f32 %v9191_v36, %v9534_v24 }
 0x13d   :  { %9200 = vrsqrt.f32 %v214_v37  ;;  %v210_v45 = vmul.f32 0.03125, %v196_v40  ;;  %v211_v46 = vmul.f32 0.03125, %v199_v41 }
 0x13e   :  { %9202 = vrsqrt.f32 %v219_v38  ;;  %v251_v48 = vmul.f32 %v9620_v39, %v235_v43 }
 0x13f   :  { %v220_v49 = vadd.f32 1e-05, %v210_v45  ;;  %v221_v50 = vadd.f32 1e-05, %v211_v46  ;;  %v9193_v51 = vpop.eup %9192 }
 0x140   :  { %v202_v54 = vpop.xlane.xlu1 %201  ;;  %v9182_v55 = vpop.permute.xlu0 %9181  ;;  %v9630_v56 = vadd.f32 %v9626_v47, %v251_v48  ;;  %v236_v1 = vmul.f32 %v9193_v51, %v9542_v32 }
 0x141   :  { %v9195_v24 = vpop.eup %9194  ;;  %9204 = vrsqrt.f32 %v220_v49  ;;  %v212_v57 = vmul.f32 0.03125, %v202_v54  ;;  %v9184_v58 = vunpack.i.h.bf16 %v9182_v55  ;;  %v9183_v59 = vunpack.i.l.bf16 %v9182_v55 }
 0x142   :  { %9206 = vrsqrt.f32 %v221_v50  ;;  %8619 = vmatprep.mubr.msk.f32.mxu1 %vm111_vm0, %v9630_v56  ;;  %v237_v4 = vmul.f32 %v9195_v24, %v9536_v25  ;;  %v252_v32 = vmul.f32 %v9620_v39, %v236_v1  ;;  %v9107_v25 = vpack.c.bf16 %v9602_v9, %v9597_v8 }
 0x143   :  { %v9197_v60 = vpop.eup %9196  ;;  %v222_v61 = vadd.f32 1e-05, %v212_v57  ;;  %v9099_v0 = vpack.c.bf16 %v9184_v58, %v9183_v59  ;;  %v449_v31 = vrot.slane %v9630_v56, 5 }
 0x144   :  { %v9199_v2 = vpop.eup %9198  ;;  %v9187_v3 = vpop.permute.xlu1 %9186  ;;  %v238_v13 = vmul.f32 %v9197_v60, %v9544_v33  ;;  %v253_v19 = vmul.f32 %v9620_v39, %v237_v4  ;;  %v268_v8 = vadd.f32 %v9626_v47, %v252_v32 }
 0x145   :  { %9208 = vrsqrt.f32 %v222_v61  ;;  %v9189_v5 = vunpack.i.h.bf16 %v9187_v3  ;;  %v9188_v10 = vunpack.i.l.bf16 %v9187_v3  ;;  %9100 = vmatprep.subr.bf16.mxu0 %v9099_v0  ;;  %9163 = vmatprep.subr.bf16.mxu1 %v9099_v0  ;;  %v233_v11 = vmul.f32 %v9199_v2, %v9552_v42 }
 0x146   :  { %9102 = vmatpush3.bf16.msra.mxu0 %v9099_v0  ;;  %9165 = vmatpush3.bf16.msra.mxu1 %v9099_v0  ;;  %v254_v21 = vmul.f32 %v9620_v39, %v238_v13  ;;  %v452_v34 = vrot.slane %v268_v8, 4  ;;  %v554_v13 = vlaneseq }
 0x147   :  { %v9201_v14 = vpop.eup %9200  ;;  %v9103_v15 = vpack.c.bf16 %v9189_v5, %v9188_v10  ;;  %v249_v16 = vmul.f32 %v9620_v39, %v233_v11  ;;  %v9400_v10 = vmov 1966171168  }
 0x148   :  { %v9203_v17 = vpop.eup %9202  ;;  %v234_v18 = vmul.f32 %v9201_v14, %v9555_v44  ;;  %v9111_v44 = vpack.c.bf16 %v9592_v7, %v9587_v6  ;;  %v270_v6 = vadd.f32 %v9626_v47, %v254_v21  ;;  %v9691_v57 = vpop.permute.xlu1 %296  ;;  %v552_v11 = vunpack.c.l.s4 %v9400_v10 }
 0x149   :  { %9104 = vmatprep.subr.bf16.mxu0 %v9103_v15  ;;  %9164 = vmatprep.subr.bf16.mxu1 %v9103_v15  ;;  %v265_v42 = vadd.f32 %v9626_v47, %v249_v16  ;;  %v239_v33 = vmul.f32 %v9203_v17, %v9562_v52  ;;  %v269_v52 = vadd.f32 %v9626_v47, %v253_v19  ;;  %v555_v32 = vshrl.u32 %v554_v13, 7 }
 0x14a   :  { %9106 = vmatpush3.bf16.msra.mxu0 %v9103_v15  ;;  %9166 = vmatpush3.bf16.msra.mxu1 %v9103_v15  ;;  %v250_v20 = vmul.f32 %v9620_v39, %v234_v18  ;;  %v458_v41 = vrot.slane %v270_v6, 2  ;;  %v553_v16 = vunpack.c.0.s8 %v552_v11 }
 0x14b   :  { %v9205_v22 = vpop.eup %9204  ;;  %8616 = vmatprep.mubr.msk.f32.mxu0 %vm111_vm0, %v265_v42  ;;  %9108 = vmatprep.subr.bf16.mxu1 %v9107_v25  ;;  %v255_v26 = vmul.f32 %v9620_v39, %v239_v33  ;;  %v445_v29 = vrot.slane %v265_v42, 7  ;;  %v455_v38 = vrot.slane %v269_v52, 3 }
 0x14c   :  { %v9207_v9 = vpop.eup %9206  ;;  %v266_v23 = vadd.f32 %v9626_v47, %v250_v20  ;;  %v240_v27 = vmul.f32 %v9205_v22, %v9564_v53  ;;  %v556_v19 = vsub.s32 %v553_v16, %v555_v32 }
 0x14d   :  { %8620 = vmatmul.mubr.msk.f32.vlgmr.msra.gmra.mrb[0].mxu1 %vm111_vm0, %v268_v8  ;;  %v241_v28 = vmul.f32 %v9207_v9, %v9572_v62  ;;  %v271_v35 = vadd.f32 %v9626_v47, %v255_v26  ;;  %v2295_v9 = vsub.s32 0, %v555_v32 }
 0x14e   :  { %8617 = vmatmul.mubr.msk.f32.vlgmr.msra.gmra.mrb[0].mxu0 %vm111_vm0, %v266_v23  ;;  %v446_v30 = vrot.slane %v266_v23, 6  ;;  %8622 = vmatprep.mubr.msk.f32.mxu1 %vm111_vm0, %v269_v52  ;;  %v256_v53 = vmul.f32 %v9620_v39, %v240_v27 }
 0x14f   :  { %v9209_v7 = vpop.eup %9208  ;;  %9110 = vmatpush3.bf16.msra.mxu1 %v9107_v25  ;;  %v257_v36 = vmul.f32 %v9620_v39, %v241_v28 }
 0x150   :  { %v448_v62 = vsel %vm447_vm1, %v446_v30, %v445_v29  ;;  %9112 = vmatprep.subr.bf16.mxu1 %v9111_v44  ;;  %v242_v37 = vmul.f32 %v9209_v7, %v9574_v63  ;;  %v272_v46 = vadd.f32 %v9626_v47, %v256_v53  ;;  %v461_v63 = vrot.slane %v271_v35, 1 }
 0x151   :  { %8623 = vmatmul.mubr.msk.f32.gmra.mrb[2].mxu1 %vm111_vm0, %v270_v6  ;;  %v451_v40 = vsel %vm450_vm2, %v449_v31, %v448_v62  ;;  %v273_v49 = vadd.f32 %v9626_v47, %v257_v36 }
 0x152   :  { %8625 = vmatprep.mubr.msk.f32.mxu1 %vm111_vm0, %v271_v35  ;;  %v258_v43 = vmul.f32 %v9620_v39, %v242_v37  ;;  %v454_v45 = vsel %vm453_vm3, %v452_v34, %v451_v40 }
 0x153   :  { %9114 = vmatpush3.bf16.msra.mxu1 %v9111_v44  ;;  %v457_v48 = vsel %vm456_vm4, %v455_v38, %v454_v45  ;;  %v466_v56 = vrot.slane %v273_v49, 7 }
 0x154   :  { %v274_v50 = vadd.f32 %v9626_v47, %v258_v43  ;;  %v460_v51 = vsel %vm459_vm5, %v458_v41, %v457_v48  ;;  %v11347_v47 = vmov 0.0  }
 0x155   :  { %8626 = vmatmul.mubr.msk.f32.gmra.mrb[4].mxu1 %vm111_vm0, %v272_v46  ;;  %v463_v39 = vsel %vm462_vm6, %v461_v63, %v460_v51  ;;  %8642 = vmatprep.subr.mxu1 %v11347_v47 }
 0x156   :  { %8628 = vmatprep.mubr.msk.f32.mxu1 %vm111_vm0, %v273_v49  ;;  %v467_v54 = vrot.slane %v274_v50, 6  ;;  %v465_v55 = vsel %vm464_vm7, %v272_v46, %v463_v39  ;;  %8662 = vmatprep.subr.mxu0 %v11347_v47 }
 0x157   :  { %8664 = vmatprep.mubr.msk.f32.mxu0 %vm9398_vm8, %v11347_v47 }
 0x158   :  { %v468_v24 = vsel %vm447_vm1, %v467_v54, %v466_v56 }
 0x159   :  { %8629 = vmatmul.mubr.msk.f32.gmra.mrb[6].mxu1 %vm111_vm0, %v274_v50 }
 0x15a   :  { %8639 = vmatprep.mubr.msk.f32.mxu1 %vm111_vm0, %v465_v55 }
 0x15d   :  { %8640 = vmatmul.mubr.msk.f32.vlgmr.msra.gmra.mrb[8].mxu1 %vm111_vm0, %v468_v24  ;;  %v65_v24 = vld [vmem:[%s11334_s1] sm:$0xff] }
 0x15e   :  { %8644 = vmatprep.mubr.msk.f32.mxu1 %vm9398_vm8, %v11347_v47 }
 0x220   :  { %v8621_v58 = vpop.f32.mrb[0].mxu1 }
 0x221   :  { %v9694_v59 = vadd.f32 %v8621_v58, %v9691_v57  ;;  %v8618_v60 = vpop.f32.mrb[0].mxu0  ;;  %v405_v61 = vpop.f32.mrb[1].mxu1  ;;  %v9845_v58 = vrot.slane %v65_v24, 7  ;;  %v68_v24 = vld [vmem:[%s11334_s1 + $0x18] sm:$0xff] }
 0x222   :  { %v9697_v0 = vadd.f32 %v8618_v60, %v9691_v57  ;;  %v395_v1 = vpop.f32.mrb[1].mxu0  ;;  %v9724_v18 = vadd.f32 %v405_v61, %v9691_v57  ;;  %v66_v61 = vld [vmem:[%s11334_s1 + $0x8] sm:$0xff] }
 0x223   :  { %v9700_v2 = vadd.f32 %v395_v1, %v9691_v57  ;;  %2545 = vrot.lane.b32.xlu0 %v9694_v59, %s9399_s2  ;;  %v9858_v16 = vrot.slane %v66_v61, 7  ;;  %v9900_v61 = vrot.slane %v68_v24, 7 }
 0x224   :  { %v8624_v3 = vpop.f32.mrb[2].mxu1  ;;  %1609 = vrot.lane.b32.xlu1 %v9697_v0, %s9396_s21  ;;  %11361 = vst [vmem:[#allocation2_spill] sm:$0xff] %v9724_v18 }
 0x225   :  { %v415_v4 = vpop.f32.mrb[3].mxu1  ;;  %8643 = vmatpush3.xpose.msk.msra.mxu1 %vm621_vm9, %v9700_v2  ;;  %v9735_v22 = vadd.f32 %v8624_v3, %v9691_v57 }
 0x226   :  { %v9709_v5 = vadd.f32 %v415_v4, %v9691_v57  ;;  %8647 = vmatprep.subr.mxu1 %v11347_v47 }
 0x227   :  { %1533 = vrot.lane.b32.xlu0 %v9700_v2, %s9396_s21  ;;  %11362 = vst [vmem:[#allocation3_spill] sm:$0xff] %v9735_v22 }
 0x228   :  { %v8627_v14 = vpop.f32.mrb[4].mxu1  ;;  %8663 = vmatpush3.xpose.msk.msra.mxu0 %vm621_vm9, %v9709_v5  ;;  %1761 = vrot.lane.b32.xlu1 %v9694_v59, %s9396_s21 }
 0x229   :  { %v425_v15 = vpop.f32.mrb[5].mxu1  ;;  %8672 = vmatprep.subr.mxu0 %v11347_v47  ;;  %v9746_v29 = vadd.f32 %v8627_v14, %v9691_v57  ;;  %v71_v14 = vld [vmem:[%s11334_s1 + $0x30] sm:$0xff] }
 0x22a   :  { %v9731_v33 = vadd.f32 %v425_v15, %v9691_v57 }
 0x22b   :  { %2299 = vrot.lane.b32.xlu0 %v9700_v2, %s9399_s2 }
 0x22c   :  { %v8630_v25 = vpop.f32.mrb[6].mxu1  ;;  %2381 = vrot.lane.b32.xlu1 %v9697_v0, %s9399_s2 }
 0x22d   :  { %v435_v17 = vpop.f32.mrb[7].mxu1  ;;  %v9755_v36 = vadd.f32 %v8630_v25, %v9691_v57 }
 0x22e   :  { %v9743_v26 = vadd.f32 %v435_v17, %v9691_v57  ;;  %v69_v57 = vld [vmem:[%s11334_s1 + $0x20] sm:$0xff] }
 0x22f   :  { %1837 = vrot.lane.b32.xlu0 %v9709_v5, %s9396_s21  ;;  %v9850_v10 = vrot.slane %v69_v57, 7 }
 0x230   :  { %v8641_v42 = vpop.f32.mrb[8].mxu1  ;;  %1685 = vrot.lane.b32.xlu1 %v9724_v18, %s9396_s21 }
 0x231   :  { %v545_v20 = vadd.f32 %v8641_v42, %v9613_v12  ;;  %v539_v21 = vpop.f32.mrb[9].mxu1 }
 0x232   :  { %v540_v8 = vadd.f32 %v9613_v12, %v539_v21  ;;  %v67_v21 = vld [vmem:[%s11334_s1 + $0x10] sm:$0xff] }
 0x233   :  { %v605_v44 = vrot.slane %v545_v20, %v556_v19  ;;  %1989 = vrot.lane.b32.xlu0 %v9731_v33, %s9396_s21  ;;  %v9865_v20 = vrot.slane %v71_v14, 7 }
 0x234   :  { %v550_v23 = vcombine.high %v540_v8, %v540_v8  ;;  %v557_v52 = vrot.slane %v540_v8, %v556_v19  ;;  %1913 = vrot.lane.b32.xlu1 %v9735_v22, %s9396_s21 }
 0x235   :  { %v606_v27 = vcombine.high %v605_v44, %v605_v44  ;;  %v613_v28 = vrot.slane %v605_v44, %v556_v19 }
 0x236   :  { %v564_v30 = vrot.slane %v550_v23, %v556_v19  ;;  %v565_v12 = vcombine.high %v557_v52, %v557_v52  ;;  %v573_v6 = vrot.slane %v557_v52, %v556_v19 }
 0x237   :  { %v620_v7 = vrot.slane %v606_v27, %v556_v19  ;;  %2141 = vrot.lane.b32.xlu0 %v9743_v26, %s9396_s21  ;;  %v9750_v31 = vrot.slane %v613_v28, %v2295_v9  ;;  %v9873_v27 = vrot.slane %v67_v21, 7 }
 0x238   :  { %v566_v34 = vcombine.high %v564_v30, %v564_v30  ;;  %v580_v53 = vrot.slane %v564_v30, %v556_v19  ;;  %v587_v62 = vrot.slane %v565_v12, %v556_v19  ;;  %v595_v35 = vcombine.high %v573_v6, %v573_v6  ;;  %2065 = vrot.lane.b32.xlu1 %v9746_v29, %s9396_s21 }
 0x239   :  { %8645 = vmatmul.mubr.msk.f32.vlgmr.msra.gmra.mrb[10].mxu1 %vm621_vm9, %v573_v6  ;;  %v9758_v37 = vrot.slane %v620_v7, %v2295_v9  ;;  %v9791_v51 = vrot.slane %v573_v6, %v2295_v9 }
 0x23a   :  { %v594_v38 = vrot.slane %v566_v34, %v556_v19  ;;  %v596_v40 = vcombine.high %v580_v53, %v580_v53  ;;  %v597_v41 = vcombine.high %v587_v62, %v587_v62  ;;  %8648 = vmatpush3.xpose.msk.msra.mxu1 %vm621_vm9, %v9697_v0  ;;  %8665 = vmatmul.mubr.msk.f32.vlgmr.msra.gmra.mrb[2].mxu0 %vm621_vm9, %v580_v53 }
 0x23b   :  { %8673 = vmatpush3.xpose.msk.msra.mxu0 %vm621_vm9, %v9731_v33  ;;  %8649 = vmatprep.mubr.msk.f32.mxu1 %vm9398_vm8, %v11347_v47  ;;  %v9767_v43 = vrot.slane %v595_v35, %v2295_v9  ;;  %v9769_v45 = vrot.slane %v580_v53, %v2295_v9  ;;  %11365 = vst [vmem:[#allocation6_spill] sm:$0xff] %v9791_v51  ;;  %v73_v53 = vld [vmem:[%s11334_s1 + $0x40] sm:$0xff] }
 0x23c   :  { %8652 = vmatprep.subr.mxu1 %v11347_v47  ;;  %2217 = vrot.lane.b32.xlu1 %v9755_v36, %s9396_s21  ;;  %v598_v46 = vcombine.high %v594_v38, %v594_v38  ;;  %v9774_v48 = vrot.slane %v597_v41, %v2295_v9  ;;  %v9776_v63 = vrot.slane %v594_v38, %v2295_v9 }
 0x23d   :  { %11363 = vst [vmem:[#allocation4_spill] sm:$0xff] %v9767_v43  ;;  %8650 = vmatmul.mubr.msk.f32.vlgmr.msra.gmra.mrb[12].mxu1 %vm621_vm9, %v587_v62  ;;  %8674 = vmatprep.mubr.msk.f32.mxu0 %vm9398_vm8, %v11347_v47  ;;  %v9781_v49 = vrot.slane %v596_v40, %v2295_v9  ;;  %v9806_v39 = vrot.slane %v587_v62, %v2295_v9 }
 0x23e   :  { %11364 = vst [vmem:[#allocation5_spill] sm:$0xff] %v9774_v48  ;;  %8653 = vmatpush3.xpose.msk.msra.mxu1 %vm621_vm9, %v9724_v18  ;;  %8682 = vmatprep.subr.mxu0 %v11347_v47  ;;  %v9786_v50 = vrot.slane %v598_v46, %v2295_v9 }
 0x23f   :  { %8675 = vmatmul.mubr.msk.f32.vlgmr.msra.gmra.mrb[4].mxu0 %vm621_vm9, %v596_v40  ;;  %8654 = vmatprep.mubr.msk.f32.mxu1 %vm9398_vm8, %v11347_v47  ;;  %11366 = vst [vmem:[#allocation7_spill] sm:$0xff] %v9806_v39 }
 0x240   :  { %8683 = vmatpush3.xpose.msk.msra.mxu0 %vm621_vm9, %v9743_v26  ;;  %8657 = vmatprep.subr.mxu1 %v11347_v47 }
 0x241   :  { %2297 = vrot.lane.b32.xlu1 %v9791_v51, %s9399_s2  ;;  %8655 = vmatmul.mubr.msk.f32.vlgmr.msra.gmra.mrb[14].mxu1 %vm621_vm9, %v595_v35 }
 0x242   :  { %8658 = vmatpush3.xpose.msk.msra.mxu1 %vm621_vm9, %v9694_v59  ;;  %8684 = vmatprep.mubr.msk.f32.mxu0 %vm9398_vm8, %v11347_v47 }
 0x243   :  { %8685 = vmatmul.mubr.msk.f32.vlgmr.msra.gmra.mrb[6].mxu0 %vm621_vm9, %v613_v28  ;;  %8659 = vmatprep.mubr.msk.f32.mxu1 %vm9398_vm8, %v11347_v47 }
 0x244   :  { %8667 = vmatprep.subr.mxu1 %v11347_v47  ;;  %8692 = vmatprep.subr.mxu0 %v11347_v47 }
 0x245   :  { %2379 = vrot.lane.b32.xlu1 %v9806_v39, %s9399_s2  ;;  %8660 = vmatmul.mubr.msk.f32.vlgmr.msra.gmra.mrb[16].mxu1 %vm621_vm9, %v597_v41 }
 0x246   :  { %8668 = vmatpush3.xpose.msk.msra.mxu1 %vm621_vm9, %v9735_v22  ;;  %8669 = vmatprep.mubr.msk.f32.mxu1 %vm9398_vm8, %v11347_v47 }
 0x247   :  { %8677 = vmatprep.subr.mxu1 %v11347_v47  ;;  %8694 = vmatprep.mubr.msk.f32.mxu0 %vm9398_vm8, %v11347_v47 }
 0x249   :  { %8670 = vmatmul.mubr.msk.f32.vlgmr.msra.gmra.mrb[18].mxu1 %vm621_vm9, %v594_v38  ;;  %v70_v38 = vld [vmem:[%s11334_s1 + $0x28] sm:$0xff] }
 0x24a   :  { %8678 = vmatpush3.xpose.msk.msra.mxu1 %vm621_vm9, %v9746_v29  ;;  %8679 = vmatprep.mubr.msk.f32.mxu1 %vm9398_vm8, %v11347_v47  ;;  %v9898_v57 = vrot.slane %v70_v38, 7 }
 0x24b   :  { %8687 = vmatprep.subr.mxu1 %v11347_v47 }
 0x24d   :  { %8680 = vmatmul.mubr.msk.f32.vlgmr.msra.gmra.mrb[20].mxu1 %vm621_vm9, %v598_v46 }
 0x24e   :  { %8688 = vmatpush3.xpose.msk.msra.mxu1 %vm621_vm9, %v9755_v36  ;;  %8689 = vmatprep.mubr.msk.f32.mxu1 %vm9398_vm8, %v11347_v47 }
 0x24f   :  { %8697 = vmatprep.subr.mxu1 %v11347_v47 }
 0x251   :  { %8690 = vmatmul.mubr.msk.f32.vlgmr.msra.gmra.mrb[22].mxu1 %vm621_vm9, %v620_v7 }
 0x252   :  { %8699 = vmatprep.mubr.msk.f32.mxu1 %vm9398_vm8, %v11347_v47 }
 0x295   :  { %v9835_v54 = vpop.permute.xlu0 %2545 }
 0x296   :  { %v1610_v55 = vpop.permute.xlu1 %1609 }
 0x297   :  { %8698 = vmatpush3.msra.mxu1 %v1610_v55 }
 0x298   :  { %8707 = vmatprep.subr.mxu1 %v11347_v47 }
 0x299   :  { %v1534_v56 = vpop.permute.xlu0 %1533 }
 0x29a   :  { %8693 = vmatpush3.msra.mxu0 %v1534_v56  ;;  %v9893_v56 = vrot.slane %v73_v53, 7 }
 0x29b   :  { %8702 = vmatprep.subr.mxu0 %v11347_v47 }
 0x30c   :  { %v693_v60 = vpop.f32.mrb[10].mxu1 }
 0x30d   :  { %v1372_v1 = vmul.f32 0.35355338, %v693_v60  ;;  %v8646_v3 = vpop.f32.mrb[11].mxu1  ;;  %v993_v4 = vpop.f32.mrb[2].mxu0 }
 0x30e   :  { %v1376_v11 = vmul.f32 0.35355338, %v993_v4  ;;  %v8666_v13 = vpop.f32.mrb[3].mxu0 }
 0x30f   :  { %v9856_v15 = vadd.f32 %v9845_v58, %v1372_v1  ;;  %v72_v1 = vld [vmem:[%s11334_s1 + $0x38] sm:$0xff] }
 0x310   :  { %v768_v32 = vpop.f32.mrb[12].mxu1  ;;  %v9863_v42 = vadd.f32 %v9850_v10, %v1376_v11 }
 0x311   :  { %v1373_v25 = vmul.f32 0.35355338, %v768_v32  ;;  %v8651_v17 = vpop.f32.mrb[13].mxu1  ;;  %v1423_v19 = vsel %vm1422_vm10, %v9856_v15, -inf }
 0x312   :  { %v1143_v8 = vpop.f32.mrb[4].mxu0  ;;  %1424 = vmax.xlane.f32.xlu0 %v1423_v19  ;;  %v1435_v12 = vsel %vm1422_vm10, %v9863_v42, -inf  ;;  %v74_v19 = vld [vmem:[%s11334_s1 + $0x48] sm:$0xff]  ;;  %s9401_s1 = smov 88  }
 0x313   :  { %v1378_v44 = vmul.f32 0.35355338, %v1143_v8  ;;  %v8676_v9 = vpop.f32.mrb[5].mxu0  ;;  %v9871_v23 = vadd.f32 %v9858_v16, %v1373_v25  ;;  %v9913_v25 = vrot.slane %v72_v1, 7 }
 0x314   :  { %v843_v52 = vpop.f32.mrb[14].mxu1 }
 0x315   :  { %v1374_v28 = vmul.f32 0.35355338, %v843_v52  ;;  %v8656_v30 = vpop.f32.mrb[15].mxu1  ;;  %v1426_v6 = vsel %vm1422_vm10, %v9871_v23, -inf  ;;  %v9880_v7 = vadd.f32 %v9865_v20, %v1378_v44 }
 0x316   :  { %v1293_v34 = vpop.f32.mrb[6].mxu0  ;;  %1436 = vmax.xlane.f32.xlu0 %v1435_v12  ;;  %1427 = vmax.xlane.f32.xlu1 %v1426_v6  ;;  %v9928_v30 = vrot.slane %v74_v19, 7 }
 0x317   :  { %v8686_v62 = vpop.f32.mrb[7].mxu0  ;;  %v1380_v40 = vmul.f32 0.35355338, %v1293_v34  ;;  %v1441_v46 = vsel %vm1422_vm10, %v9880_v7, -inf  ;;  %v9891_v55 = vadd.f32 %v9873_v27, %v1374_v28 }
 0x318   :  { %v918_v35 = vpop.f32.mrb[16].mxu1 }
 0x319   :  { %v8661_v41 = vpop.f32.mrb[17].mxu1  ;;  %v1375_v3 = vmul.f32 0.35355338, %v918_v35  ;;  %v1429_v13 = vsel %vm1422_vm10, %v9891_v55, -inf  ;;  %v9908_v14 = vadd.f32 %v9893_v56, %v1380_v40  ;;  %v9943_v40 = vpop.permute.xlu1 %1761 }
 0x31a   :  { %1442 = vmax.xlane.f32.xlu0 %v1441_v46 }
 0x31b   :  { %v1447_v44 = vsel %vm1422_vm10, %v9908_v14, -inf  ;;  %v9923_v52 = vadd.f32 %v9900_v61, %v1375_v3 }
 0x31c   :  { %v1068_v60 = vpop.f32.mrb[18].mxu1 }
 0x31d   :  { %v1377_v4 = vmul.f32 0.35355338, %v1068_v60  ;;  %v8671_v11 = vpop.f32.mrb[19].mxu1  ;;  %v1432_v53 = vsel %vm1422_vm10, %v9923_v52, -inf  ;;  %v9945_v41 = vpop.permute.xlu1 %2381 }
 0x31e   :  { %1430 = vmax.xlane.f32.xlu0 %v1429_v13  ;;  %v9951_v60 = vpop.permute.xlu0 %2299 }
 0x31f   :  { %v9911_v32 = vadd.f32 %v9898_v57, %v1377_v4 }
 0x320   :  { %v1218_v17 = vpop.f32.mrb[20].mxu1 }
 0x321   :  { %v1379_v21 = vmul.f32 0.35355338, %v1218_v17  ;;  %v8681_v8 = vpop.f32.mrb[21].mxu1  ;;  %v1438_v9 = vsel %vm1422_vm10, %v9911_v32, -inf  ;;  %v9947_v46 = vpop.permute.xlu1 %1685 }
 0x322   :  { %1448 = vmax.xlane.f32.xlu0 %v1447_v44  ;;  %1439 = vmax.xlane.f32.xlu1 %v1438_v9  ;;  %v9955_v3 = vpop.permute.xlu0 %1837 }
 0x323   :  { %v9926_v28 = vadd.f32 %v9913_v25, %v1379_v21 }
 0x324   :  { %v1368_v12 = vpop.f32.mrb[22].mxu1 }
 0x325   :  { %v1381_v6 = vmul.f32 0.35355338, %v1368_v12  ;;  %v8691_v34 = vpop.f32.mrb[23].mxu1  ;;  %v1444_v62 = vsel %vm1422_vm10, %v9926_v28, -inf  ;;  %v9949_v24 = vpop.permute.xlu1 %1913 }
 0x326   :  { %1433 = vmax.xlane.f32.xlu0 %v1432_v53  ;;  %1445 = vmax.xlane.f32.xlu1 %v1444_v62  ;;  %v9959_v11 = vpop.permute.xlu0 %1989 }
 0x327   :  { %v9935_v35 = vadd.f32 %v9928_v30, %v1381_v6 }
 0x329   :  { %v1450_v38 = vsel %vm1422_vm10, %v9935_v35, -inf  ;;  %v9953_v1 = vpop.permute.xlu1 %2065 }
 0x32a   :  { %1451 = vmax.xlane.f32.xlu1 %v1450_v38  ;;  %v9963_v17 = vpop.permute.xlu0 %2141 }
 0x32d   :  { %v9957_v4 = vpop.permute.xlu1 %2217 }
 0x331   :  { %v9961_v13 = vpop.permute.xlu1 %2297 }
 0x335   :  { %v9965_v19 = vpop.permute.xlu1 %2379 }
 0x33b   :  { %2543 = vrot.lane.b32.xlu1 %v9774_v48, %s9399_s2 }
 0x33c   :  { %2463 = vrot.lane.b32.xlu0 %v9724_v18, %s9399_s2 }
 0x39f   :  { %v1425_v21 = vpop.xlane.xlu0 %1424 }
 0x3a0   :  { %v1453_v8 = vsub.f32 %v9856_v15, %v1425_v21 }
 0x3a2   :  { %v1463_v44 = vmul.f32 1.442695, %v1453_v8 }
 0x3a3   :  { %v1437_v9 = vpop.xlane.xlu0 %1436  ;;  %v1428_v12 = vpop.xlane.xlu1 %1427 }
 0x3a4   :  { %9210 = vpow2.f32 %v1463_v44  ;;  %v1457_v6 = vsub.f32 %v9863_v42, %v1437_v9  ;;  %v1454_v34 = vsub.f32 %v9871_v23, %v1428_v12 }
 0x3a6   :  { %v1471_v53 = vmul.f32 1.442695, %v1457_v6  ;;  %v1465_v62 = vmul.f32 1.442695, %v1454_v34 }
 0x3a7   :  { %v1443_v38 = vpop.xlane.xlu0 %1442 }
 0x3a8   :  { %9212 = vpow2.f32 %v1471_v53  ;;  %v1459_v47 = vsub.f32 %v9880_v7, %v1443_v38 }
 0x3a9   :  { %9214 = vpow2.f32 %v1465_v62 }
 0x3aa   :  { %v1475_v48 = vmul.f32 1.442695, %v1459_v47 }
 0x3ab   :  { %v1431_v51 = vpop.xlane.xlu0 %1430 }
 0x3ac   :  { %9216 = vpow2.f32 %v1475_v48  ;;  %v1455_v15 = vsub.f32 %v9891_v55, %v1431_v51 }
 0x3ae   :  { %v9972_v21 = vpop.eup %9210  ;;  %v1467_v8 = vmul.f32 1.442695, %v1455_v15 }
 0x3af   :  { %v1483_v42 = vsel %vm1422_vm10, %v9972_v21, 0.0  ;;  %v1449_v12 = vpop.xlane.xlu0 %1448  ;;  %v1440_v6 = vpop.xlane.xlu1 %1439 }
 0x3b0   :  { %9218 = vpow2.f32 %v1467_v8  ;;  %1484 = vadd.xlane.f32.xlu0 %v1483_v42  ;;  %v1458_v38 = vsub.f32 %v9911_v32, %v1440_v6  ;;  %v1461_v8 = vsub.f32 %v9908_v14, %v1449_v12 }
 0x3b2   :  { %v9976_v23 = vpop.eup %9212  ;;  %v1473_v42 = vmul.f32 1.442695, %v1458_v38 }
 0x3b3   :  { %v9978_v44 = vpop.eup %9214  ;;  %v1495_v7 = vsel %vm1422_vm10, %v9976_v23, 0.0  ;;  %v1434_v34 = vpop.xlane.xlu0 %1433 }
 0x3b4   :  { %1496 = vadd.xlane.f32.xlu0 %v1495_v7  ;;  %v1486_v47 = vsel %vm1422_vm10, %v9978_v44, 0.0  ;;  %v1456_v53 = vsub.f32 %v9923_v52, %v1434_v34  ;;  %v1446_v62 = vpop.xlane.xlu1 %1445 }
 0x3b5   :  { %1487 = vadd.xlane.f32.xlu1 %v1486_v47  ;;  %v1460_v7 = vsub.f32 %v9926_v28, %v1446_v62 }
 0x3b6   :  { %v9984_v48 = vpop.eup %9216  ;;  %v1469_v15 = vmul.f32 1.442695, %v1456_v53 }
 0x3b7   :  { %v1501_v51 = vsel %vm1422_vm10, %v9984_v48, 0.0  ;;  %v10053_v53 = vpop.permute.xlu0 %2463 }
 0x3b8   :  { %1502 = vadd.xlane.f32.xlu0 %v1501_v51  ;;  %9220 = vpow2.f32 %v1469_v15  ;;  %v1452_v47 = vpop.xlane.xlu1 %1451  ;;  %v1479_v51 = vmul.f32 1.442695, %v1461_v8 }
 0x3b9   :  { %9222 = vpow2.f32 %v1473_v42 }
 0x3ba   :  { %v9988_v55 = vpop.eup %9218  ;;  %9224 = vpow2.f32 %v1479_v51 }
 0x3bb   :  { %v1489_v9 = vsel %vm1422_vm10, %v9988_v55, 0.0 }
 0x3bc   :  { %1490 = vadd.xlane.f32.xlu0 %v1489_v9  ;;  %v1477_v9 = vmul.f32 1.442695, %v1460_v7  ;;  %v10055_v38 = vpop.permute.xlu1 %2543 }
 0x3be   :  { %9226 = vpow2.f32 %v1477_v9  ;;  %v11367_v9 = vmov 0.0  }
 0x3c2   :  { %v10001_v52 = vpop.eup %9220 }
 0x3c3   :  { %v1492_v32 = vsel %vm1422_vm10, %v10001_v52, 0.0  ;;  %v10005_v14 = vpop.eup %9222 }
 0x3c4   :  { %v10007_v12 = vpop.eup %9224  ;;  %v1498_v28 = vsel %vm1422_vm10, %v10005_v14, 0.0 }
 0x3c6   :  { %2461 = vrot.lane.b32.xlu1 %v9767_v43, %s9399_s2  ;;  %v1462_v43 = vsub.f32 %v9935_v35, %v1452_v47 }
 0x3c8   :  { %v1481_v39 = vmul.f32 1.442695, %v1462_v43  ;;  %v10011_v6 = vpop.eup %9226  ;;  %v1507_v43 = vsel %vm1422_vm10, %v10007_v12, 0.0 }
 0x3ca   :  { %9228 = vpow2.f32 %v1481_v39  ;;  %v1504_v39 = vsel %vm1422_vm10, %v10011_v6, 0.0 }
 0x3d2   :  { %2709 = vrot.lane.b32.xlu0 %v9735_v22, %s9399_s2 }
 0x3d4   :  { %v10017_v35 = vpop.eup %9228 }
 0x3d5   :  { %v1510_v34 = vsel %vm1422_vm10, %v10017_v35, 0.0 }
 0x3ea   :  { %1493 = vadd.xlane.f32.xlu1 %v1492_v32 }
 0x3ee   :  { %1499 = vadd.xlane.f32.xlu1 %v1498_v28 }
 0x3f1   :  { %1508 = vadd.xlane.f32.xlu0 %v1507_v43 }
 0x3f2   :  { %1505 = vadd.xlane.f32.xlu1 %v1504_v39 }
 0x3f6   :  { %1511 = vadd.xlane.f32.xlu1 %v1510_v34 }
 0x407   :  { %2707 = vrot.lane.b32.xlu1 %v9776_v63, %s9399_s2  ;;  %2627 = vrot.lane.b32.xlu0 %v9709_v5, %s9399_s2 }
 0x40b   :  { %2625 = vrot.lane.b32.xlu1 %v9769_v45, %s9399_s2  ;;  %2873 = vrot.lane.b32.xlu0 %v9746_v29, %s9399_s2 }
 0x40f   :  { %2871 = vrot.lane.b32.xlu1 %v9786_v50, %s9399_s2  ;;  %2791 = vrot.lane.b32.xlu0 %v9731_v33, %s9399_s2 }
 0x413   :  { %3037 = vrot.lane.b32.xlu1 %v9755_v36, %s9399_s2  ;;  %2789 = vrot.lane.b32.xlu0 %v9781_v49, %s9399_s2 }
 0x417   :  { %3035 = vrot.lane.b32.xlu1 %v9758_v37, %s9399_s2  ;;  %2955 = vrot.lane.b32.xlu0 %v9743_v26, %s9399_s2 }
 0x41b   :  { %3319 = vrot.lane.b32.xlu1 %v9697_v0, %s9401_s1  ;;  %2953 = vrot.lane.b32.xlu0 %v9750_v31, %s9399_s2  ;;  %s9402_s2 = smov 112  }
 0x41f   :  { %3471 = vrot.lane.b32.xlu1 %v9694_v59, %s9401_s1  ;;  %3243 = vrot.lane.b32.xlu0 %v9700_v2, %s9401_s1 }
 0x423   :  { %3395 = vrot.lane.b32.xlu1 %v9724_v18, %s9401_s1 }
 0x427   :  { %3623 = vrot.lane.b32.xlu1 %v9735_v22, %s9401_s1 }
 0x43d   :  { %v1485_v62 = vpop.xlane.xlu0 %1484 }
 0x43e   :  { %9230 = vrcp.f32 %v1485_v62 }
 0x441   :  { %v1497_v15 = vpop.xlane.xlu0 %1496 }
 0x442   :  { %v1488_v8 = vpop.xlane.xlu1 %1487 }
 0x443   :  { %9232 = vrcp.f32 %v1488_v8 }
 0x445   :  { %v1503_v42 = vpop.xlane.xlu0 %1502 }
 0x448   :  { %v9231_v7 = vpop.eup %9230 }
 0x449   :  { %v1491_v47 = vpop.xlane.xlu0 %1490  ;;  %v1523_v51 = vmul.f32 %v9231_v7, %v9972_v21 }
 0x44a   :  { %9234 = vrcp.f32 %v1491_v47 }
 0x44b   :  { %8695 = vmatmul.mubr.msk.f32.vlgmr.msra.gmra.mrb[8].mxu0 %vm621_vm9, %v1523_v51  ;;  %9236 = vrcp.f32 %v1497_v15 }
 0x44c   :  { %8703 = vmatpush3.msra.mxu0 %v9947_v46  ;;  %8704 = vmatprep.mubr.msk.f32.mxu0 %vm9398_vm8, %v11367_v9  ;;  %9238 = vrcp.f32 %v1503_v42 }
 0x44d   :  { %v9233_v32 = vpop.eup %9232  ;;  %8712 = vmatprep.subr.mxu0 %v11367_v9 }
 0x44e   :  { %v1524_v28 = vmul.f32 %v9233_v32, %v9978_v44 }
 0x450   :  { %8700 = vmatmul.mubr.msk.f32.vlgmr.msra.gmra.mrb[24].mxu1 %vm621_vm9, %v1524_v28 }
 0x451   :  { %8708 = vmatpush3.msra.mxu1 %v9943_v40  ;;  %8709 = vmatprep.mubr.msk.f32.mxu1 %vm9398_vm8, %v11367_v9 }
 0x452   :  { %8717 = vmatprep.subr.mxu1 %v11367_v9 }
 0x454   :  { %v9235_v21 = vpop.eup %9234 }
 0x455   :  { %v1525_v46 = vmul.f32 %v9235_v21, %v9988_v55  ;;  %v9237_v43 = vpop.eup %9236 }
 0x456   :  { %v1527_v40 = vmul.f32 %v9237_v43, %v9976_v23  ;;  %v9239_v44 = vpop.eup %9238 }
 0x457   :  { %8705 = vmatmul.mubr.msk.f32.vlgmr.msra.gmra.mrb[10].mxu0 %vm621_vm9, %v1525_v46  ;;  %v1529_v55 = vmul.f32 %v9239_v44, %v9984_v48 }
 0x458   :  { %8713 = vmatpush3.msra.mxu0 %v9955_v3  ;;  %8714 = vmatprep.mubr.msk.f32.mxu0 %vm9398_vm8, %v11367_v9  ;;  %v2462_v3 = vpop.permute.xlu1 %2461 }
 0x459   :  { %8722 = vmatprep.subr.mxu0 %v11367_v9 }
 0x45b   :  { %8715 = vmatmul.mubr.msk.f32.vlgmr.msra.gmra.mrb[12].mxu0 %vm621_vm9, %v1527_v40 }
 0x45c   :  { %8723 = vmatpush3.msra.mxu0 %v9959_v11  ;;  %8724 = vmatprep.mubr.msk.f32.mxu0 %vm9398_vm8, %v11367_v9  ;;  %v10087_v11 = vpop.permute.xlu0 %2709 }
 0x45d   :  { %8732 = vmatprep.subr.mxu0 %v11367_v9 }
 0x45f   :  { %8725 = vmatmul.mubr.msk.f32.vlgmr.msra.gmra.mrb[14].mxu0 %vm621_vm9, %v1529_v55 }
 0x460   :  { %8733 = vmatpush3.msra.mxu0 %v9963_v17  ;;  %8734 = vmatprep.mubr.msk.f32.mxu0 %vm9398_vm8, %v11367_v9 }
 0x461   :  { %8742 = vmatprep.subr.mxu0 %v11367_v9 }
 0x477   :  { %v1494_v23 = vpop.xlane.xlu1 %1493 }
 0x478   :  { %9240 = vrcp.f32 %v1494_v23 }
 0x47b   :  { %v1500_v39 = vpop.xlane.xlu1 %1499 }
 0x47c   :  { %9242 = vrcp.f32 %v1500_v39 }
 0x47e   :  { %v1509_v34 = vpop.xlane.xlu0 %1508 }
 0x47f   :  { %9244 = vrcp.f32 %v1509_v34  ;;  %v1506_v62 = vpop.xlane.xlu1 %1505 }
 0x480   :  { %9246 = vrcp.f32 %v1506_v62 }
 0x482   :  { %v9241_v48 = vpop.eup %9240  ;;  %v2628_v15 = vpop.permute.xlu0 %2627 }
 0x483   :  { %v1512_v8 = vpop.xlane.xlu1 %1511  ;;  %v1526_v17 = vmul.f32 %v9241_v48, %v10001_v52 }
 0x484   :  { %9248 = vrcp.f32 %v1512_v8 }
 0x485   :  { %8710 = vmatmul.mubr.msk.f32.vlgmr.msra.gmra.mrb[26].mxu1 %vm621_vm9, %v1526_v17 }
 0x486   :  { %v9243_v42 = vpop.eup %9242  ;;  %8718 = vmatpush3.msra.mxu1 %v9949_v24  ;;  %v2874_v7 = vpop.permute.xlu0 %2873  ;;  %8719 = vmatprep.mubr.msk.f32.mxu1 %vm9398_vm8, %v11367_v9 }
 0x487   :  { %8727 = vmatprep.subr.mxu1 %v11367_v9  ;;  %v1528_v47 = vmul.f32 %v9243_v42, %v10005_v14  ;;  %v2708_v28 = vpop.permute.xlu1 %2707 }
 0x489   :  { %v9245_v51 = vpop.eup %9244  ;;  %8720 = vmatmul.mubr.msk.f32.vlgmr.msra.gmra.mrb[28].mxu1 %vm621_vm9, %v1528_v47 }
 0x48a   :  { %v9247_v32 = vpop.eup %9246  ;;  %8728 = vmatpush3.msra.mxu1 %v9953_v1  ;;  %v2792_v52 = vpop.permute.xlu0 %2791  ;;  %8729 = vmatprep.mubr.msk.f32.mxu1 %vm9398_vm8, %v11367_v9  ;;  %v1531_v24 = vmul.f32 %v9245_v51, %v10007_v12 }
 0x48b   :  { %8737 = vmatprep.subr.mxu1 %v11367_v9  ;;  %v1530_v21 = vmul.f32 %v9247_v32, %v10011_v6  ;;  %v2626_v6 = vpop.permute.xlu1 %2625 }
 0x48c   :  { %8735 = vmatmul.mubr.msk.f32.vlgmr.msra.gmra.mrb[16].mxu0 %vm621_vm9, %v1531_v24 }
 0x48d   :  { %8730 = vmatmul.mubr.msk.f32.vlgmr.msra.gmra.mrb[30].mxu1 %vm621_vm9, %v1530_v21  ;;  %8743 = vmatpush3.xpose.msk.msra.mxu0 %vm621_vm9, %v9951_v60 }
 0x48e   :  { %v9249_v14 = vpop.eup %9248  ;;  %8738 = vmatpush3.msra.mxu1 %v9957_v4  ;;  %v2790_v1 = vpop.permute.xlu0 %2789  ;;  %8739 = vmatprep.mubr.msk.f32.mxu1 %vm9398_vm8, %v11367_v9 }
 0x48f   :  { %8744 = vmatprep.mubr.msk.f32.mxu0 %vm9398_vm8, %v11367_v9  ;;  %8752 = vmatprep.subr.mxu0 %v11367_v9  ;;  %v1532_v12 = vmul.f32 %v9249_v14, %v10017_v35  ;;  %v2872_v4 = vpop.permute.xlu1 %2871 }
 0x490   :  { %8745 = vmatmul.mubr.msk.f32.vlgmr.msra.gmra.mrb[18].mxu0 %vm621_vm9, %v9961_v13  ;;  %8747 = vmatprep.subr.mxu1 %v11367_v9 }
 0x491   :  { %8740 = vmatmul.mubr.msk.f32.vlgmr.msra.gmra.mrb[32].mxu1 %vm621_vm9, %v1532_v12  ;;  %8753 = vmatpush3.xpose.msk.msra.mxu0 %vm621_vm9, %v10053_v53 }
 0x492   :  { %8754 = vmatprep.mubr.msk.f32.mxu0 %vm9398_vm8, %v11367_v9  ;;  %8762 = vmatprep.subr.mxu0 %v11367_v9  ;;  %v2956_v60 = vpop.permute.xlu0 %2955 }
 0x493   :  { %8749 = vmatprep.mubr.msk.f32.mxu1 %vm9398_vm8, %v11367_v9  ;;  %v3038_v13 = vpop.permute.xlu1 %3037 }
 0x494   :  { %8755 = vmatmul.mubr.msk.f32.vlgmr.msra.gmra.mrb[20].mxu0 %vm621_vm9, %v2462_v3 }
 0x495   :  { %8748 = vmatpush3.xpose.msk.msra.mxu1 %vm621_vm9, %v9945_v41  ;;  %8763 = vmatpush3.xpose.msk.msra.mxu0 %vm621_vm9, %v2628_v15 }
 0x496   :  { %8757 = vmatprep.subr.mxu1 %v11367_v9  ;;  %8764 = vmatprep.mubr.msk.f32.mxu0 %vm9398_vm8, %v11367_v9  ;;  %v2954_v41 = vpop.permute.xlu0 %2953 }
 0x497   :  { %8772 = vmatprep.subr.mxu0 %v11367_v9 }
 0x498   :  { %8750 = vmatmul.mubr.msk.f32.vlgmr.msra.gmra.mrb[34].mxu1 %vm621_vm9, %v9965_v19  ;;  %8765 = vmatmul.mubr.msk.f32.vlgmr.msra.gmra.mrb[22].mxu0 %vm621_vm9, %v2626_v6  ;;  %v3036_v19 = vpop.permute.xlu1 %3035 }
 0x499   :  { %8758 = vmatpush3.xpose.msk.msra.mxu1 %vm621_vm9, %v9835_v54  ;;  %8773 = vmatpush3.xpose.msk.msra.mxu0 %vm621_vm9, %v2792_v52 }
 0x49a   :  { %8759 = vmatprep.mubr.msk.f32.mxu1 %vm9398_vm8, %v11367_v9  ;;  %8767 = vmatprep.subr.mxu1 %v11367_v9  ;;  %v3244_v54 = vpop.permute.xlu0 %3243 }
 0x49b   :  { %8774 = vmatprep.mubr.msk.f32.mxu0 %vm9398_vm8, %v11367_v9  ;;  %8782 = vmatprep.subr.mxu0 %v11367_v9 }
 0x49c   :  { %8760 = vmatmul.mubr.msk.f32.vlgmr.msra.gmra.mrb[36].mxu1 %vm621_vm9, %v10055_v38  ;;  %8775 = vmatmul.mubr.msk.f32.vlgmr.msra.gmra.mrb[24].mxu0 %vm621_vm9, %v2790_v1  ;;  %v3320_v35 = vpop.permute.xlu1 %3319 }
 0x49d   :  { %8768 = vmatpush3.xpose.msk.msra.mxu1 %vm621_vm9, %v10087_v11  ;;  %8783 = vmatpush3.xpose.msk.msra.mxu0 %vm621_vm9, %v2956_v60 }
 0x49e   :  { %8769 = vmatprep.mubr.msk.f32.mxu1 %vm9398_vm8, %v11367_v9  ;;  %8777 = vmatprep.subr.mxu1 %v11367_v9 }
 0x49f   :  { %8784 = vmatprep.mubr.msk.f32.mxu0 %vm9398_vm8, %v11367_v9  ;;  %8792 = vmatprep.subr.mxu0 %v11367_v9 }
 0x4a0   :  { %8770 = vmatmul.mubr.msk.f32.vlgmr.msra.gmra.mrb[38].mxu1 %vm621_vm9, %v2708_v28  ;;  %8785 = vmatmul.mubr.msk.f32.vlgmr.msra.gmra.mrb[26].mxu0 %vm621_vm9, %v2954_v41 }
 0x4a1   :  { %8778 = vmatpush3.xpose.msk.msra.mxu1 %vm621_vm9, %v2874_v7  ;;  %8793 = vmatpush3.msra.mxu0 %v3244_v54 }
 0x4a2   :  { %8779 = vmatprep.mubr.msk.f32.mxu1 %vm9398_vm8, %v11367_v9  ;;  %8787 = vmatprep.subr.mxu1 %v11367_v9 }
 0x4a3   :  { %8794 = vmatprep.mubr.msk.f32.mxu0 %vm9398_vm8, %v11367_v9  ;;  %8802 = vmatprep.subr.mxu0 %v11367_v9 }
 0x4a4   :  { %8780 = vmatmul.mubr.msk.f32.vlgmr.msra.gmra.mrb[40].mxu1 %vm621_vm9, %v2872_v4 }
 0x4a5   :  { %8788 = vmatpush3.xpose.msk.msra.mxu1 %vm621_vm9, %v3038_v13  ;;  %8789 = vmatprep.mubr.msk.f32.mxu1 %vm9398_vm8, %v11367_v9 }
 0x4a6   :  { %8797 = vmatprep.subr.mxu1 %v11367_v9 }
 0x4a8   :  { %8790 = vmatmul.mubr.msk.f32.vlgmr.msra.gmra.mrb[42].mxu1 %vm621_vm9, %v3036_v19 }
 0x4a9   :  { %8798 = vmatpush3.msra.mxu1 %v3320_v35  ;;  %8799 = vmatprep.mubr.msk.f32.mxu1 %vm9398_vm8, %v11367_v9 }
 0x4aa   :  { %8807 = vmatprep.subr.mxu1 %v11367_v9 }
 0x51e   :  { %v1605_v53 = vpop.f32.mrb[8].mxu0 }
 0x51f   :  { %v8696_v38 = vpop.f32.mrb[9].mxu0 }
 0x523   :  { %v1681_v46 = vpop.f32.mrb[24].mxu1 }
 0x524   :  { %v7353_v43 = vrot.slane %v1681_v46, 7  ;;  %v8701_v40 = vpop.f32.mrb[25].mxu1 }
 0x526   :  { %v7354_v44 = vsel %vm447_vm1, %v7353_v43, %v1605_v53 }
 0x52a   :  { %v1757_v55 = vpop.f32.mrb[10].mxu0 }
 0x52b   :  { %v7355_v3 = vrot.slane %v1757_v55, 6  ;;  %v8706_v23 = vpop.f32.mrb[11].mxu0 }
 0x52d   :  { %v7356_v11 = vsel %vm450_vm2, %v7355_v3, %v7354_v44 }
 0x52e   :  { %v1909_v39 = vpop.f32.mrb[12].mxu0 }
 0x52f   :  { %v8716_v34 = vpop.f32.mrb[13].mxu0  ;;  %v7359_v42 = vrot.slane %v1909_v39, 4 }
 0x532   :  { %v2061_v62 = vpop.f32.mrb[14].mxu0 }
 0x533   :  { %v8726_v48 = vpop.f32.mrb[15].mxu0  ;;  %v7363_v52 = vrot.slane %v2061_v62, 2 }
 0x558   :  { %v1833_v15 = vpop.f32.mrb[26].mxu1 }
 0x559   :  { %v7357_v8 = vrot.slane %v1833_v15, 5  ;;  %v8711_v17 = vpop.f32.mrb[27].mxu1 }
 0x55b   :  { %v7358_v7 = vsel %vm453_vm3, %v7357_v8, %v7356_v11 }
 0x55c   :  { %v1985_v47 = vpop.f32.mrb[28].mxu1  ;;  %v7360_v51 = vsel %vm456_vm4, %v7359_v42, %v7358_v7 }
 0x55d   :  { %v7361_v32 = vrot.slane %v1985_v47, 3  ;;  %v8721_v28 = vpop.f32.mrb[29].mxu1 }
 0x55f   :  { %v7362_v24 = vsel %vm459_vm5, %v7361_v32, %v7360_v51  ;;  %v2213_v21 = vpop.f32.mrb[16].mxu0 }
 0x560   :  { %v2137_v14 = vpop.f32.mrb[30].mxu1  ;;  %v8736_v1 = vpop.f32.mrb[17].mxu0  ;;  %v7364_v12 = vsel %vm462_vm6, %v7363_v52, %v7362_v24 }
 0x561   :  { %v7365_v6 = vrot.slane %v2137_v14, 1  ;;  %v8731_v60 = vpop.f32.mrb[31].mxu1 }
 0x563   :  { %v2371_v4 = vpop.f32.mrb[18].mxu0  ;;  %v10182_v41 = vsel %vm464_vm7, %v7365_v6, %v7364_v12 }
 0x564   :  { %11368 = vst [vmem:[#allocation8_spill] sm:$0xff] %v10182_v41  ;;  %v2289_v13 = vpop.f32.mrb[32].mxu1  ;;  %v3113_v54 = vmul.f32 0.35355338, %v2371_v4  ;;  %v8746_v19 = vpop.f32.mrb[19].mxu0 }
 0x565   :  { %v7367_v35 = vrot.slane %v2289_v13, 7  ;;  %v8741_v53 = vpop.f32.mrb[33].mxu1 }
 0x566   :  { %v10185_v38 = vadd.f32 %v3113_v54, %v9845_v58 }
 0x567   :  { %v2535_v46 = vpop.f32.mrb[20].mxu0  ;;  %v10188_v43 = vsel %vm447_vm1, %v7367_v35, %v2213_v21 }
 0x568   :  { %11369 = vst [vmem:[#allocation9_spill] sm:$0xff] %v10188_v43  ;;  %v3115_v40 = vmul.f32 0.35355338, %v2535_v46  ;;  %v8756_v44 = vpop.f32.mrb[21].mxu0  ;;  %v3133_v55 = vsel %vm1422_vm10, %v10185_v38, -inf }
 0x569   :  { %3134 = vmax.xlane.f32.xlu0 %v3133_v55 }
 0x56a   :  { %v10193_v3 = vadd.f32 %v3115_v40, %v9873_v27 }
 0x56b   :  { %v2453_v23 = vpop.f32.mrb[34].mxu1  ;;  %v2699_v11 = vpop.f32.mrb[22].mxu0 }
 0x56c   :  { %v3114_v39 = vmul.f32 0.35355338, %v2453_v23  ;;  %v8751_v34 = vpop.f32.mrb[35].mxu1  ;;  %v8766_v62 = vpop.f32.mrb[23].mxu0  ;;  %v3139_v48 = vsel %vm1422_vm10, %v10193_v3, -inf }
 0x56d   :  { %3140 = vmax.xlane.f32.xlu0 %v3139_v48  ;;  %v3117_v13 = vmul.f32 0.35355338, %v2699_v11 }
 0x56e   :  { %v10198_v15 = vadd.f32 %v3114_v39, %v9858_v16 }
 0x56f   :  { %v2617_v8 = vpop.f32.mrb[36].mxu1  ;;  %v2863_v17 = vpop.f32.mrb[24].mxu0  ;;  %v10217_v46 = vadd.f32 %v3117_v13, %v9850_v10 }
 0x570   :  { %v3116_v42 = vmul.f32 0.35355338, %v2617_v8  ;;  %v8761_v7 = vpop.f32.mrb[37].mxu1  ;;  %v3136_v47 = vsel %vm1422_vm10, %v10198_v15, -inf  ;;  %v8776_v51 = vpop.f32.mrb[25].mxu0 }
 0x571   :  { %3137 = vmax.xlane.f32.xlu1 %v3136_v47  ;;  %v3119_v35 = vmul.f32 0.35355338, %v2863_v17  ;;  %v3145_v55 = vsel %vm1422_vm10, %v10217_v46, -inf  ;;  %v11371_v51 = vld [vmem:[#allocation6_spill] sm:$0xff] }
 0x572   :  { %v10203_v32 = vadd.f32 %v3116_v42, %v9900_v61  ;;  %v11370_v42 = vld [vmem:[#allocation7_spill] sm:$0xff] }
 0x573   :  { %v2781_v28 = vpop.f32.mrb[38].mxu1  ;;  %v3027_v52 = vpop.f32.mrb[26].mxu0  ;;  %v10227_v11 = vadd.f32 %v3119_v35, %v9865_v20 }
 0x574   :  { %v8771_v24 = vpop.f32.mrb[39].mxu1  ;;  %v3142_v21 = vsel %vm1422_vm10, %v10203_v32, -inf  ;;  %v8786_v14 = vpop.f32.mrb[27].mxu0  ;;  %v3118_v4 = vmul.f32 0.35355338, %v2781_v28 }
 0x575   :  { %3143 = vmax.xlane.f32.xlu0 %v3142_v21  ;;  %v3121_v44 = vmul.f32 0.35355338, %v3027_v52  ;;  %v3151_v39 = vsel %vm1422_vm10, %v10227_v11, -inf  ;;  %v10262_v52 = vpop.permute.xlu1 %3471  ;;  %v11372_v14 = vld [vmem:[#allocation5_spill] sm:$0xff] }
 0x576   :  { %v10212_v19 = vadd.f32 %v3118_v4, %v9898_v57 }
 0x577   :  { %v2945_v1 = vpop.f32.mrb[40].mxu1  ;;  %v10232_v34 = vadd.f32 %v3121_v44, %v9893_v56 }
 0x578   :  { %v8781_v12 = vpop.f32.mrb[41].mxu1  ;;  %v3120_v54 = vmul.f32 0.35355338, %v2945_v1  ;;  %v3148_v53 = vsel %vm1422_vm10, %v10212_v19, -inf }
 0x579   :  { %v3157_v62 = vsel %vm1422_vm10, %v10232_v34, -inf  ;;  %v11373_v12 = vld [vmem:[#allocation4_spill] sm:$0xff] }
 0x57a   :  { %v10220_v40 = vadd.f32 %v3120_v54, %v9913_v25 }
 0x57b   :  { %v3109_v6 = vpop.f32.mrb[42].mxu1 }
 0x57c   :  { %v8791_v60 = vpop.f32.mrb[43].mxu1  ;;  %v3154_v23 = vsel %vm1422_vm10, %v10220_v40, -inf  ;;  %v3122_v48 = vmul.f32 0.35355338, %v3109_v6  ;;  %v10269_v6 = vpop.permute.xlu1 %3395 }
 0x57e   :  { %v10249_v8 = vadd.f32 %v3122_v48, %v9928_v30 }
 0x580   :  { %v3160_v17 = vsel %vm1422_vm10, %v10249_v8, -inf  ;;  %v10275_v4 = vpop.permute.xlu1 %3623 }
 0x582   :  { %3775 = vrot.lane.b32.xlu1 %v9746_v29, %s9401_s1 }
 0x58b   :  { %3547 = vrot.lane.b32.xlu0 %v9709_v5, %s9401_s1 }
 0x5a6   :  { %3149 = vmax.xlane.f32.xlu1 %v3148_v53 }
 0x5aa   :  { %3146 = vmax.xlane.f32.xlu0 %v3145_v55  ;;  %3155 = vmax.xlane.f32.xlu1 %v3154_v23 }
 0x5ae   :  { %3152 = vmax.xlane.f32.xlu0 %v3151_v39 }
 0x5b2   :  { %3158 = vmax.xlane.f32.xlu0 %v3157_v62 }
 0x5bb   :  { %3927 = vrot.lane.b32.xlu1 %v9755_v36, %s9401_s1 }
 0x5c8   :  { %3699 = vrot.lane.b32.xlu0 %v9731_v33, %s9401_s1 }
 0x5cc   :  { %3851 = vrot.lane.b32.xlu0 %v9743_v26, %s9401_s1 }
 0x5d0   :  { %4005 = vrot.lane.b32.xlu0 %v9700_v2, %s9402_s2 }
 0x5d4   :  { %4239 = vrot.lane.b32.xlu0 %v9694_v59, %s9402_s2 }
 0x5d8   :  { %4161 = vrot.lane.b32.xlu0 %v9724_v18, %s9402_s2 }
 0x5dc   :  { %4395 = vrot.lane.b32.xlu0 %v9735_v22, %s9402_s2 }
 0x5df   :  { %3161 = vmax.xlane.f32.xlu1 %v3160_v17 }
 0x5f0   :  { %4083 = vrot.lane.b32.xlu1 %v9697_v0, %s9402_s2 }
 0x5f4   :  { %4081 = vrot.lane.b32.xlu1 %v11370_v42, %s9402_s2 }
 0x5f6   :  { %v3135_v7 = vpop.xlane.xlu0 %3134 }
 0x5f7   :  { %v3163_v47 = vsub.f32 %v10185_v38, %v3135_v7 }
 0x5f8   :  { %4003 = vrot.lane.b32.xlu1 %v11371_v51, %s9402_s2 }
 0x5f9   :  { %v3173_v28 = vmul.f32 1.442695, %v3163_v47 }
 0x5fa   :  { %v3141_v24 = vpop.xlane.xlu0 %3140 }
 0x5fb   :  { %9250 = vpow2.f32 %v3173_v28  ;;  %v3165_v21 = vsub.f32 %v10193_v3, %v3141_v24 }
 0x5fc   :  { %4237 = vrot.lane.b32.xlu1 %v11372_v14, %s9402_s2 }
 0x5fd   :  { %v3177_v1 = vmul.f32 1.442695, %v3165_v21 }
 0x5fe   :  { %v3138_v3 = vpop.xlane.xlu1 %3137 }
 0x5ff   :  { %9252 = vpow2.f32 %v3177_v1  ;;  %v3164_v35 = vsub.f32 %v10198_v15, %v3138_v3 }
 0x600   :  { %4159 = vrot.lane.b32.xlu1 %v11373_v12, %s9402_s2 }
 0x601   :  { %v3175_v44 = vmul.f32 1.442695, %v3164_v35 }
 0x602   :  { %v3144_v53 = vpop.xlane.xlu0 %3143  ;;  %v10291_v15 = vpop.permute.xlu1 %3775 }
 0x603   :  { %v3166_v55 = vsub.f32 %v10203_v32, %v3144_v53  ;;  %9254 = vpow2.f32 %v3175_v44 }
 0x605   :  { %v10271_v38 = vpop.eup %9250  ;;  %v3179_v23 = vmul.f32 1.442695, %v3166_v55 }
 0x606   :  { %v3193_v60 = vsel %vm1422_vm10, %v10271_v38, 0.0  ;;  %v10293_v7 = vpop.permute.xlu0 %3547 }
 0x607   :  { %3194 = vadd.xlane.f32.xlu0 %v3193_v60  ;;  %9256 = vpow2.f32 %v3179_v23 }
 0x609   :  { %v10277_v13 = vpop.eup %9252 }
 0x60a   :  { %v3199_v54 = vsel %vm1422_vm10, %v10277_v13, 0.0 }
 0x60b   :  { %3200 = vadd.xlane.f32.xlu0 %v3199_v54 }
 0x60d   :  { %v10283_v39 = vpop.eup %9254 }
 0x60e   :  { %v3196_v62 = vsel %vm1422_vm10, %v10283_v39, 0.0 }
 0x611   :  { %v10287_v48 = vpop.eup %9256 }
 0x612   :  { %v3202_v17 = vsel %vm1422_vm10, %v10287_v48, 0.0 }
 0x624   :  { %3197 = vadd.xlane.f32.xlu1 %v3196_v62 }
 0x628   :  { %3203 = vadd.xlane.f32.xlu1 %v3202_v17 }
 0x633   :  { %v3150_v32 = vpop.xlane.xlu1 %3149 }
 0x634   :  { %v3168_v47 = vsub.f32 %v10212_v19, %v3150_v32 }
 0x636   :  { %v3183_v28 = vmul.f32 1.442695, %v3168_v47 }
 0x637   :  { %v3147_v24 = vpop.xlane.xlu0 %3146  ;;  %v3156_v21 = vpop.xlane.xlu1 %3155 }
 0x638   :  { %9258 = vpow2.f32 %v3183_v28  ;;  %v3167_v1 = vsub.f32 %v10217_v46, %v3147_v24  ;;  %v3170_v60 = vsub.f32 %v10220_v40, %v3156_v21 }
 0x63a   :  { %v3181_v3 = vmul.f32 1.442695, %v3167_v1  ;;  %v3187_v54 = vmul.f32 1.442695, %v3170_v60 }
 0x63b   :  { %v3153_v35 = vpop.xlane.xlu0 %3152  ;;  %v10322_v21 = vpop.permute.xlu1 %3927 }
 0x63c   :  { %9260 = vpow2.f32 %v3181_v3  ;;  %v3169_v53 = vsub.f32 %v10227_v11, %v3153_v35 }
 0x63d   :  { %9262 = vpow2.f32 %v3187_v54 }
 0x63e   :  { %v3185_v44 = vmul.f32 1.442695, %v3169_v53 }
 0x63f   :  { %v3159_v55 = vpop.xlane.xlu0 %3158 }
 0x640   :  { %9264 = vpow2.f32 %v3185_v44  ;;  %v3171_v19 = vsub.f32 %v10232_v34, %v3159_v55 }
 0x642   :  { %v10300_v23 = vpop.eup %9258  ;;  %v3189_v62 = vmul.f32 1.442695, %v3171_v19 }
 0x643   :  { %v3208_v46 = vsel %vm1422_vm10, %v10300_v23, 0.0  ;;  %v10329_v54 = vpop.permute.xlu0 %3699 }
 0x644   :  { %9266 = vpow2.f32 %v3189_v62  ;;  %3209 = vadd.xlane.f32.xlu1 %v3208_v46 }
 0x646   :  { %v10304_v40 = vpop.eup %9260 }
 0x647   :  { %v10306_v17 = vpop.eup %9262  ;;  %v3205_v11 = vsel %vm1422_vm10, %v10304_v40, 0.0  ;;  %v10335_v35 = vpop.permute.xlu0 %3851 }
 0x648   :  { %3206 = vadd.xlane.f32.xlu0 %v3205_v11  ;;  %v3214_v32 = vsel %vm1422_vm10, %v10306_v17, 0.0 }
 0x649   :  { %3215 = vadd.xlane.f32.xlu1 %v3214_v32 }
 0x64a   :  { %v10312_v34 = vpop.eup %9264 }
 0x64b   :  { %v3211_v47 = vsel %vm1422_vm10, %v10312_v34, 0.0  ;;  %v10343_v44 = vpop.permute.xlu0 %4005 }
 0x64c   :  { %3212 = vadd.xlane.f32.xlu0 %v3211_v47 }
 0x64e   :  { %v10316_v28 = vpop.eup %9266 }
 0x64f   :  { %v3217_v24 = vsel %vm1422_vm10, %v10316_v28, 0.0  ;;  %v10349_v55 = vpop.permute.xlu0 %4239 }
 0x650   :  { %3218 = vadd.xlane.f32.xlu0 %v3217_v24 }
 0x653   :  { %v10353_v19 = vpop.permute.xlu0 %4161 }
 0x657   :  { %v10361_v62 = vpop.permute.xlu0 %4395 }
 0x666   :  { %4317 = vrot.lane.b32.xlu0 %v9709_v5, %s9402_s2 }
 0x66a   :  { %4551 = vrot.lane.b32.xlu0 %v9746_v29, %s9402_s2 }
 0x66c   :  { %v3162_v1 = vpop.xlane.xlu1 %3161 }
 0x66d   :  { %v3172_v60 = vsub.f32 %v10249_v8, %v3162_v1 }
 0x66e   :  { %4473 = vrot.lane.b32.xlu0 %v9731_v33, %s9402_s2 }
 0x66f   :  { %v3191_v3 = vmul.f32 1.442695, %v3172_v60 }
 0x670   :  { %v10367_v11 = vpop.permute.xlu1 %4083 }
 0x671   :  { %9268 = vpow2.f32 %v3191_v3 }
 0x672   :  { %4471 = vrot.lane.b32.xlu0 %v9781_v49, %s9402_s2 }
 0x674   :  { %v10375_v47 = vpop.permute.xlu1 %4081 }
 0x676   :  { %4629 = vrot.lane.b32.xlu0 %v9743_v26, %s9402_s2 }
 0x678   :  { %v10380_v60 = vpop.permute.xlu1 %4003 }
 0x67a   :  { %4627 = vrot.lane.b32.xlu0 %v9750_v31, %s9402_s2 }
 0x67b   :  { %v10339_v53 = vpop.eup %9268 }
 0x67c   :  { %v3220_v8 = vsel %vm1422_vm10, %v10339_v53, 0.0 }
 0x67d   :  { %3221 = vadd.xlane.f32.xlu1 %v3220_v8 }
 0x67e   :  { %4913 = vrot.lane.b32.xlu0 %v9700_v2, %s9403_s29 }
 0x682   :  { %5217 = vrot.lane.b32.xlu0 %v9709_v5, %s9403_s29 }
 0x686   :  { %5369 = vrot.lane.b32.xlu0 %v9731_v33, %s9403_s29 }
 0x68a   :  { %5521 = vrot.lane.b32.xlu0 %v9743_v26, %s9403_s29 }
 0x68e   :  { %5675 = vrot.lane.b32.xlu0 %v9700_v2, %s9404_s30  ;;  %4393 = vrot.lane.b32.xlu1 %v9776_v63, %s9402_s2 }
 0x692   :  { %5909 = vrot.lane.b32.xlu0 %v9694_v59, %s9404_s30  ;;  %4315 = vrot.lane.b32.xlu1 %v9769_v45, %s9402_s2 }
 0x694   :  { %v3195_v46 = vpop.xlane.xlu0 %3194 }
 0x695   :  { %9270 = vrcp.f32 %v3195_v46 }
 0x696   :  { %5831 = vrot.lane.b32.xlu0 %v9724_v18, %s9404_s30  ;;  %4549 = vrot.lane.b32.xlu1 %v9786_v50, %s9402_s2 }
 0x698   :  { %v3201_v32 = vpop.xlane.xlu0 %3200 }
 0x699   :  { %9272 = vrcp.f32 %v3201_v32 }
 0x69a   :  { %4707 = vrot.lane.b32.xlu1 %v9755_v36, %s9402_s2 }
 0x69e   :  { %4705 = vrot.lane.b32.xlu1 %v9758_v37, %s9402_s2 }
 0x69f   :  { %v9271_v24 = vpop.eup %9270 }
 0x6a0   :  { %v3233_v1 = vmul.f32 %v9271_v24, %v10271_v38  ;;  %v10392_v38 = vpop.permute.xlu1 %4237 }
 0x6a2   :  { %4989 = vrot.lane.b32.xlu1 %v9697_v0, %s9403_s29  ;;  %8795 = vmatmul.mubr.msk.f32.vlgmr.msra.gmra.mrb[28].mxu0 %vm621_vm9, %v3233_v1 }
 0x6a3   :  { %8803 = vmatpush3.msra.mxu0 %v10269_v6  ;;  %8804 = vmatprep.mubr.msk.f32.mxu0 %vm9398_vm8, %v11367_v9  ;;  %v9273_v3 = vpop.eup %9272 }
 0x6a4   :  { %8812 = vmatprep.subr.mxu0 %v11367_v9  ;;  %v3235_v8 = vmul.f32 %v9273_v3, %v10277_v13  ;;  %v10401_v6 = vpop.permute.xlu1 %4159 }
 0x6a6   :  { %5141 = vrot.lane.b32.xlu1 %v9694_v59, %s9403_s29  ;;  %8805 = vmatmul.mubr.msk.f32.vlgmr.msra.gmra.mrb[30].mxu0 %vm621_vm9, %v3235_v8 }
 0x6a7   :  { %8813 = vmatpush3.msra.mxu0 %v10293_v7  ;;  %8814 = vmatprep.mubr.msk.f32.mxu0 %vm9398_vm8, %v11367_v9 }
 0x6a8   :  { %8822 = vmatprep.subr.mxu0 %v11367_v9 }
 0x6aa   :  { %5065 = vrot.lane.b32.xlu1 %v9724_v18, %s9403_s29 }
 0x6ae   :  { %5293 = vrot.lane.b32.xlu1 %v9735_v22, %s9403_s29 }
 0x6b1   :  { %v3198_v13 = vpop.xlane.xlu1 %3197 }
 0x6b2   :  { %9274 = vrcp.f32 %v3198_v13  ;;  %5445 = vrot.lane.b32.xlu1 %v9746_v29, %s9403_s29 }
 0x6b5   :  { %v3204_v46 = vpop.xlane.xlu1 %3203 }
 0x6b6   :  { %9276 = vrcp.f32 %v3204_v46  ;;  %5597 = vrot.lane.b32.xlu1 %v9755_v36, %s9403_s29 }
 0x6ba   :  { %5753 = vrot.lane.b32.xlu1 %v9697_v0, %s9404_s30 }
 0x6bc   :  { %v9275_v7 = vpop.eup %9274 }
 0x6bd   :  { %v3234_v32 = vmul.f32 %v9275_v7, %v10283_v39 }
 0x6be   :  { %5751 = vrot.lane.b32.xlu1 %v11370_v42, %s9404_s30 }
 0x6bf   :  { %8800 = vmatmul.mubr.msk.f32.vlgmr.msra.gmra.mrb[44].mxu1 %vm621_vm9, %v3234_v32 }
 0x6c0   :  { %v9277_v24 = vpop.eup %9276  ;;  %8808 = vmatpush3.msra.mxu1 %v10262_v52  ;;  %8809 = vmatprep.mubr.msk.f32.mxu1 %vm9398_vm8, %v11367_v9 }
 0x6c1   :  { %8817 = vmatprep.subr.mxu1 %v11367_v9  ;;  %v3236_v1 = vmul.f32 %v9277_v24, %v10287_v48 }
 0x6c2   :  { %5673 = vrot.lane.b32.xlu1 %v11371_v51, %s9404_s30 }
 0x6c3   :  { %8810 = vmatmul.mubr.msk.f32.vlgmr.msra.gmra.mrb[46].mxu1 %vm621_vm9, %v3236_v1 }
 0x6c4   :  { %8818 = vmatpush3.msra.mxu1 %v10275_v4  ;;  %8819 = vmatprep.mubr.msk.f32.mxu1 %vm9398_vm8, %v11367_v9 }
 0x6c5   :  { %8827 = vmatprep.subr.mxu1 %v11367_v9 }
 0x6c6   :  { %5907 = vrot.lane.b32.xlu1 %v11372_v14, %s9404_s30 }
 0x6d1   :  { %v3210_v42 = vpop.xlane.xlu1 %3209 }
 0x6d2   :  { %9278 = vrcp.f32 %v3210_v42 }
 0x6d5   :  { %v3207_v52 = vpop.xlane.xlu0 %3206 }
 0x6d6   :  { %9280 = vrcp.f32 %v3207_v52  ;;  %v3216_v39 = vpop.xlane.xlu1 %3215 }
 0x6d7   :  { %9282 = vrcp.f32 %v3216_v39 }
 0x6d9   :  { %v3213_v48 = vpop.xlane.xlu0 %3212 }
 0x6da   :  { %9284 = vrcp.f32 %v3213_v48 }
 0x6dc   :  { %v9279_v51 = vpop.eup %9278 }
 0x6dd   :  { %v3219_v3 = vpop.xlane.xlu0 %3218  ;;  %v3238_v4 = vmul.f32 %v9279_v51, %v10300_v23 }
 0x6de   :  { %9286 = vrcp.f32 %v3219_v3 }
 0x6df   :  { %8820 = vmatmul.mubr.msk.f32.vlgmr.msra.gmra.mrb[48].mxu1 %vm621_vm9, %v3238_v4 }
 0x6e0   :  { %v9281_v8 = vpop.eup %9280  ;;  %8828 = vmatpush3.msra.mxu1 %v10291_v15  ;;  %8829 = vmatprep.mubr.msk.f32.mxu1 %vm9398_vm8, %v11367_v9 }
 0x6e1   :  { %v9283_v14 = vpop.eup %9282  ;;  %8837 = vmatprep.subr.mxu1 %v11367_v9  ;;  %v3237_v13 = vmul.f32 %v9281_v8, %v10304_v40 }
 0x6e2   :  { %v3240_v46 = vmul.f32 %v9283_v14, %v10306_v17  ;;  %v4318_v17 = vpop.permute.xlu0 %4317 }
 0x6e3   :  { %8815 = vmatmul.mubr.msk.f32.vlgmr.msra.gmra.mrb[32].mxu0 %vm621_vm9, %v3237_v13 }
 0x6e4   :  { %v9285_v7 = vpop.eup %9284  ;;  %8823 = vmatpush3.msra.mxu0 %v10329_v54  ;;  %8830 = vmatmul.mubr.msk.f32.vlgmr.msra.gmra.mrb[50].mxu1 %vm621_vm9, %v3240_v46 }
 0x6e5   :  { %8838 = vmatpush3.msra.mxu1 %v10322_v21  ;;  %8824 = vmatprep.mubr.msk.f32.mxu0 %vm9398_vm8, %v11367_v9  ;;  %v3239_v15 = vmul.f32 %v9285_v7, %v10312_v34 }
 0x6e6   :  { %8832 = vmatprep.subr.mxu0 %v11367_v9  ;;  %8839 = vmatprep.mubr.msk.f32.mxu1 %vm9398_vm8, %v11367_v9  ;;  %v4552_v34 = vpop.permute.xlu0 %4551 }
 0x6e7   :  { %8825 = vmatmul.mubr.msk.f32.vlgmr.msra.gmra.mrb[34].mxu0 %vm621_vm9, %v3239_v15  ;;  %8847 = vmatprep.subr.mxu1 %v11367_v9 }
 0x6e8   :  { %v9287_v23 = vpop.eup %9286  ;;  %8833 = vmatpush3.msra.mxu0 %v10335_v35  ;;  %8834 = vmatprep.mubr.msk.f32.mxu0 %vm9398_vm8, %v11367_v9 }
 0x6e9   :  { %v3241_v40 = vmul.f32 %v9287_v23, %v10316_v28  ;;  %8842 = vmatprep.subr.mxu0 %v11367_v9 }
 0x6ea   :  { %v4474_v28 = vpop.permute.xlu0 %4473 }
 0x6eb   :  { %8835 = vmatmul.mubr.msk.f32.vlgmr.msra.gmra.mrb[36].mxu0 %vm621_vm9, %v3241_v40 }
 0x6ec   :  { %8844 = vmatprep.mubr.msk.f32.mxu0 %vm9398_vm8, %v11367_v9 }
 0x6ee   :  { %v4472_v21 = vpop.permute.xlu0 %4471 }
 0x6ef   :  { %8843 = vmatpush3.xpose.msk.msra.mxu0 %vm621_vm9, %v10343_v44 }
 0x6f0   :  { %8852 = vmatprep.subr.mxu0 %v11367_v9 }
 0x6f2   :  { %8845 = vmatmul.mubr.msk.f32.vlgmr.msra.gmra.mrb[38].mxu0 %vm621_vm9, %v10380_v60  ;;  %v4630_v44 = vpop.permute.xlu0 %4629 }
 0x6f3   :  { %8853 = vmatpush3.xpose.msk.msra.mxu0 %vm621_vm9, %v10353_v19  ;;  %8854 = vmatprep.mubr.msk.f32.mxu0 %vm9398_vm8, %v11367_v9 }
 0x6f4   :  { %8862 = vmatprep.subr.mxu0 %v11367_v9 }
 0x6f6   :  { %8855 = vmatmul.mubr.msk.f32.vlgmr.msra.gmra.mrb[40].mxu0 %vm621_vm9, %v10401_v6  ;;  %v4628_v6 = vpop.permute.xlu0 %4627 }
 0x6f7   :  { %8863 = vmatpush3.xpose.msk.msra.mxu0 %vm621_vm9, %v4318_v17  ;;  %8864 = vmatprep.mubr.msk.f32.mxu0 %vm9398_vm8, %v11367_v9 }
 0x6f8   :  { %8872 = vmatprep.subr.mxu0 %v11367_v9 }
 0x6fa   :  { %v4914_v1 = vpop.permute.xlu0 %4913 }
 0x70a   :  { %v3222_v54 = vpop.xlane.xlu1 %3221 }
 0x70b   :  { %9288 = vrcp.f32 %v3222_v54 }
 0x70e   :  { %v4394_v35 = vpop.permute.xlu1 %4393 }
 0x712   :  { %v4316_v19 = vpop.permute.xlu1 %4315 }
 0x713   :  { %8865 = vmatmul.mubr.msk.f32.vlgmr.msra.gmra.mrb[42].mxu0 %vm621_vm9, %v4316_v19 }
 0x714   :  { %8873 = vmatpush3.xpose.msk.msra.mxu0 %vm621_vm9, %v4474_v28  ;;  %8874 = vmatprep.mubr.msk.f32.mxu0 %vm9398_vm8, %v11367_v9 }
 0x715   :  { %v9289_v60 = vpop.eup %9288  ;;  %8882 = vmatprep.subr.mxu0 %v11367_v9 }
 0x716   :  { %v3242_v32 = vmul.f32 %v9289_v60, %v10339_v53  ;;  %v4550_v24 = vpop.permute.xlu1 %4549 }
 0x717   :  { %8875 = vmatmul.mubr.msk.f32.vlgmr.msra.gmra.mrb[44].mxu0 %vm621_vm9, %v4472_v21 }
 0x718   :  { %8883 = vmatpush3.xpose.msk.msra.mxu0 %vm621_vm9, %v4630_v44  ;;  %8840 = vmatmul.mubr.msk.f32.vlgmr.msra.gmra.mrb[52].mxu1 %vm621_vm9, %v3242_v32 }
 0x719   :  { %8848 = vmatpush3.xpose.msk.msra.mxu1 %vm621_vm9, %v10367_v11  ;;  %8884 = vmatprep.mubr.msk.f32.mxu0 %vm9398_vm8, %v11367_v9 }
 0x71a   :  { %8892 = vmatprep.subr.mxu0 %v11367_v9  ;;  %8849 = vmatprep.mubr.msk.f32.mxu1 %vm9398_vm8, %v11367_v9  ;;  %v4708_v53 = vpop.permute.xlu1 %4707 }
 0x71b   :  { %8857 = vmatprep.subr.mxu1 %v11367_v9  ;;  %8885 = vmatmul.mubr.msk.f32.vlgmr.msra.gmra.mrb[46].mxu0 %vm621_vm9, %v4628_v6 }
 0x71c   :  { %8893 = vmatpush3.msra.mxu0 %v4914_v1  ;;  %8850 = vmatmul.mubr.msk.f32.vlgmr.msra.gmra.mrb[54].mxu1 %vm621_vm9, %v10375_v47 }
 0x71d   :  { %8858 = vmatpush3.xpose.msk.msra.mxu1 %vm621_vm9, %v10349_v55  ;;  %8859 = vmatprep.mubr.msk.f32.mxu1 %vm9398_vm8, %v11367_v9 }
 0x71e   :  { %8867 = vmatprep.subr.mxu1 %v11367_v9  ;;  %8894 = vmatprep.mubr.msk.f32.mxu0 %vm9398_vm8, %v11367_v9  ;;  %v4706_v55 = vpop.permute.xlu1 %4705 }
 0x71f   :  { %8902 = vmatprep.subr.mxu0 %v11367_v9 }
 0x720   :  { %8860 = vmatmul.mubr.msk.f32.vlgmr.msra.gmra.mrb[56].mxu1 %vm621_vm9, %v10392_v38 }
 0x721   :  { %8868 = vmatpush3.xpose.msk.msra.mxu1 %vm621_vm9, %v10361_v62  ;;  %8869 = vmatprep.mubr.msk.f32.mxu1 %vm9398_vm8, %v11367_v9 }
 0x722   :  { %8877 = vmatprep.subr.mxu1 %v11367_v9  ;;  %v4990_v62 = vpop.permute.xlu1 %4989 }
 0x724   :  { %8870 = vmatmul.mubr.msk.f32.vlgmr.msra.gmra.mrb[58].mxu1 %vm621_vm9, %v4394_v35 }
 0x725   :  { %8878 = vmatpush3.xpose.msk.msra.mxu1 %vm621_vm9, %v4552_v34  ;;  %8879 = vmatprep.mubr.msk.f32.mxu1 %vm9398_vm8, %v11367_v9 }
 0x726   :  { %8887 = vmatprep.subr.mxu1 %v11367_v9 }
 0x728   :  { %8880 = vmatmul.mubr.msk.f32.vlgmr.msra.gmra.mrb[60].mxu1 %vm621_vm9, %v4550_v24 }
 0x729   :  { %8888 = vmatpush3.xpose.msk.msra.mxu1 %vm621_vm9, %v4708_v53  ;;  %8889 = vmatprep.mubr.msk.f32.mxu1 %vm9398_vm8, %v11367_v9 }
 0x72a   :  { %8897 = vmatprep.subr.mxu1 %v11367_v9 }
 0x72c   :  { %8890 = vmatmul.mubr.msk.f32.vlgmr.msra.gmra.mrb[62].mxu1 %vm621_vm9, %v4706_v55 }
 0x72d   :  { %8898 = vmatpush3.msra.mxu1 %v4990_v62  ;;  %8899 = vmatprep.mubr.msk.f32.mxu1 %vm9398_vm8, %v11367_v9 }
 0x72e   :  { %8907 = vmatprep.subr.mxu1 %v11367_v9 }
 0x775   :  { %v3315_v11 = vpop.f32.mrb[28].mxu0 }
 0x776   :  { %v8796_v47 = vpop.f32.mrb[29].mxu0 }
 0x779   :  { %v3467_v38 = vpop.f32.mrb[30].mxu0 }
 0x77a   :  { %v8806_v42 = vpop.f32.mrb[31].mxu0  ;;  %v7383_v51 = vrot.slane %v3467_v38, 6 }
 0x792   :  { %v3391_v52 = vpop.f32.mrb[44].mxu1 }
 0x793   :  { %v7381_v39 = vrot.slane %v3391_v52, 7  ;;  %v8801_v48 = vpop.f32.mrb[45].mxu1 }
 0x795   :  { %v7382_v3 = vsel %vm447_vm1, %v7381_v39, %v3315_v11 }
 0x796   :  { %v3543_v4 = vpop.f32.mrb[46].mxu1  ;;  %v7384_v8 = vsel %vm450_vm2, %v7383_v51, %v7382_v3 }
 0x797   :  { %v7385_v14 = vrot.slane %v3543_v4, 5  ;;  %v8811_v13 = vpop.f32.mrb[47].mxu1 }
 0x799   :  { %v7386_v46 = vsel %vm453_vm3, %v7385_v14, %v7384_v8 }
 0x7b2   :  { %v3695_v7 = vpop.f32.mrb[48].mxu1 }
 0x7b3   :  { %v8821_v15 = vpop.f32.mrb[49].mxu1  ;;  %v7389_v28 = vrot.slane %v3695_v7, 3 }
 0x7b6   :  { %v3619_v23 = vpop.f32.mrb[32].mxu0 }
 0x7b7   :  { %v7387_v40 = vrot.slane %v3619_v23, 4  ;;  %v3847_v17 = vpop.f32.mrb[50].mxu1  ;;  %v8816_v34 = vpop.f32.mrb[33].mxu0 }
 0x7b8   :  { %v8831_v21 = vpop.f32.mrb[51].mxu1  ;;  %v7393_v6 = vrot.slane %v3847_v17, 1 }
 0x7b9   :  { %v7388_v54 = vsel %vm456_vm4, %v7387_v40, %v7386_v46 }
 0x7ba   :  { %v3771_v35 = vpop.f32.mrb[34].mxu0  ;;  %v7390_v44 = vsel %vm459_vm5, %v7389_v28, %v7388_v54 }
 0x7bb   :  { %v7391_v19 = vrot.slane %v3771_v35, 2  ;;  %v8826_v60 = vpop.f32.mrb[35].mxu0 }
 0x7bd   :  { %v7392_v32 = vsel %vm462_vm6, %v7391_v19, %v7390_v44 }
 0x7be   :  { %v3923_v24 = vpop.f32.mrb[36].mxu0  ;;  %v10529_v1 = vsel %vm464_vm7, %v7393_v6, %v7392_v32 }
 0x7bf   :  { %11374 = vst [vmem:[#allocation7_spill] sm:$0xff] %v10529_v1  ;;  %v8836_v53 = vpop.f32.mrb[37].mxu0 }
 0x7c5   :  { %v4077_v55 = vpop.f32.mrb[38].mxu0 }
 0x7c6   :  { %v4783_v62 = vmul.f32 0.35355338, %v4077_v55  ;;  %v8846_v11 = vpop.f32.mrb[39].mxu0 }
 0x7c8   :  { %v10532_v47 = vadd.f32 %v4783_v62, %v9845_v58 }
 0x7c9   :  { %v4233_v38 = vpop.f32.mrb[40].mxu0 }
 0x7ca   :  { %v4785_v42 = vmul.f32 0.35355338, %v4233_v38  ;;  %v8856_v52 = vpop.f32.mrb[41].mxu0  ;;  %v4803_v39 = vsel %vm1422_vm10, %v10532_v47, -inf }
 0x7cb   :  { %4804 = vmax.xlane.f32.xlu0 %v4803_v39 }
 0x7cc   :  { %v10537_v48 = vadd.f32 %v4785_v42, %v9873_v27 }
 0x7ce   :  { %v4809_v51 = vsel %vm1422_vm10, %v10537_v48, -inf }
 0x7cf   :  { %4810 = vmax.xlane.f32.xlu0 %v4809_v51 }
 0x7e6   :  { %v4389_v3 = vpop.f32.mrb[42].mxu0 }
 0x7e7   :  { %v8866_v4 = vpop.f32.mrb[43].mxu0  ;;  %v4787_v54 = vmul.f32 0.35355338, %v4389_v3 }
 0x7e9   :  { %v10553_v32 = vadd.f32 %v4787_v54, %v9850_v10 }
 0x7ea   :  { %v4545_v8 = vpop.f32.mrb[44].mxu0 }
 0x7eb   :  { %v3999_v14 = vpop.f32.mrb[52].mxu1  ;;  %v8876_v13 = vpop.f32.mrb[45].mxu0  ;;  %v4789_v53 = vmul.f32 0.35355338, %v4545_v8  ;;  %v4815_v52 = vsel %vm1422_vm10, %v10553_v32, -inf }
 0x7ec   :  { %v7395_v46 = vrot.slane %v3999_v14, 7  ;;  %v8841_v7 = vpop.f32.mrb[53].mxu1 }
 0x7ed   :  { %v10563_v39 = vadd.f32 %v4789_v53, %v9865_v20  ;;  %v10598_v53 = vpop.permute.xlu1 %5141 }
 0x7ee   :  { %v4701_v15 = vpop.f32.mrb[46].mxu0  ;;  %v10542_v23 = vsel %vm447_vm1, %v7395_v46, %v3923_v24 }
 0x7ef   :  { %11375 = vst [vmem:[#allocation6_spill] sm:$0xff] %v10542_v23  ;;  %v4155_v40 = vpop.f32.mrb[54].mxu1  ;;  %v8886_v17 = vpop.f32.mrb[47].mxu0  ;;  %v4791_v51 = vmul.f32 0.35355338, %v4701_v15 }
 0x7f0   :  { %v4784_v34 = vmul.f32 0.35355338, %v4155_v40  ;;  %v8851_v28 = vpop.f32.mrb[55].mxu1  ;;  %v4821_v17 = vsel %vm1422_vm10, %v10563_v39, -inf }
 0x7f1   :  { %v10571_v46 = vadd.f32 %v4791_v51, %v9893_v56 }
 0x7f2   :  { %v10545_v21 = vadd.f32 %v4784_v34, %v9858_v16 }
 0x7f3   :  { %v4311_v35 = vpop.f32.mrb[56].mxu1  ;;  %v4827_v28 = vsel %vm1422_vm10, %v10571_v46, -inf }
 0x7f4   :  { %v4786_v44 = vmul.f32 0.35355338, %v4311_v35  ;;  %v8861_v19 = vpop.f32.mrb[57].mxu1  ;;  %v4806_v60 = vsel %vm1422_vm10, %v10545_v21, -inf  ;;  %v10588_v35 = vpop.permute.xlu0 %5217 }
 0x7f5   :  { %4807 = vmax.xlane.f32.xlu1 %v4806_v60 }
 0x7f6   :  { %v10550_v6 = vadd.f32 %v4786_v44, %v9900_v61 }
 0x7f7   :  { %v4467_v24 = vpop.f32.mrb[58].mxu1 }
 0x7f8   :  { %v4788_v55 = vmul.f32 0.35355338, %v4467_v24  ;;  %v8871_v62 = vpop.f32.mrb[59].mxu1  ;;  %v4812_v11 = vsel %vm1422_vm10, %v10550_v6, -inf  ;;  %v10590_v44 = vpop.permute.xlu0 %5369 }
 0x7f9   :  { %4813 = vmax.xlane.f32.xlu0 %v4812_v11  ;;  %v10602_v62 = vpop.permute.xlu1 %5065 }
 0x7fa   :  { %v10558_v38 = vadd.f32 %v4788_v55, %v9898_v57 }
 0x7fb   :  { %v4623_v42 = vpop.f32.mrb[60].mxu1 }
 0x7fc   :  { %v4790_v3 = vmul.f32 0.35355338, %v4623_v42  ;;  %v8881_v4 = vpop.f32.mrb[61].mxu1  ;;  %v4818_v8 = vsel %vm1422_vm10, %v10558_v38, -inf  ;;  %v10592_v19 = vpop.permute.xlu0 %5521 }
 0x7fd   :  { %4816 = vmax.xlane.f32.xlu0 %v4815_v52  ;;  %4819 = vmax.xlane.f32.xlu1 %v4818_v8  ;;  %v10605_v42 = vpop.permute.xlu1 %5293 }
 0x7fe   :  { %v10568_v14 = vadd.f32 %v4790_v3, %v9913_v25 }
 0x7ff   :  { %v4779_v13 = vpop.f32.mrb[62].mxu1 }
 0x800   :  { %v4792_v7 = vmul.f32 0.35355338, %v4779_v13  ;;  %v8891_v40 = vpop.f32.mrb[63].mxu1  ;;  %v4824_v15 = vsel %vm1422_vm10, %v10568_v14, -inf  ;;  %v10594_v60 = vpop.permute.xlu0 %5675 }
 0x801   :  { %4822 = vmax.xlane.f32.xlu0 %v4821_v17  ;;  %4825 = vmax.xlane.f32.xlu1 %v4824_v15  ;;  %v10608_v8 = vpop.permute.xlu1 %5445 }
 0x802   :  { %v10578_v34 = vadd.f32 %v4792_v7, %v9928_v30 }
 0x804   :  { %v4830_v54 = vsel %vm1422_vm10, %v10578_v34, -inf  ;;  %v10596_v24 = vpop.permute.xlu0 %5909 }
 0x805   :  { %4828 = vmax.xlane.f32.xlu0 %v4827_v28  ;;  %4831 = vmax.xlane.f32.xlu1 %v4830_v54  ;;  %v10610_v13 = vpop.permute.xlu1 %5597 }
 0x808   :  { %v10600_v55 = vpop.permute.xlu0 %5831 }
 0x809   :  { %v10618_v17 = vpop.permute.xlu1 %5753 }
 0x816   :  { %5829 = vrot.lane.b32.xlu1 %v11373_v12, %s9404_s30 }
 0x81b   :  { %6065 = vrot.lane.b32.xlu0 %v9735_v22, %s9404_s30 }
 0x858   :  { %v4805_v12 = vpop.xlane.xlu0 %4804 }
 0x859   :  { %v4833_v11 = vsub.f32 %v10532_v47, %v4805_v12 }
 0x85b   :  { %v4843_v52 = vmul.f32 1.442695, %v4833_v11 }
 0x85c   :  { %v4811_v51 = vpop.xlane.xlu0 %4810 }
 0x85d   :  { %9290 = vpow2.f32 %v4843_v52  ;;  %v4835_v3 = vsub.f32 %v10537_v48, %v4811_v51  ;;  %v10622_v48 = vpop.permute.xlu1 %5751 }
 0x85f   :  { %v4847_v4 = vmul.f32 1.442695, %v4835_v3 }
 0x861   :  { %9292 = vpow2.f32 %v4847_v4  ;;  %v10624_v28 = vpop.permute.xlu1 %5673 }
 0x865   :  { %v10626_v54 = vpop.permute.xlu1 %5907 }
 0x867   :  { %v10612_v7 = vpop.eup %9290 }
 0x868   :  { %v4863_v40 = vsel %vm1422_vm10, %v10612_v7, 0.0 }
 0x869   :  { %4864 = vadd.xlane.f32.xlu0 %v4863_v40 }
 0x86b   :  { %v10616_v47 = vpop.eup %9292 }
 0x86c   :  { %v4869_v15 = vsel %vm1422_vm10, %v10616_v47, 0.0 }
 0x86d   :  { %4870 = vadd.xlane.f32.xlu0 %v4869_v15 }
 0x882   :  { %v4808_v12 = vpop.xlane.xlu1 %4807 }
 0x883   :  { %v4834_v11 = vsub.f32 %v10545_v21, %v4808_v12 }
 0x885   :  { %v4845_v52 = vmul.f32 1.442695, %v4834_v11 }
 0x886   :  { %v4814_v51 = vpop.xlane.xlu0 %4813 }
 0x887   :  { %9294 = vpow2.f32 %v4845_v52  ;;  %v4836_v3 = vsub.f32 %v10550_v6, %v4814_v51 }
 0x889   :  { %v4849_v4 = vmul.f32 1.442695, %v4836_v3 }
 0x88a   :  { %v4817_v40 = vpop.xlane.xlu0 %4816  ;;  %v4820_v43 = vpop.xlane.xlu1 %4819 }
 0x88b   :  { %9296 = vpow2.f32 %v4849_v4  ;;  %v4837_v15 = vsub.f32 %v10553_v32, %v4817_v40  ;;  %v4838_v41 = vsub.f32 %v10558_v38, %v4820_v43 }
 0x88d   :  { %v4851_v1 = vmul.f32 1.442695, %v4837_v15  ;;  %v4853_v23 = vmul.f32 1.442695, %v4838_v41 }
 0x88e   :  { %v4823_v22 = vpop.xlane.xlu0 %4822  ;;  %v4826_v18 = vpop.xlane.xlu1 %4825 }
 0x88f   :  { %9298 = vpow2.f32 %v4851_v1  ;;  %v4839_v21 = vsub.f32 %v10563_v39, %v4823_v22  ;;  %v4840_v12 = vsub.f32 %v10568_v14, %v4826_v18 }
 0x890   :  { %9300 = vpow2.f32 %v4853_v23 }
 0x891   :  { %v10634_v11 = vpop.eup %9294  ;;  %v4855_v6 = vmul.f32 1.442695, %v4839_v21  ;;  %v4857_v52 = vmul.f32 1.442695, %v4840_v12 }
 0x892   :  { %v4866_v51 = vsel %vm1422_vm10, %v10634_v11, 0.0  ;;  %v4829_v3 = vpop.xlane.xlu0 %4828  ;;  %v4832_v4 = vpop.xlane.xlu1 %4831 }
 0x893   :  { %9302 = vpow2.f32 %v4855_v6  ;;  %4867 = vadd.xlane.f32.xlu1 %v4866_v51  ;;  %v4841_v40 = vsub.f32 %v10571_v46, %v4829_v3  ;;  %v4842_v15 = vsub.f32 %v10578_v34, %v4832_v4 }
 0x894   :  { %9304 = vpow2.f32 %v4857_v52 }
 0x895   :  { %v10638_v43 = vpop.eup %9296  ;;  %v4859_v21 = vmul.f32 1.442695, %v4841_v40  ;;  %v4861_v12 = vmul.f32 1.442695, %v4842_v15 }
 0x896   :  { %v4872_v41 = vsel %vm1422_vm10, %v10638_v43, 0.0  ;;  %v10682_v46 = vpop.permute.xlu0 %6065 }
 0x897   :  { %4873 = vadd.xlane.f32.xlu1 %v4872_v41  ;;  %9306 = vpow2.f32 %v4859_v21 }
 0x898   :  { %9308 = vpow2.f32 %v4861_v12 }
 0x899   :  { %v10642_v22 = vpop.eup %9298 }
 0x89a   :  { %v10644_v18 = vpop.eup %9300  ;;  %v4875_v1 = vsel %vm1422_vm10, %v10642_v22, 0.0 }
 0x89b   :  { %4876 = vadd.xlane.f32.xlu0 %v4875_v1  ;;  %v4878_v23 = vsel %vm1422_vm10, %v10644_v18, 0.0 }
 0x89c   :  { %4879 = vadd.xlane.f32.xlu1 %v4878_v23 }
 0x89d   :  { %v10650_v32 = vpop.eup %9302 }
 0x89e   :  { %v10652_v38 = vpop.eup %9304  ;;  %v4881_v39 = vsel %vm1422_vm10, %v10650_v32, 0.0 }
 0x89f   :  { %4882 = vadd.xlane.f32.xlu0 %v4881_v39  ;;  %v4884_v14 = vsel %vm1422_vm10, %v10652_v38, 0.0 }
 0x8a0   :  { %4885 = vadd.xlane.f32.xlu1 %v4884_v14 }
 0x8a1   :  { %v10664_v6 = vpop.eup %9306 }
 0x8a2   :  { %v10666_v52 = vpop.eup %9308 }
 0x8a3   :  { %v4890_v51 = vsel %vm1422_vm10, %v10666_v52, 0.0 }
 0x8b1   :  { %6063 = vrot.lane.b32.xlu1 %v9776_v63, %s9404_s30  ;;  %v4887_v63 = vsel %vm1422_vm10, %v10664_v6, 0.0 }
 0x8b5   :  { %5987 = vrot.lane.b32.xlu0 %v9709_v5, %s9404_s30 }
 0x8d4   :  { %4888 = vadd.xlane.f32.xlu0 %v4887_v63 }
 0x8d5   :  { %4891 = vadd.xlane.f32.xlu1 %v4890_v51 }
 0x8e6   :  { %5985 = vrot.lane.b32.xlu1 %v9769_v45, %s9404_s30 }
 0x8ea   :  { %6219 = vrot.lane.b32.xlu1 %v9786_v50, %s9404_s30  ;;  %6221 = vrot.lane.b32.xlu0 %v9746_v29, %s9404_s30 }
 0x8ee   :  { %6141 = vrot.lane.b32.xlu1 %v9781_v49, %s9404_s30  ;;  %6143 = vrot.lane.b32.xlu0 %v9731_v33, %s9404_s30 }
 0x8f2   :  { %6375 = vrot.lane.b32.xlu1 %v9758_v37, %s9404_s30  ;;  %6377 = vrot.lane.b32.xlu0 %v9755_v36, %s9404_s30 }
 0x8f6   :  { %v4865_v45 = vpop.xlane.xlu0 %4864  ;;  %6299 = vrot.lane.b32.xlu0 %v9743_v26, %s9404_s30 }
 0x8f7   :  { %9310 = vrcp.f32 %v4865_v45 }
 0x8fa   :  { %v4871_v50 = vpop.xlane.xlu0 %4870  ;;  %6297 = vrot.lane.b32.xlu0 %v9750_v31, %s9404_s30  ;;  %v10704_v31 = vpop.permute.xlu1 %5829 }
 0x8fb   :  { %9312 = vrcp.f32 %v4871_v50 }
 0x901   :  { %v9311_v49 = vpop.eup %9310 }
 0x902   :  { %v4903_v34 = vmul.f32 %v9311_v49, %v10612_v7 }
 0x904   :  { %8895 = vmatmul.mubr.msk.f32.vlgmr.msra.gmra.mrb[48].mxu0 %vm621_vm9, %v4903_v34 }
 0x905   :  { %v9313_v41 = vpop.eup %9312  ;;  %8903 = vmatpush3.msra.mxu0 %v10602_v62  ;;  %8904 = vmatprep.mubr.msk.f32.mxu0 %vm9398_vm8, %v11367_v9 }
 0x906   :  { %v4905_v37 = vmul.f32 %v9313_v41, %v10616_v47  ;;  %8912 = vmatprep.subr.mxu0 %v11367_v9 }
 0x908   :  { %8905 = vmatmul.mubr.msk.f32.vlgmr.msra.gmra.mrb[50].mxu0 %vm621_vm9, %v4905_v37 }
 0x909   :  { %8913 = vmatpush3.msra.mxu0 %v10588_v35  ;;  %8914 = vmatprep.mubr.msk.f32.mxu0 %vm9398_vm8, %v11367_v9 }
 0x90a   :  { %8922 = vmatprep.subr.mxu0 %v11367_v9 }
 0x920   :  { %v4868_v7 = vpop.xlane.xlu1 %4867 }
 0x921   :  { %9314 = vrcp.f32 %v4868_v7 }
 0x924   :  { %v4874_v62 = vpop.xlane.xlu1 %4873 }
 0x925   :  { %9316 = vrcp.f32 %v4874_v62 }
 0x928   :  { %v4877_v1 = vpop.xlane.xlu0 %4876 }
 0x929   :  { %9318 = vrcp.f32 %v4877_v1  ;;  %v4880_v47 = vpop.xlane.xlu1 %4879 }
 0x92a   :  { %9320 = vrcp.f32 %v4880_v47 }
 0x92b   :  { %v9315_v23 = vpop.eup %9314 }
 0x92c   :  { %v4904_v39 = vmul.f32 %v9315_v23, %v10634_v11  ;;  %v4883_v14 = vpop.xlane.xlu0 %4882 }
 0x92d   :  { %9322 = vrcp.f32 %v4883_v14  ;;  %v4886_v35 = vpop.xlane.xlu1 %4885 }
 0x92e   :  { %9324 = vrcp.f32 %v4886_v35  ;;  %8900 = vmatmul.mubr.msk.f32.vlgmr.msra.gmra.mrb[64].mxu1 %vm621_vm9, %v4904_v39 }
 0x92f   :  { %v9317_v3 = vpop.eup %9316  ;;  %8908 = vmatpush3.msra.mxu1 %v10598_v53  ;;  %8909 = vmatprep.mubr.msk.f32.mxu1 %vm9398_vm8, %v11367_v9 }
 0x930   :  { %v4906_v4 = vmul.f32 %v9317_v3, %v10638_v43  ;;  %8917 = vmatprep.subr.mxu1 %v11367_v9 }
 0x932   :  { %8910 = vmatmul.mubr.msk.f32.vlgmr.msra.gmra.mrb[66].mxu1 %vm621_vm9, %v4906_v4 }
 0x933   :  { %v9319_v40 = vpop.eup %9318  ;;  %8918 = vmatpush3.msra.mxu1 %v10605_v42  ;;  %8919 = vmatprep.mubr.msk.f32.mxu1 %vm9398_vm8, %v11367_v9 }
 0x934   :  { %v9321_v11 = vpop.eup %9320  ;;  %v4907_v15 = vmul.f32 %v9319_v40, %v10642_v22  ;;  %8927 = vmatprep.subr.mxu1 %v11367_v9 }
 0x935   :  { %v4908_v53 = vmul.f32 %v9321_v11, %v10644_v18 }
 0x936   :  { %8915 = vmatmul.mubr.msk.f32.vlgmr.msra.gmra.mrb[52].mxu0 %vm621_vm9, %v4907_v15 }
 0x937   :  { %v9323_v43 = vpop.eup %9322  ;;  %8920 = vmatmul.mubr.msk.f32.vlgmr.msra.gmra.mrb[68].mxu1 %vm621_vm9, %v4908_v53  ;;  %8923 = vmatpush3.msra.mxu0 %v10590_v44  ;;  %v5988_v44 = vpop.permute.xlu0 %5987 }
 0x938   :  { %v9325_v21 = vpop.eup %9324  ;;  %v4909_v42 = vmul.f32 %v9323_v43, %v10650_v32  ;;  %8928 = vmatpush3.msra.mxu1 %v10608_v8  ;;  %8924 = vmatprep.mubr.msk.f32.mxu0 %vm9398_vm8, %v11367_v9  ;;  %v6064_v8 = vpop.permute.xlu1 %6063 }
 0x939   :  { %v4910_v22 = vmul.f32 %v9325_v21, %v10652_v38  ;;  %8929 = vmatprep.mubr.msk.f32.mxu1 %vm9398_vm8, %v11367_v9  ;;  %8932 = vmatprep.subr.mxu0 %v11367_v9 }
 0x93a   :  { %8937 = vmatprep.subr.mxu1 %v11367_v9  ;;  %8925 = vmatmul.mubr.msk.f32.vlgmr.msra.gmra.mrb[54].mxu0 %vm621_vm9, %v4909_v42 }
 0x93b   :  { %8930 = vmatmul.mubr.msk.f32.vlgmr.msra.gmra.mrb[70].mxu1 %vm621_vm9, %v4910_v22  ;;  %8933 = vmatpush3.msra.mxu0 %v10592_v19 }
 0x93c   :  { %8938 = vmatpush3.msra.mxu1 %v10610_v13  ;;  %8934 = vmatprep.mubr.msk.f32.mxu0 %vm9398_vm8, %v11367_v9 }
 0x93d   :  { %8939 = vmatprep.mubr.msk.f32.mxu1 %vm9398_vm8, %v11367_v9  ;;  %8942 = vmatprep.subr.mxu0 %v11367_v9 }
 0x93e   :  { %8947 = vmatprep.subr.mxu1 %v11367_v9 }
 0x961   :  { %v4889_v18 = vpop.xlane.xlu0 %4888 }
 0x962   :  { %9326 = vrcp.f32 %v4889_v18  ;;  %v4892_v32 = vpop.xlane.xlu1 %4891 }
 0x963   :  { %9328 = vrcp.f32 %v4892_v32 }
 0x965   :  { %v6222_v38 = vpop.permute.xlu0 %6221 }
 0x966   :  { %v5986_v45 = vpop.permute.xlu1 %5985 }
 0x969   :  { %v6144_v51 = vpop.permute.xlu0 %6143 }
 0x96c   :  { %v9327_v19 = vpop.eup %9326 }
 0x96d   :  { %v9329_v12 = vpop.eup %9328  ;;  %v4911_v13 = vmul.f32 %v9327_v19, %v10664_v6 }
 0x96e   :  { %v4912_v63 = vmul.f32 %v9329_v12, %v10666_v52 }
 0x96f   :  { %8935 = vmatmul.mubr.msk.f32.vlgmr.msra.gmra.mrb[56].mxu0 %vm621_vm9, %v4911_v13 }
 0x970   :  { %8940 = vmatmul.mubr.msk.f32.vlgmr.msra.gmra.mrb[72].mxu1 %vm621_vm9, %v4912_v63  ;;  %8943 = vmatpush3.xpose.msk.msra.mxu0 %vm621_vm9, %v10594_v60  ;;  %v6378_v60 = vpop.permute.xlu0 %6377 }
 0x971   :  { %8948 = vmatpush3.xpose.msk.msra.mxu1 %vm621_vm9, %v10618_v17  ;;  %8944 = vmatprep.mubr.msk.f32.mxu0 %vm9398_vm8, %v11367_v9  ;;  %v6220_v17 = vpop.permute.xlu1 %6219 }
 0x972   :  { %8949 = vmatprep.mubr.msk.f32.mxu1 %vm9398_vm8, %v11367_v9  ;;  %8952 = vmatprep.subr.mxu0 %v11367_v9 }
 0x973   :  { %8957 = vmatprep.subr.mxu1 %v11367_v9  ;;  %8945 = vmatmul.mubr.msk.f32.vlgmr.msra.gmra.mrb[58].mxu0 %vm621_vm9, %v10624_v28 }
 0x974   :  { %8950 = vmatmul.mubr.msk.f32.vlgmr.msra.gmra.mrb[74].mxu1 %vm621_vm9, %v10622_v48  ;;  %8953 = vmatpush3.xpose.msk.msra.mxu0 %vm621_vm9, %v10600_v55 }
 0x975   :  { %8958 = vmatpush3.xpose.msk.msra.mxu1 %vm621_vm9, %v10596_v24  ;;  %8954 = vmatprep.mubr.msk.f32.mxu0 %vm9398_vm8, %v11367_v9  ;;  %v6300_v24 = vpop.permute.xlu0 %6299  ;;  %v6142_v55 = vpop.permute.xlu1 %6141 }
 0x976   :  { %8959 = vmatprep.mubr.msk.f32.mxu1 %vm9398_vm8, %v11367_v9  ;;  %8962 = vmatprep.subr.mxu0 %v11367_v9 }
 0x977   :  { %8967 = vmatprep.subr.mxu1 %v11367_v9  ;;  %8955 = vmatmul.mubr.msk.f32.vlgmr.msra.gmra.mrb[60].mxu0 %vm621_vm9, %v10704_v31 }
 0x978   :  { %8960 = vmatmul.mubr.msk.f32.vlgmr.msra.gmra.mrb[76].mxu1 %vm621_vm9, %v10626_v54  ;;  %8963 = vmatpush3.xpose.msk.msra.mxu0 %vm621_vm9, %v5988_v44 }
 0x979   :  { %8968 = vmatpush3.xpose.msk.msra.mxu1 %vm621_vm9, %v10682_v46  ;;  %8964 = vmatprep.mubr.msk.f32.mxu0 %vm9398_vm8, %v11367_v9  ;;  %v6298_v48 = vpop.permute.xlu0 %6297  ;;  %v6376_v28 = vpop.permute.xlu1 %6375 }
 0x97a   :  { %8969 = vmatprep.mubr.msk.f32.mxu1 %vm9398_vm8, %v11367_v9  ;;  %8972 = vmatprep.subr.mxu0 %v11367_v9 }
 0x97b   :  { %8977 = vmatprep.subr.mxu1 %v11367_v9  ;;  %8965 = vmatmul.mubr.msk.f32.vlgmr.msra.gmra.mrb[62].mxu0 %vm621_vm9, %v5986_v45 }
 0x97c   :  { %8970 = vmatmul.mubr.msk.f32.vlgmr.msra.gmra.mrb[78].mxu1 %vm621_vm9, %v6064_v8  ;;  %8973 = vmatpush3.xpose.msk.msra.mxu0 %vm621_vm9, %v6144_v51 }
 0x97d   :  { %8978 = vmatpush3.xpose.msk.msra.mxu1 %vm621_vm9, %v6222_v38  ;;  %8974 = vmatprep.mubr.msk.f32.mxu0 %vm9398_vm8, %v11367_v9 }
 0x97e   :  { %8979 = vmatprep.mubr.msk.f32.mxu1 %vm9398_vm8, %v11367_v9  ;;  %8982 = vmatprep.subr.mxu0 %v11367_v9 }
 0x97f   :  { %8987 = vmatprep.subr.mxu1 %v11367_v9  ;;  %8975 = vmatmul.mubr.msk.f32.vlgmr.msra.gmra.mrb[64].mxu0 %vm621_vm9, %v6142_v55 }
 0x980   :  { %8980 = vmatmul.mubr.msk.f32.vlgmr.msra.gmra.mrb[80].mxu1 %vm621_vm9, %v6220_v17  ;;  %8983 = vmatpush3.xpose.msk.msra.mxu0 %vm621_vm9, %v6300_v24 }
 0x981   :  { %8988 = vmatpush3.xpose.msk.msra.mxu1 %vm621_vm9, %v6378_v60  ;;  %8984 = vmatprep.mubr.msk.f32.mxu0 %vm9398_vm8, %v11367_v9 }
 0x982   :  { %8989 = vmatprep.mubr.msk.f32.mxu1 %vm9398_vm8, %v11367_v9  ;;  %8997 = vmatprep.subr.mxu1 %v11367_v9 }
 0x983   :  { %8985 = vmatmul.mubr.msk.f32.vlgmr.msra.gmra.mrb[66].mxu0 %vm621_vm9, %v6298_v48  ;;  %8992 = vmatprep.subr.mxu0 %v11367_v9 }
 0x984   :  { %8990 = vmatmul.mubr.msk.f32.vlgmr.msra.gmra.mrb[82].mxu1 %vm621_vm9, %v6376_v28  ;;  %8994 = vmatprep.mubr.msk.f32.mxu0 %vm9398_vm8, %v11367_v9 }
 0x985   :  { %8999 = vmatprep.mubr.msk.f32.mxu1 %vm9398_vm8, %v11367_v9 }
 0x9d7   :  { %v4985_v54 = vpop.f32.mrb[48].mxu0 }
 0x9d8   :  { %v8896_v6 = vpop.f32.mrb[49].mxu0 }
 0x9db   :  { %v5137_v52 = vpop.f32.mrb[50].mxu0 }
 0x9dc   :  { %v8906_v46 = vpop.f32.mrb[51].mxu0  ;;  %v7415_v41 = vrot.slane %v5137_v52, 6 }
 0xa01   :  { %v5061_v50 = vpop.f32.mrb[64].mxu1 }
 0xa02   :  { %v7413_v49 = vrot.slane %v5061_v50, 7  ;;  %v8901_v34 = vpop.f32.mrb[65].mxu1 }
 0xa04   :  { %v7414_v37 = vsel %vm447_vm1, %v7413_v49, %v4985_v54 }
 0xa05   :  { %v5213_v31 = vpop.f32.mrb[66].mxu1  ;;  %v7416_v7 = vsel %vm450_vm2, %v7415_v41, %v7414_v37 }
 0xa06   :  { %v7417_v62 = vrot.slane %v5213_v31, 5  ;;  %v8911_v1 = vpop.f32.mrb[67].mxu1 }
 0xa08   :  { %v7418_v47 = vsel %vm453_vm3, %v7417_v62, %v7416_v7 }
 0xa09   :  { %v5289_v23 = vpop.f32.mrb[52].mxu0 }
 0xa0a   :  { %v7419_v39 = vrot.slane %v5289_v23, 4  ;;  %v5365_v14 = vpop.f32.mrb[68].mxu1  ;;  %v8916_v35 = vpop.f32.mrb[53].mxu0 }
 0xa0b   :  { %v7421_v3 = vrot.slane %v5365_v14, 3  ;;  %v8921_v4 = vpop.f32.mrb[69].mxu1 }
 0xa0c   :  { %v7420_v40 = vsel %vm456_vm4, %v7419_v39, %v7418_v47 }
 0xa0d   :  { %v7422_v11 = vsel %vm459_vm5, %v7421_v3, %v7420_v40  ;;  %v5441_v15 = vpop.f32.mrb[54].mxu0 }
 0xa0e   :  { %v7423_v53 = vrot.slane %v5441_v15, 2  ;;  %v5517_v43 = vpop.f32.mrb[70].mxu1  ;;  %v8926_v21 = vpop.f32.mrb[55].mxu0 }
 0xa0f   :  { %v7425_v42 = vrot.slane %v5517_v43, 1  ;;  %v8931_v22 = vpop.f32.mrb[71].mxu1 }
 0xa10   :  { %v7424_v44 = vsel %vm462_vm6, %v7423_v53, %v7422_v11 }
 0xa11   :  { %v10816_v8 = vsel %vm464_vm7, %v7425_v42, %v7424_v44 }
 0xa42   :  { %v5593_v18 = vpop.f32.mrb[56].mxu0 }
 0xa43   :  { %v5669_v32 = vpop.f32.mrb[72].mxu1  ;;  %v8936_v38 = vpop.f32.mrb[57].mxu0 }
 0xa44   :  { %v7427_v19 = vrot.slane %v5669_v32, 7  ;;  %v8941_v12 = vpop.f32.mrb[73].mxu1 }
 0xa46   :  { %v5747_v13 = vpop.f32.mrb[58].mxu0  ;;  %v10819_v63 = vsel %vm447_vm1, %v7427_v19, %v5593_v18 }
 0xa47   :  { %v6453_v51 = vmul.f32 0.35355338, %v5747_v13  ;;  %v5825_v45 = vpop.f32.mrb[74].mxu1  ;;  %v8946_v60 = vpop.f32.mrb[59].mxu0 }
 0xa48   :  { %v6454_v17 = vmul.f32 0.35355338, %v5825_v45  ;;  %v8951_v24 = vpop.f32.mrb[75].mxu1 }
 0xa49   :  { %v10822_v55 = vadd.f32 %v6453_v51, %v9845_v58 }
 0xa4a   :  { %v10825_v48 = vadd.f32 %v6454_v17, %v9858_v16  ;;  %v5903_v28 = vpop.f32.mrb[60].mxu0 }
 0xa4b   :  { %v6455_v54 = vmul.f32 0.35355338, %v5903_v28  ;;  %v5981_v6 = vpop.f32.mrb[76].mxu1  ;;  %v8956_v52 = vpop.f32.mrb[61].mxu0  ;;  %v6473_v46 = vsel %vm1422_vm10, %v10822_v55, -inf }
 0xa4c   :  { %v6456_v50 = vmul.f32 0.35355338, %v5981_v6  ;;  %v8961_v49 = vpop.f32.mrb[77].mxu1  ;;  %6474 = vmax.xlane.f32.xlu0 %v6473_v46  ;;  %v6476_v34 = vsel %vm1422_vm10, %v10825_v48, -inf }
 0xa4d   :  { %6477 = vmax.xlane.f32.xlu1 %v6476_v34  ;;  %v10833_v16 = vadd.f32 %v6455_v54, %v9873_v27 }
 0xa4e   :  { %v6466_v58 = vadd.f32 %v6456_v50, %v9900_v61  ;;  %v6059_v41 = vpop.f32.mrb[62].mxu0 }
 0xa4f   :  { %v6137_v37 = vpop.f32.mrb[78].mxu1  ;;  %v8966_v31 = vpop.f32.mrb[63].mxu0  ;;  %v6457_v7 = vmul.f32 0.35355338, %v6059_v41  ;;  %v6479_v61 = vsel %vm1422_vm10, %v10833_v16, -inf }
 0xa50   :  { %v6458_v62 = vmul.f32 0.35355338, %v6137_v37  ;;  %v8971_v1 = vpop.f32.mrb[79].mxu1  ;;  %v6482_v47 = vsel %vm1422_vm10, %v6466_v58, -inf }
 0xa51   :  { %6483 = vmax.xlane.f32.xlu0 %v6482_v47  ;;  %v6467_v3 = vadd.f32 %v6457_v7, %v9850_v10 }
 0xa52   :  { %v6468_v23 = vadd.f32 %v6458_v62, %v9898_v57  ;;  %v6215_v39 = vpop.f32.mrb[64].mxu0 }
 0xa53   :  { %v6293_v14 = vpop.f32.mrb[80].mxu1  ;;  %v8976_v35 = vpop.f32.mrb[65].mxu0  ;;  %v6459_v27 = vmul.f32 0.35355338, %v6215_v39  ;;  %v6485_v44 = vsel %vm1422_vm10, %v6467_v3, -inf }
 0xa54   :  { %v6460_v4 = vmul.f32 0.35355338, %v6293_v14  ;;  %v8981_v40 = vpop.f32.mrb[81].mxu1  ;;  %v6488_v11 = vsel %vm1422_vm10, %v6468_v23, -inf }
 0xa55   :  { %6480 = vmax.xlane.f32.xlu0 %v6479_v61  ;;  %6489 = vmax.xlane.f32.xlu1 %v6488_v11  ;;  %v10843_v21 = vadd.f32 %v6459_v27, %v9865_v20 }
 0xa56   :  { %v6470_v15 = vadd.f32 %v6460_v4, %v9913_v25  ;;  %v6371_v53 = vpop.f32.mrb[66].mxu0 }
 0xa57   :  { %v6449_v43 = vpop.f32.mrb[82].mxu1  ;;  %v8986_v57 = vpop.f32.mrb[67].mxu0  ;;  %v6461_v42 = vmul.f32 0.35355338, %v6371_v53  ;;  %v6491_v25 = vsel %vm1422_vm10, %v10843_v21, -inf }
 0xa58   :  { %v8991_v22 = vpop.f32.mrb[83].mxu1  ;;  %v6494_v10 = vsel %vm1422_vm10, %v6470_v15, -inf  ;;  %v6462_v20 = vmul.f32 0.35355338, %v6449_v43 }
 0xa59   :  { %6486 = vmax.xlane.f32.xlu0 %v6485_v44  ;;  %6495 = vmax.xlane.f32.xlu1 %v6494_v10  ;;  %v10848_v18 = vadd.f32 %v6461_v42, %v9893_v56  ;;  %v11378_v42 = vld [vmem:[#allocation6_spill] sm:$0xff] }
 0xa5a   :  { %v10863_v56 = vadd.f32 %v6462_v20, %v9928_v30 }
 0xa5b   :  { %v6497_v32 = vsel %vm1422_vm10, %v10848_v18, -inf }
 0xa5c   :  { %v6500_v38 = vsel %vm1422_vm10, %v10863_v56, -inf }
 0xa5d   :  { %6492 = vmax.xlane.f32.xlu0 %v6491_v25 }
 0xa61   :  { %6498 = vmax.xlane.f32.xlu0 %v6497_v32 }
 0xa6a   :  { %6659 = vrot.lane.b32.xlu1 %v9697_v0, %s9405_s0  ;;  %v11376_v0 = vld [vmem:[#allocation2_spill] sm:$0xff] }
 0xa77   :  { %6583 = vrot.lane.b32.xlu0 %v9700_v2, %s9405_s0  ;;  %v11377_v2 = vld [vmem:[#allocation3_spill] sm:$0xff] }
 0xa7b   :  { %6887 = vrot.lane.b32.xlu0 %v9709_v5, %s9405_s0 }
 0xa7f   :  { %7039 = vrot.lane.b32.xlu0 %v9731_v33, %s9405_s0 }
 0xa8e   :  { %6501 = vmax.xlane.f32.xlu1 %v6500_v38 }
 0xa9f   :  { %6811 = vrot.lane.b32.xlu1 %v9694_v59, %s9405_s0 }
 0xaa3   :  { %6735 = vrot.lane.b32.xlu1 %v11376_v0, %s9405_s0 }
 0xaa7   :  { %6963 = vrot.lane.b32.xlu1 %v11377_v2, %s9405_s0 }
 0xaab   :  { %7115 = vrot.lane.b32.xlu1 %v9746_v29, %s9405_s0 }
 0xad9   :  { %v6475_v5 = vpop.xlane.xlu0 %6474 }
 0xada   :  { %v6503_v33 = vsub.f32 %v10822_v55, %v6475_v5  ;;  %v6478_v30 = vpop.xlane.xlu1 %6477 }
 0xadb   :  { %v6504_v19 = vsub.f32 %v10825_v48, %v6478_v30 }
 0xadc   :  { %v6513_v12 = vmul.f32 1.442695, %v6503_v33 }
 0xadd   :  { %v6515_v13 = vmul.f32 1.442695, %v6504_v19 }
 0xade   :  { %9330 = vpow2.f32 %v6513_v12  ;;  %v6484_v51 = vpop.xlane.xlu0 %6483 }
 0xadf   :  { %9332 = vpow2.f32 %v6515_v13  ;;  %v6506_v59 = vsub.f32 %v6466_v58, %v6484_v51 }
 0xae1   :  { %v6519_v45 = vmul.f32 1.442695, %v6506_v59 }
 0xae2   :  { %v6481_v60 = vpop.xlane.xlu0 %6480  ;;  %v6490_v17 = vpop.xlane.xlu1 %6489 }
 0xae3   :  { %9334 = vpow2.f32 %v6519_v45  ;;  %v6505_v24 = vsub.f32 %v10833_v16, %v6481_v60  ;;  %v6508_v28 = vsub.f32 %v6468_v23, %v6490_v17 }
 0xae5   :  { %v6517_v29 = vmul.f32 1.442695, %v6505_v24  ;;  %v6523_v54 = vmul.f32 1.442695, %v6508_v28 }
 0xae6   :  { %v6487_v6 = vpop.xlane.xlu0 %6486  ;;  %v6496_v55 = vpop.xlane.xlu1 %6495 }
 0xae7   :  { %9336 = vpow2.f32 %v6517_v29  ;;  %v6507_v52 = vsub.f32 %v6467_v3, %v6487_v6  ;;  %v6510_v48 = vsub.f32 %v6470_v15, %v6496_v55 }
 0xae8   :  { %v10878_v46 = vpop.eup %9330  ;;  %9338 = vpow2.f32 %v6523_v54 }
 0xae9   :  { %v10880_v50 = vpop.eup %9332  ;;  %v6521_v49 = vmul.f32 1.442695, %v6507_v52  ;;  %v6527_v34 = vmul.f32 1.442695, %v6510_v48  ;;  %v6533_v58 = vsel %vm1422_vm10, %v10878_v46, 0.0 }
 0xaea   :  { %v6493_v41 = vpop.xlane.xlu0 %6492  ;;  %v6660_v16 = vpop.permute.xlu1 %6659  ;;  %6534 = vadd.xlane.f32.xlu0 %v6533_v58  ;;  %v6536_v37 = vsel %vm1422_vm10, %v10880_v50, 0.0 }
 0xaeb   :  { %9340 = vpow2.f32 %v6521_v49  ;;  %v6509_v31 = vsub.f32 %v10843_v21, %v6493_v41  ;;  %8998 = vmatpush3.msra.mxu1 %v6660_v16  ;;  %6537 = vadd.xlane.f32.xlu1 %v6536_v37 }
 0xaec   :  { %9342 = vpow2.f32 %v6527_v34  ;;  %9007 = vmatprep.subr.mxu1 %v11367_v9 }
 0xaed   :  { %v10888_v7 = vpop.eup %9334  ;;  %v6525_v62 = vmul.f32 1.442695, %v6509_v31 }
 0xaee   :  { %v6499_v1 = vpop.xlane.xlu0 %6498  ;;  %v6542_v47 = vsel %vm1422_vm10, %v10888_v7, 0.0 }
 0xaef   :  { %9344 = vpow2.f32 %v6525_v62  ;;  %v6511_v23 = vsub.f32 %v10848_v18, %v6499_v1  ;;  %6543 = vadd.xlane.f32.xlu1 %v6542_v47 }
 0xaf1   :  { %v10893_v39 = vpop.eup %9336  ;;  %v6529_v14 = vmul.f32 1.442695, %v6511_v23 }
 0xaf2   :  { %v10895_v35 = vpop.eup %9338  ;;  %v6584_v61 = vpop.permute.xlu0 %6583  ;;  %v6539_v3 = vsel %vm1422_vm10, %v10893_v39, 0.0 }
 0xaf3   :  { %9346 = vpow2.f32 %v6529_v14  ;;  %6540 = vadd.xlane.f32.xlu0 %v6539_v3  ;;  %8993 = vmatpush3.msra.mxu0 %v6584_v61  ;;  %v6548_v27 = vsel %vm1422_vm10, %v10895_v35, 0.0 }
 0xaf4   :  { %6549 = vadd.xlane.f32.xlu1 %v6548_v27  ;;  %9002 = vmatprep.subr.mxu0 %v11367_v9 }
 0xaf5   :  { %v10902_v4 = vpop.eup %9340 }
 0xaf6   :  { %v10904_v40 = vpop.eup %9342  ;;  %v6545_v11 = vsel %vm1422_vm10, %v10902_v4, 0.0 }
 0xaf7   :  { %6546 = vadd.xlane.f32.xlu0 %v6545_v11  ;;  %v6554_v15 = vsel %vm1422_vm10, %v10904_v40, 0.0 }
 0xaf8   :  { %6555 = vadd.xlane.f32.xlu1 %v6554_v15  ;;  %v82_v15 = vld [vmem:[%s11335_s6] sm:$0xff] }
 0xaf9   :  { %v10910_v53 = vpop.eup %9344 }
 0xafa   :  { %v6551_v43 = vsel %vm1422_vm10, %v10910_v53, 0.0 }
 0xafb   :  { %6552 = vadd.xlane.f32.xlu0 %v6551_v43  ;;  %v84_v43 = vld [vmem:[%s11335_s6 + $0x10] sm:$0xff] }
 0xafd   :  { %v10914_v57 = vpop.eup %9346 }
 0xafe   :  { %v6557_v21 = vsel %vm1422_vm10, %v10914_v57, 0.0 }
 0xaff   :  { %6558 = vadd.xlane.f32.xlu0 %v6557_v21 }
 0xb15   :  { %7191 = vrot.lane.b32.xlu0 %v9743_v26, %s9405_s0  ;;  %v11379_v26 = vld [vmem:[#allocation7_spill] sm:$0xff] }
 0xb19   :  { %7399 = vrot.lane.b32.xlu0 %v11378_v42, %s9406_s17  ;;  %v85_v42 = vld [vmem:[%s11335_s6 + $0x18] sm:$0xff] }
 0xb1b   :  { %v6502_v22 = vpop.xlane.xlu1 %6501 }
 0xb1c   :  { %v6512_v44 = vsub.f32 %v10863_v56, %v6502_v22  ;;  %v6888_v56 = vpop.permute.xlu0 %6887 }
 0xb1d   :  { %7431 = vrot.lane.b32.xlu0 %v10819_v63, %s9407_s18 }
 0xb1e   :  { %v6531_v10 = vmul.f32 1.442695, %v6512_v44 }
 0xb1f   :  { %v6812_v32 = vpop.permute.xlu1 %6811 }
 0xb20   :  { %9348 = vpow2.f32 %v6531_v10  ;;  %v7040_v63 = vpop.permute.xlu0 %7039  ;;  %v9119_v10 = vpack.c.bf16 %v85_v42, %v84_v43  ;;  %v9392_v42 = vld [vmem:[%s11360_s23 + $0x28] sm:$0xff] }
 0xb23   :  { %v6736_v20 = vpop.permute.xlu1 %6735 }
 0xb27   :  { %v6964_v38 = vpop.permute.xlu1 %6963 }
 0xb2a   :  { %v10923_v18 = vpop.eup %9348 }
 0xb2b   :  { %v6560_v25 = vsel %vm1422_vm10, %v10923_v18, 0.0  ;;  %v7116_v0 = vpop.permute.xlu1 %7115 }
 0xb2c   :  { %6561 = vadd.xlane.f32.xlu1 %v6560_v25 }
 0xb3d   :  { %7267 = vrot.lane.b32.xlu1 %v9755_v36, %s9405_s0 }
 0xb41   :  { %7397 = vrot.lane.b32.xlu1 %v11379_v26, %s9406_s17 }
 0xb45   :  { %7429 = vrot.lane.b32.xlu1 %v10816_v8, %s9407_s18 }
 0xb77   :  { %v6535_v2 = vpop.xlane.xlu0 %6534 }
 0xb78   :  { %9350 = vrcp.f32 %v6535_v2  ;;  %v6538_v5 = vpop.xlane.xlu1 %6537 }
 0xb79   :  { %9352 = vrcp.f32 %v6538_v5 }
 0xb7c   :  { %v6544_v33 = vpop.xlane.xlu1 %6543 }
 0xb7d   :  { %9354 = vrcp.f32 %v6544_v33 }
 0xb80   :  { %v6541_v30 = vpop.xlane.xlu0 %6540 }
 0xb81   :  { %9356 = vrcp.f32 %v6541_v30  ;;  %v6550_v19 = vpop.xlane.xlu1 %6549 }
 0xb82   :  { %v9351_v36 = vpop.eup %9350  ;;  %9358 = vrcp.f32 %v6550_v19 }
 0xb83   :  { %v9353_v12 = vpop.eup %9352  ;;  %v6573_v8 = vmul.f32 %v9351_v36, %v10878_v46 }
 0xb84   :  { %v6574_v13 = vmul.f32 %v9353_v12, %v10880_v50  ;;  %v6547_v51 = vpop.xlane.xlu0 %6546 }
 0xb85   :  { %9360 = vrcp.f32 %v6547_v51  ;;  %v6556_v59 = vpop.xlane.xlu1 %6555  ;;  %8995 = vmatmul.mubr.msk.f32.vlgmr.msra.gmra.mrb[68].mxu0 %vm621_vm9, %v6573_v8 }
 0xb86   :  { %9362 = vrcp.f32 %v6556_v59  ;;  %9000 = vmatmul.mubr.msk.f32.vlgmr.msra.gmra.mrb[84].mxu1 %vm621_vm9, %v6574_v13  ;;  %9003 = vmatpush3.msra.mxu0 %v6736_v20 }
 0xb87   :  { %v9355_v45 = vpop.eup %9354  ;;  %9008 = vmatpush3.msra.mxu1 %v6812_v32  ;;  %9009 = vmatprep.mubr.msk.f32.mxu1 %vm9398_vm8, %v11367_v9 }
 0xb88   :  { %v6576_v60 = vmul.f32 %v9355_v45, %v10888_v7  ;;  %v6553_v17 = vpop.xlane.xlu0 %6552  ;;  %9017 = vmatprep.subr.mxu1 %v11367_v9  ;;  %9004 = vmatprep.mubr.msk.f32.mxu0 %vm9398_vm8, %v11367_v9 }
 0xb89   :  { %9364 = vrcp.f32 %v6553_v17  ;;  %9012 = vmatprep.subr.mxu0 %v11367_v9 }
 0xb8a   :  { %9010 = vmatmul.mubr.msk.f32.vlgmr.msra.gmra.mrb[86].mxu1 %vm621_vm9, %v6576_v60  ;;  %v11380_v60 = vld [vmem:[#allocation8_spill] sm:$0xff] }
 0xb8b   :  { %v9357_v24 = vpop.eup %9356  ;;  %9018 = vmatpush3.msra.mxu1 %v6964_v38  ;;  %9019 = vmatprep.mubr.msk.f32.mxu1 %vm9398_vm8, %v11367_v9 }
 0xb8c   :  { %v9359_v28 = vpop.eup %9358  ;;  %v6575_v29 = vmul.f32 %v9357_v24, %v10893_v39  ;;  %v6559_v54 = vpop.xlane.xlu0 %6558  ;;  %9027 = vmatprep.subr.mxu1 %v11367_v9 }
 0xb8d   :  { %v6578_v6 = vmul.f32 %v9359_v28, %v10895_v35  ;;  %9366 = vrcp.f32 %v6559_v54 }
 0xb8e   :  { %9005 = vmatmul.mubr.msk.f32.vlgmr.msra.gmra.mrb[70].mxu0 %vm621_vm9, %v6575_v29 }
 0xb8f   :  { %v9361_v55 = vpop.eup %9360  ;;  %9013 = vmatpush3.msra.mxu0 %v6888_v56  ;;  %9020 = vmatmul.mubr.msk.f32.vlgmr.msra.gmra.mrb[88].mxu1 %vm621_vm9, %v6578_v6 }
 0xb90   :  { %v9363_v52 = vpop.eup %9362  ;;  %v6577_v48 = vmul.f32 %v9361_v55, %v10902_v4  ;;  %9028 = vmatpush3.msra.mxu1 %v7116_v0  ;;  %9014 = vmatprep.mubr.msk.f32.mxu0 %vm9398_vm8, %v11367_v9  ;;  %v7192_v34 = vpop.permute.xlu0 %7191  ;;  %v11381_v55 = vld [vmem:[#allocation9_spill] sm:$0xff] }
 0xb91   :  { %v6580_v46 = vmul.f32 %v9363_v52, %v10904_v40  ;;  %9022 = vmatprep.subr.mxu0 %v11367_v9  ;;  %9029 = vmatprep.mubr.msk.f32.mxu1 %vm9398_vm8, %v11367_v9 }
 0xb92   :  { %9015 = vmatmul.mubr.msk.f32.vlgmr.msra.gmra.mrb[72].mxu0 %vm621_vm9, %v6577_v48  ;;  %9037 = vmatprep.subr.mxu1 %v11367_v9 }
 0xb93   :  { %v9365_v50 = vpop.eup %9364  ;;  %9023 = vmatpush3.msra.mxu0 %v7040_v63  ;;  %9030 = vmatmul.mubr.msk.f32.vlgmr.msra.gmra.mrb[90].mxu1 %vm621_vm9, %v6580_v46 }
 0xb94   :  { %v6579_v49 = vmul.f32 %v9365_v50, %v10910_v53  ;;  %9024 = vmatprep.mubr.msk.f32.mxu0 %vm9398_vm8, %v11367_v9  ;;  %9032 = vmatprep.subr.mxu0 %v11367_v9  ;;  %v83_v53 = vld [vmem:[%s11335_s6 + $0x8] sm:$0xff]  ;;  %s9408_s6 = smov 24   ;;  %v7400_v54 = vpop.permute.xlu0 %7399 }
 0xb95   :  { %9039 = vmatprep.mubr.msk.f32.mxu1 %vm9398_vm8, %v11367_v9  ;;  %v9115_v21 = vpack.c.bf16 %v83_v53, %v82_v15  ;;  %v7468_v52 = vsel %vm621_vm9, %v11381_v55, %v7400_v54  ;;  %v9391_v53 = vld [vmem:[%s11360_s23 + $0x20] sm:$0xff] }
 0xb96   :  { %9025 = vmatmul.mubr.msk.f32.vlgmr.msra.gmra.mrb[74].mxu0 %vm621_vm9, %v6579_v49  ;;  %v8387_v49 = vld [vmem:[%s11336_s7] ss:$0 sm:$0xff] }
 0xb97   :  { %v9367_v58 = vpop.eup %9366  ;;  %9033 = vmatpush3.msra.mxu0 %v7192_v34  ;;  %9034 = vmatprep.mubr.msk.f32.mxu0 %vm9398_vm8, %v11367_v9 }
 0xb98   :  { %v6581_v41 = vmul.f32 %v9367_v58, %v10914_v57  ;;  %9116 = vmatprep.subr.bf16.mxu0 %v9115_v21  ;;  %v7432_v6 = vpop.permute.xlu0 %7431 }
 0xb99   :  { %v7471_v48 = vsel %vm7469_vm12, %v7468_v52, %v7432_v6 }
 0xb9a   :  { %9035 = vmatmul.mubr.msk.f32.vlgmr.msra.gmra.mrb[76].mxu0 %vm621_vm9, %v6581_v41 }
 0xb9b   :  { %9118 = vmatpush3.bf16.msra.mxu0 %v9115_v21 }
 0xb9c   :  { %9120 = vmatprep.subr.bf16.mxu0 %v9119_v10 }
 0xb9f   :  { %9122 = vmatpush3.bf16.msra.mxu0 %v9119_v10  ;;  %v9393_v10 = vld [vmem:[%s11360_s23 + $0x30] sm:$0xff] }
 0xbb9   :  { %v6562_v16 = vpop.xlane.xlu1 %6561 }
 0xbba   :  { %9368 = vrcp.f32 %v6562_v16 }
 0xbbd   :  { %v7268_v37 = vpop.permute.xlu1 %7267 }
 0xbbe   :  { %9038 = vmatpush3.msra.mxu1 %v7268_v37 }
 0xbc1   :  { %v7398_v59 = vpop.permute.xlu1 %7397 }
 0xbc2   :  { %v7467_v17 = vsel %vm621_vm9, %v11380_v60, %v7398_v59 }
 0xbc4   :  { %v9369_v31 = vpop.eup %9368 }
 0xbc5   :  { %v6582_v7 = vmul.f32 %v9369_v31, %v10923_v18  ;;  %v7430_v45 = vpop.permute.xlu1 %7429 }
 0xbc6   :  { %v7470_v24 = vsel %vm7469_vm12, %v7467_v17, %v7430_v45 }
 0xbc7   :  { %9040 = vmatmul.mubr.msk.f32.vlgmr.msra.gmra.mrb[92].mxu1 %vm621_vm9, %v6582_v7 }
 0xc58   :  { %v6655_v62 = vpop.f32.mrb[68].mxu0 }
 0xc59   :  { %v6731_v1 = vpop.f32.mrb[84].mxu1  ;;  %v8996_v47 = vpop.f32.mrb[69].mxu0 }
 0xc5a   :  { %v7445_v23 = vrot.slane %v6731_v1, 7  ;;  %v9001_v39 = vpop.f32.mrb[85].mxu1  ;;  %v9386_v47 = vld [vmem:[%s11360_s23 + $0x48] sm:$0xff] }
 0xc5c   :  { %v7446_v9 = vsel %vm447_vm1, %v7445_v23, %v6655_v62 }
 0xc5d   :  { %v6883_v14 = vpop.f32.mrb[86].mxu1 }
 0xc5e   :  { %v9011_v35 = vpop.f32.mrb[87].mxu1  ;;  %v7449_v40 = vrot.slane %v6883_v14, 5  ;;  %v9387_v14 = vld [vmem:[%s11360_s23] sm:$0xff] }
 0xc61   :  { %v6807_v61 = vpop.f32.mrb[70].mxu0 }
 0xc62   :  { %v7447_v3 = vrot.slane %v6807_v61, 6  ;;  %v7035_v27 = vpop.f32.mrb[88].mxu1  ;;  %v9006_v4 = vpop.f32.mrb[71].mxu0 }
 0xc63   :  { %v9021_v11 = vpop.f32.mrb[89].mxu1  ;;  %v7453_v32 = vrot.slane %v7035_v27, 3  ;;  %v9389_v4 = vld [vmem:[%s11360_s23 + $0x10] sm:$0xff] }
 0xc64   :  { %v7448_v57 = vsel %vm450_vm2, %v7447_v3, %v7446_v9  ;;  %v9388_v3 = vld [vmem:[%s11360_s23 + $0x8] sm:$0xff]  ;;  %v9390_v11 = vld [vmem:[%s11360_s23 + $0x18] sm:$0xff] }
 0xc65   :  { %v6959_v22 = vpop.f32.mrb[72].mxu0  ;;  %v7450_v44 = vsel %vm453_vm3, %v7449_v40, %v7448_v57 }
 0xc66   :  { %v7451_v18 = vrot.slane %v6959_v22, 4  ;;  %v7187_v25 = vpop.f32.mrb[90].mxu1  ;;  %v9016_v26 = vpop.f32.mrb[73].mxu0 }
 0xc67   :  { %v9031_v20 = vpop.f32.mrb[91].mxu1  ;;  %v7457_v5 = vrot.slane %v7187_v25, 1 }
 0xc68   :  { %v7452_v56 = vsel %vm456_vm4, %v7451_v18, %v7450_v44 }
 0xc69   :  { %v7111_v38 = vpop.f32.mrb[74].mxu0  ;;  %v7454_v63 = vsel %vm459_vm5, %v7453_v32, %v7452_v56  ;;  %v9394_v32 = vld [vmem:[%s11360_s23 + $0x38] sm:$0xff] }
 0xc6a   :  { %v7455_v0 = vrot.slane %v7111_v38, 2  ;;  %v9026_v2 = vpop.f32.mrb[75].mxu0 }
 0xc6c   :  { %v7456_v33 = vsel %vm462_vm6, %v7455_v0, %v7454_v63 }
 0xc6d   :  { %v7263_v30 = vpop.f32.mrb[76].mxu0  ;;  %v7458_v19 = vsel %vm464_vm7, %v7457_v5, %v7456_v33 }
 0xc6e   :  { %v9036_v36 = vpop.f32.mrb[77].mxu0  ;;  %7461 = vrot.lane.b32.xlu1 %v7458_v19, %s9408_s6 }
 0xc9a   :  { %v7339_v12 = vpop.f32.mrb[92].mxu1 }
 0xc9b   :  { %v7459_v8 = vrot.slane %v7339_v12, 7  ;;  %v9041_v13 = vpop.f32.mrb[93].mxu1  ;;  %v9395_v12 = vld [vmem:[%s11360_s23 + $0x40] sm:$0xff] }
 0xc9d   :  { %v7460_v51 = vsel %vm447_vm1, %v7459_v8, %v7263_v30 }
 0xc9e   :  { %7463 = vrot.lane.b32.xlu0 %v7460_v51, %s9408_s6 }
 0xce0   :  { %v7462_v28 = vpop.permute.xlu1 %7461 }
 0xce1   :  { %v7473_v29 = vsel %vm7472_vm11, %v7470_v24, %v7462_v28 }
 0xce2   :  { %9050 = vmatprep.mubr.msk.f32.mxu0 %vm111_vm0, %v7473_v29 }
 0xd10   :  { %v7464_v46 = vpop.permute.xlu0 %7463 }
 0xd11   :  { %v7474_v50 = vsel %vm7472_vm11, %v7471_v48, %v7464_v46 }
 0xd12   :  { %9051 = vmatmul.mubr.msk.f32.vlgmr.msra.gmra.mrb[78].mxu0 %vm111_vm0, %v7474_v50 }
 0xde5   :  { %v9052_v34 = vpop.f32.mrb[78].mxu0 }
 0xde6   :  { %v7559_v58 = vadd.f32 %v9052_v34, %v8387_v49  ;;  %v7553_v41 = vpop.f32.mrb[79].mxu0 }
 0xde7   :  { %v7554_v16 = vadd.f32 %v8387_v49, %v7553_v41 }
 0xde8   :  { %v7572_v37 = vrot.slane %v7559_v58, 2  ;;  %v7571_v56 = vrot.slane %v7559_v58, 1 }
 0xde9   :  { %v7564_v31 = vrot.slane %v7554_v16, 1  ;;  %v7565_v7 = vrot.slane %v7554_v16, 2  ;;  %v7566_v62 = vrot.slane %v7554_v16, 3  ;;  %v7567_v1 = vrot.slane %v7554_v16, 4 }
 0xdea   :  { %v11005_v23 = vadd.f32 %v9386_v47, %v7572_v37  ;;  %v7568_v39 = vrot.slane %v7554_v16, 5  ;;  %v7569_v9 = vrot.slane %v7554_v16, 6  ;;  %v7570_v61 = vrot.slane %v7554_v16, 7 }
 0xdeb   :  { %v11010_v35 = vadd.f32 %v9387_v14, %v7564_v31  ;;  %v11015_v27 = vadd.f32 %v9388_v3, %v7565_v7  ;;  %v11020_v40 = vadd.f32 %v9389_v4, %v7566_v62  ;;  %v11025_v15 = vadd.f32 %v9390_v11, %v7567_v1 }
 0xdec   :  { %v11030_v43 = vadd.f32 %v9391_v53, %v7568_v39  ;;  %v7617_v21 = vrot.slane %v11005_v23, 7  ;;  %v11038_v22 = vadd.f32 %v9392_v42, %v7569_v9  ;;  %v11044_v18 = vadd.f32 %v9393_v10, %v7570_v61 }
 0xded   :  { %v7622_v57 = vsel %vm7621_vm13, %v11010_v35, 0.0  ;;  %v7603_v44 = vrot.slane %v11015_v27, 7  ;;  %v7604_v25 = vrot.slane %v11020_v40, 6  ;;  %v7606_v26 = vrot.slane %v11025_v15, 5 }
 0xdee   :  { %7623 = vadd.xlane.f32.xlu0 %v7622_v57  ;;  %v11051_v20 = vadd.f32 %v9394_v32, %v7554_v16  ;;  %v7608_v63 = vrot.slane %v11030_v43, 4  ;;  %v7629_v0 = vsel %vm7628_vm14, %v7617_v21, 0.0  ;;  %v7610_v5 = vrot.slane %v11038_v22, 3 }
 0xdef   :  { %v7605_v38 = vsel %vm447_vm1, %v7604_v25, %v7603_v44  ;;  %v7612_v30 = vrot.slane %v11044_v18, 2  ;;  %v11065_v8 = vadd.f32 %v9395_v12, %v7571_v56 }
 0xdf0   :  { %v7607_v2 = vsel %vm450_vm2, %v7606_v26, %v7605_v38  ;;  %v7614_v36 = vrot.slane %v11051_v20, 1 }
 0xdf1   :  { %v7609_v33 = vsel %vm453_vm3, %v7608_v63, %v7607_v2 }
 0xdf2   :  { %7630 = vadd.xlane.f32.xlu0 %v7629_v0  ;;  %v7611_v19 = vsel %vm456_vm4, %v7610_v5, %v7609_v33 }
 0xdf3   :  { %v7613_v13 = vsel %vm459_vm5, %v7612_v30, %v7611_v19 }
 0xdf4   :  { %v7615_v51 = vsel %vm462_vm6, %v7614_v36, %v7613_v13 }
 0xdf5   :  { %v7616_v59 = vsel %vm464_vm7, %v11065_v8, %v7615_v51 }
 0xdf6   :  { %v7625_v45 = vsel %vm111_vm0, %v7616_v59, 0.0  ;;  %v89_v59 = vld [vmem:[%s11337_s10] sm:$0xff] }
 0xdf7   :  { %7626 = vadd.xlane.f32.xlu1 %v7625_v45  ;;  %v90_v45 = vld [vmem:[%s11337_s10 + $0x8] sm:$0xff] }
 0xe7b   :  { %v7624_v60 = vpop.xlane.xlu0 %7623 }
 0xe7c   :  { %v7632_v17 = vmul.f32 0.03125, %v7624_v60  ;;  %v91_v60 = vld [vmem:[%s11337_s10 + $0x10] sm:$0xff] }
 0xe7e   :  { %v11073_v24 = vsub.f32 %v11010_v35, %v7632_v17  ;;  %v9123_v17 = vpack.c.bf16 %v90_v45, %v89_v59 }
 0xe7f   :  { %v7631_v54 = vpop.xlane.xlu0 %7630 }
 0xe80   :  { %v7666_v28 = vmul.f32 %v11073_v24, %v11073_v24  ;;  %v7634_v52 = vmul.f32 0.03125, %v7631_v54  ;;  %9124 = vmatprep.subr.bf16.mxu1 %v9123_v17  ;;  %v94_v54 = vld [vmem:[%s11338_s12] sm:$0xff] }
 0xe81   :  { %9126 = vmatpush3.bf16.msra.mxu1 %v9123_v17 }
 0xe82   :  { %v7704_v29 = vsel %vm7621_vm13, %v7666_v28, 0.0  ;;  %v7645_v62 = vrot.slane %v7634_v52, 1  ;;  %v92_v28 = vld [vmem:[%s11337_s10 + $0x18] sm:$0xff] }
 0xe83   :  { %7705 = vadd.xlane.f32.xlu1 %v7704_v29  ;;  %v9127_v29 = vpack.c.bf16 %v92_v28, %v91_v60 }
 0xe84   :  { %v7627_v6 = vpop.xlane.xlu1 %7626  ;;  %v11112_v42 = vsub.f32 %v11005_v23, %v7645_v62 }
 0xe85   :  { %v7633_v55 = vmul.f32 0.03125, %v7627_v6  ;;  %9128 = vmatprep.subr.bf16.mxu1 %v9127_v29  ;;  %v95_v6 = vld [vmem:[%s11338_s12 + $0x8] sm:$0xff] }
 0xe86   :  { %v7675_v5 = vmul.f32 %v11112_v42, %v11112_v42  ;;  %9130 = vmatpush3.bf16.msra.mxu1 %v9127_v29 }
 0xe87   :  { %v7638_v48 = vrot.slane %v7633_v55, 1  ;;  %v7639_v46 = vrot.slane %v7633_v55, 2  ;;  %v7640_v50 = vrot.slane %v7633_v55, 3  ;;  %v7641_v49 = vrot.slane %v7633_v55, 4 }
 0xe88   :  { %v7642_v34 = vrot.slane %v7633_v55, 5  ;;  %v7643_v58 = vrot.slane %v7633_v55, 6  ;;  %v7644_v41 = vrot.slane %v7633_v55, 7  ;;  %v11117_v10 = vsub.f32 %v11065_v8, %v7633_v55 }
 0xe89   :  { %v11079_v16 = vsub.f32 %v11015_v27, %v7638_v48  ;;  %v11082_v37 = vsub.f32 %v11020_v40, %v7639_v46  ;;  %v11085_v31 = vsub.f32 %v11025_v15, %v7640_v50  ;;  %v11088_v7 = vsub.f32 %v11030_v43, %v7641_v49 }
 0xe8a   :  { %v11091_v1 = vsub.f32 %v11038_v22, %v7642_v34  ;;  %v11094_v47 = vsub.f32 %v11044_v18, %v7643_v58  ;;  %v11097_v39 = vsub.f32 %v11051_v20, %v7644_v41  ;;  %v7674_v33 = vmul.f32 %v11117_v10, %v11117_v10 }
 0xe8b   :  { %v7667_v9 = vmul.f32 %v11079_v16, %v11079_v16  ;;  %v7668_v14 = vmul.f32 %v11082_v37, %v11082_v37  ;;  %v7669_v61 = vmul.f32 %v11085_v31, %v11085_v31  ;;  %v7670_v3 = vmul.f32 %v11088_v7, %v11088_v7 }
 0xe8c   :  { %v7671_v4 = vmul.f32 %v11091_v1, %v11091_v1  ;;  %v7672_v11 = vmul.f32 %v11094_v47, %v11094_v47  ;;  %v7673_v44 = vmul.f32 %v11097_v39, %v11097_v39  ;;  %v7700_v13 = vrot.slane %v7675_v5, 7 }
 0xe8d   :  { %v7686_v53 = vrot.slane %v7667_v9, 7  ;;  %v7687_v57 = vrot.slane %v7668_v14, 6  ;;  %v7689_v21 = vrot.slane %v7669_v61, 5  ;;  %v7691_v26 = vrot.slane %v7670_v3, 4  ;;  %v8390_v61 = vld [vmem:[%s11339_s8] ss:$0 sm:$0xff] }
 0xe8e   :  { %v7693_v56 = vrot.slane %v7671_v4, 3  ;;  %v7695_v63 = vrot.slane %v7672_v11, 2  ;;  %v7697_v2 = vrot.slane %v7673_v44, 1  ;;  %v7710_v51 = vsel %vm7628_vm14, %v7700_v13, 0.0  ;;  %v8391_v11 = vld [vmem:[%s11340_s9] ss:$0 sm:$0xff] }
 0xe8f   :  { %v7688_v25 = vsel %vm447_vm1, %v7687_v57, %v7686_v53  ;;  %v9131_v55 = vpack.c.bf16 %v95_v6, %v94_v54 }
 0xe90   :  { %v7690_v32 = vsel %vm450_vm2, %v7689_v21, %v7688_v25 }
 0xe91   :  { %v7692_v38 = vsel %vm453_vm3, %v7691_v26, %v7690_v32  ;;  %9132 = vmatprep.subr.bf16.mxu0 %v9131_v55 }
 0xe92   :  { %v7694_v0 = vsel %vm456_vm4, %v7693_v56, %v7692_v38  ;;  %9134 = vmatpush3.bf16.msra.mxu0 %v9131_v55 }
 0xe93   :  { %v7696_v30 = vsel %vm459_vm5, %v7695_v63, %v7694_v0 }
 0xe94   :  { %v7698_v19 = vsel %vm462_vm6, %v7697_v2, %v7696_v30 }
 0xe95   :  { %v7699_v36 = vsel %vm464_vm7, %v7674_v33, %v7698_v19 }
 0xe96   :  { %v7707_v12 = vsel %vm111_vm0, %v7699_v36, 0.0 }
 0xe97   :  { %7708 = vadd.xlane.f32.xlu0 %v7707_v12 }
 0xe9b   :  { %7711 = vadd.xlane.f32.xlu0 %v7710_v51 }
 0xf10   :  { %v7706_v52 = vpop.xlane.xlu1 %7705 }
 0xf11   :  { %v7713_v48 = vmul.f32 0.03125, %v7706_v52 }
 0xf13   :  { %v7716_v46 = vadd.f32 1e-05, %v7713_v48 }
 0xf15   :  { %9370 = vrsqrt.f32 %v7716_v46 }
 0xf1f   :  { %v9371_v9 = vpop.eup %9370 }
 0xf20   :  { %v7743_v14 = vmul.f32 %v9371_v9, %v11073_v24 }
 0xf22   :  { %v7759_v4 = vmul.f32 %v8390_v61, %v7743_v14 }
 0xf24   :  { %v7709_v50 = vpop.xlane.xlu0 %7708  ;;  %v7775_v2 = vadd.f32 %v8391_v11, %v7759_v4 }
 0xf25   :  { %v7714_v49 = vmul.f32 0.03125, %v7709_v50 }
 0xf26   :  { %v7801_v17 = vrot.slane %v7775_v2, 7  ;;  %v104_v2 = vld [vmem:[%s11338_s12 + $0x50] sm:$0xff] }
 0xf27   :  { %v7717_v34 = vadd.f32 1e-05, %v7714_v49 }
 0xf28   :  { %v7712_v58 = vpop.xlane.xlu0 %7711 }
 0xf29   :  { %9372 = vrsqrt.f32 %v7717_v34  ;;  %v7715_v41 = vmul.f32 0.03125, %v7712_v58 }
 0xf2b   :  { %v7718_v62 = vadd.f32 1e-05, %v7715_v41 }
 0xf2d   :  { %9374 = vrsqrt.f32 %v7718_v62 }
 0xf33   :  { %v9373_v3 = vpop.eup %9372 }
 0xf34   :  { %v7725_v53 = vrot.slane %v9373_v3, 1  ;;  %v7726_v57 = vrot.slane %v9373_v3, 2  ;;  %v7727_v21 = vrot.slane %v9373_v3, 3  ;;  %v7728_v44 = vrot.slane %v9373_v3, 4 }
 0xf35   :  { %v7729_v25 = vrot.slane %v9373_v3, 5  ;;  %v7730_v26 = vrot.slane %v9373_v3, 6  ;;  %v7731_v32 = vrot.slane %v9373_v3, 7  ;;  %v7751_v30 = vmul.f32 %v9373_v3, %v11117_v10 }
 0xf36   :  { %v7744_v56 = vmul.f32 %v7725_v53, %v11079_v16  ;;  %v7745_v24 = vmul.f32 %v7726_v57, %v11082_v37  ;;  %v7746_v38 = vmul.f32 %v7727_v21, %v11085_v31  ;;  %v7747_v63 = vmul.f32 %v7728_v44, %v11088_v7  ;;  %v96_v57 = vld [vmem:[%s11338_s12 + $0x10] sm:$0xff]  ;;  %v98_v44 = vld [vmem:[%s11338_s12 + $0x20] sm:$0xff] }
 0xf37   :  { %v9375_v0 = vpop.eup %9374  ;;  %v7748_v5 = vmul.f32 %v7729_v25, %v11091_v1  ;;  %v7749_v33 = vmul.f32 %v7730_v26, %v11094_v47  ;;  %v7750_v16 = vmul.f32 %v7731_v32, %v11097_v39  ;;  %v7767_v28 = vmul.f32 %v8390_v61, %v7751_v30  ;;  %v99_v25 = vld [vmem:[%s11338_s12 + $0x28] sm:$0xff]  ;;  %v100_v32 = vld [vmem:[%s11338_s12 + $0x30] sm:$0xff]  ;;  %v106_v30 = vld [vmem:[%s11338_s12 + $0x60] sm:$0xff] }
 0xf38   :  { %v7732_v19 = vrot.slane %v9375_v0, 1  ;;  %v7760_v36 = vmul.f32 %v8390_v61, %v7744_v56  ;;  %v7761_v12 = vmul.f32 %v8390_v61, %v7745_v24  ;;  %v7762_v13 = vmul.f32 %v8390_v61, %v7746_v38  ;;  %v101_v56 = vld [vmem:[%s11338_s12 + $0x38] sm:$0xff]  ;;  %v102_v38 = vld [vmem:[%s11338_s12 + $0x40] sm:$0xff] }
 0xf39   :  { %v7763_v51 = vmul.f32 %v8390_v61, %v7747_v63  ;;  %v7764_v37 = vmul.f32 %v8390_v61, %v7748_v5  ;;  %v7765_v59 = vmul.f32 %v8390_v61, %v7749_v33  ;;  %v7766_v52 = vmul.f32 %v8390_v61, %v7750_v16  ;;  %v103_v63 = vld [vmem:[%s11338_s12 + $0x48] sm:$0xff]  ;;  %v105_v5 = vld [vmem:[%s11338_s12 + $0x58] sm:$0xff] }
 0xf3a   :  { %v7752_v31 = vmul.f32 %v7732_v19, %v11112_v42  ;;  %v7776_v7 = vadd.f32 %v8391_v11, %v7760_v36  ;;  %v7777_v45 = vadd.f32 %v8391_v11, %v7761_v12  ;;  %v7778_v60 = vadd.f32 %v8391_v11, %v7762_v13  ;;  %v107_v19 = vld [vmem:[%s11338_s12 + $0x68] sm:$0xff]  ;;  %v108_v12 = vld [vmem:[%s11338_s12 + $0x70] sm:$0xff]  ;;  %v109_v13 = vld [vmem:[%s11338_s12 + $0x78] sm:$0xff] }
 0xf3b   :  { %v7779_v1 = vadd.f32 %v8391_v11, %v7763_v51  ;;  %v7780_v29 = vadd.f32 %v8391_v11, %v7764_v37  ;;  %v7781_v6 = vadd.f32 %v8391_v11, %v7765_v59  ;;  %v7783_v42 = vadd.f32 %v8391_v11, %v7767_v28  ;;  %v8392_v51 = vld [vmem:[%s11341_s11] ss:$0 sm:$0xff] }
 0xf3c   :  { %v7768_v47 = vmul.f32 %v8390_v61, %v7752_v31  ;;  %v7802_v10 = vrot.slane %v7776_v7, 6  ;;  %v7804_v54 = vrot.slane %v7777_v45, 5  ;;  %v7806_v48 = vrot.slane %v7778_v60, 4 }
 0xf3d   :  { %v7808_v50 = vrot.slane %v7779_v1, 3  ;;  %v7810_v34 = vrot.slane %v7780_v29, 2  ;;  %v7812_v41 = vrot.slane %v7781_v6, 1  ;;  %v7782_v9 = vadd.f32 %v8391_v11, %v7766_v52 }
 0xf3e   :  { %v7784_v55 = vadd.f32 %v8391_v11, %v7768_v47  ;;  %v7803_v39 = vsel %vm447_vm1, %v7802_v10, %v7801_v17  ;;  %v7815_v61 = vrot.slane %v7783_v42, 7  ;;  %v97_v11 = vld [vmem:[%s11338_s12 + $0x18] sm:$0xff]  ;;  %v9139_v26 = vpack.c.bf16 %v99_v25, %v98_v44 }
 0xf3f   :  { %v7805_v46 = vsel %vm450_vm2, %v7804_v54, %v7803_v39  ;;  %v9135_v21 = vpack.c.bf16 %v97_v11, %v96_v57  ;;  %v9143_v24 = vpack.c.bf16 %v101_v56, %v100_v32  ;;  %v9147_v0 = vpack.c.bf16 %v103_v63, %v102_v38 }
 0xf40   :  { %v7807_v49 = vsel %vm453_vm3, %v7806_v48, %v7805_v46  ;;  %v7816_v62 = vrot.slane %v7784_v55, 6  ;;  %v9151_v33 = vpack.c.bf16 %v105_v5, %v104_v2  ;;  %v9155_v36 = vpack.c.bf16 %v107_v19, %v106_v30 }
 0xf41   :  { %v7809_v58 = vsel %vm456_vm4, %v7808_v50, %v7807_v49  ;;  %9136 = vmatprep.subr.bf16.mxu0 %v9135_v21  ;;  %v9159_v16 = vpack.c.bf16 %v109_v13, %v108_v12 }
 0xf42   :  { %v7811_v14 = vsel %vm459_vm5, %v7810_v34, %v7809_v58  ;;  %v7817_v53 = vsel %vm447_vm1, %v7816_v62, %v7815_v61  ;;  %9138 = vmatpush3.bf16.msra.mxu0 %v9135_v21  ;;  %v8395_v34 = vld [vmem:[%s11342_s13] ss:$0 sm:$0xff] }
 0xf43   :  { %v7813_v3 = vsel %vm462_vm6, %v7812_v41, %v7811_v14  ;;  %9140 = vmatprep.subr.bf16.mxu0 %v9139_v26 }
 0xf44   :  { %v7814_v4 = vsel %vm464_vm7, %v7782_v9, %v7813_v3 }
 0xf45   :  { %9061 = vmatprep.mubr.msk.f32.mxu1 %vm111_vm0, %v7814_v4 }
 0xf46   :  { %9062 = vmatmul.mubr.msk.f32.vlgmr.msra.gmra.mrb[94].mxu1 %vm111_vm0, %v7817_v53  ;;  %9142 = vmatpush3.bf16.msra.mxu0 %v9139_v26 }
 0xf47   :  { %9144 = vmatprep.subr.bf16.mxu0 %v9143_v24 }
 0xf4a   :  { %9146 = vmatpush3.bf16.msra.mxu0 %v9143_v24 }
 0xf4b   :  { %9148 = vmatprep.subr.bf16.mxu0 %v9147_v0 }
 0xf4e   :  { %9150 = vmatpush3.bf16.msra.mxu0 %v9147_v0 }
 0xf4f   :  { %9152 = vmatprep.subr.bf16.mxu0 %v9151_v33 }
 0xf52   :  { %9154 = vmatpush3.bf16.msra.mxu0 %v9151_v33 }
 0xf53   :  { %9156 = vmatprep.subr.bf16.mxu0 %v9155_v36 }
 0xf56   :  { %9158 = vmatpush3.bf16.msra.mxu0 %v9155_v36 }
 0xf57   :  { %9160 = vmatprep.subr.bf16.mxu0 %v9159_v16 }
 0xf5a   :  { %9162 = vmatpush3.bf16.msra.mxu0 %v9159_v16 }
0x1019   :  { %v9063_v37 = vpop.f32.mrb[94].mxu1 }
0x101a   :  { %v7894_v59 = vadd.f32 %v9063_v37, %v8392_v51  ;;  %v7888_v31 = vpop.f32.mrb[95].mxu1 }
0x101b   :  { %v7889_v7 = vadd.f32 %v8392_v51, %v7888_v31 }
0x101c   :  { %v7900_v45 = vmul.f32 0.044715, %v7894_v59  ;;  %v7898_v50 = vmul.f32 0.5, %v7894_v59 }
0x101d   :  { %v7899_v60 = vmul.f32 0.044715, %v7889_v7  ;;  %v7897_v48 = vmul.f32 0.5, %v7889_v7 }
0x101e   :  { %v7902_v17 = vmul.f32 %v7900_v45, %v7894_v59 }
0x101f   :  { %v7901_v1 = vmul.f32 %v7899_v60, %v7889_v7 }
0x1020   :  { %v7904_v28 = vmul.f32 %v7902_v17, %v7894_v59 }
0x1021   :  { %v7903_v47 = vmul.f32 %v7901_v1, %v7889_v7 }
0x1022   :  { %v7906_v29 = vadd.f32 %v7904_v28, %v7894_v59 }
0x1023   :  { %v7905_v10 = vadd.f32 %v7903_v47, %v7889_v7 }
0x1024   :  { %v7908_v54 = vmul.f32 0.7978846, %v7906_v29 }
0x1025   :  { %v7907_v6 = vmul.f32 0.7978846, %v7905_v10 }
0x1026   :  { %9376 = vtanh.f32 %v7908_v54 }
0x1027   :  { %9378 = vtanh.f32 %v7907_v6 }
0x1030   :  { %v9377_v55 = vpop.eup %9376 }
0x1031   :  { %v9379_v52 = vpop.eup %9378  ;;  %v7912_v39 = vadd.f32 1.0, %v9377_v55 }
0x1032   :  { %v7911_v46 = vadd.f32 1.0, %v9379_v52 }
0x1033   :  { %v7914_v49 = vmul.f32 %v7912_v39, %v7898_v50 }
0x1034   :  { %v7913_v42 = vmul.f32 %v7911_v46, %v7897_v48 }
0x1036   :  { %9096 = vmatprep.mubr.f32.mxu0 %v7913_v42 }
0x1037   :  { %9097 = vmatmul.mubr.f32.vlgmr.msra.gmra.mrb[80].mxu0 %v7914_v49 }
0x110a   :  { %v9098_v58 = vpop.f32.mrb[80].mxu0 }
0x110b   :  { %v7993_v41 = vadd.f32 %v9098_v58, %v8395_v34  ;;  %v7987_v62 = vpop.f32.mrb[81].mxu0 }
0x110c   :  { %v7988_v9 = vadd.f32 %v8395_v34, %v7987_v62 }
0x110d   :  { %v8006_v14 = vrot.slane %v7993_v41, 2  ;;  %v8005_v33 = vrot.slane %v7993_v41, 1 }
0x110e   :  { %v7999_v3 = vrot.slane %v7988_v9, 2  ;;  %v8000_v61 = vrot.slane %v7988_v9, 3  ;;  %v8001_v4 = vrot.slane %v7988_v9, 4  ;;  %v8002_v53 = vrot.slane %v7988_v9, 5 }
0x110f   :  { %v8026_v57 = vadd.f32 %v8006_v14, %v11005_v23  ;;  %v8003_v11 = vrot.slane %v7988_v9, 6  ;;  %v8004_v21 = vrot.slane %v7988_v9, 7  ;;  %v8024_v5 = vadd.f32 %v7988_v9, %v11051_v20 }
0x1110   :  { %v8018_v44 = vadd.f32 %v7999_v3, %v11015_v27  ;;  %v8019_v25 = vadd.f32 %v8000_v61, %v11020_v40  ;;  %v8020_v26 = vadd.f32 %v8001_v4, %v11025_v15  ;;  %v8021_v32 = vadd.f32 %v8002_v53, %v11030_v43 }
0x1111   :  { %v8051_v56 = vrot.slane %v8026_v57, 7  ;;  %v8022_v24 = vadd.f32 %v8003_v11, %v11038_v22  ;;  %v8023_v38 = vadd.f32 %v8004_v21, %v11044_v18  ;;  %v8048_v19 = vrot.slane %v8024_v5, 1 }
0x1112   :  { %v8037_v63 = vrot.slane %v8018_v44, 7  ;;  %v8038_v0 = vrot.slane %v8019_v25, 6  ;;  %v8040_v2 = vrot.slane %v8020_v26, 5  ;;  %v8042_v40 = vrot.slane %v8021_v32, 4 }
0x1113   :  { %v8061_v23 = vsel %vm7628_vm14, %v8051_v56, 0.0  ;;  %v8044_v43 = vrot.slane %v8022_v24, 3  ;;  %v8046_v22 = vrot.slane %v8023_v38, 2  ;;  %v7998_v36 = vrot.slane %v7988_v9, 1 }
0x1114   :  { %8062 = vadd.xlane.f32.xlu0 %v8061_v23  ;;  %v8039_v27 = vsel %vm447_vm1, %v8038_v0, %v8037_v63  ;;  %v8025_v12 = vadd.f32 %v8005_v33, %v11065_v8 }
0x1115   :  { %v8041_v15 = vsel %vm450_vm2, %v8040_v2, %v8039_v27  ;;  %v8017_v37 = vadd.f32 %v7998_v36, %v11010_v35 }
0x1116   :  { %v8043_v30 = vsel %vm453_vm3, %v8042_v40, %v8041_v15 }
0x1117   :  { %v8045_v18 = vsel %vm456_vm4, %v8044_v43, %v8043_v30  ;;  %v8055_v59 = vsel %vm7621_vm13, %v8017_v37, 0.0 }
0x1118   :  { %v8047_v13 = vsel %vm459_vm5, %v8046_v22, %v8045_v18 }
0x1119   :  { %v8049_v20 = vsel %vm462_vm6, %v8048_v19, %v8047_v13 }
0x111a   :  { %v8050_v16 = vsel %vm464_vm7, %v8025_v12, %v8049_v20  ;;  %v8396_v20 = vld [vmem:[%s11343_s14] ss:$0 sm:$0xff] }
0x111b   :  { %v8058_v51 = vsel %vm111_vm0, %v8050_v16, 0.0 }
0x111c   :  { %8059 = vadd.xlane.f32.xlu1 %v8058_v51 }
0x1120   :  { %8056 = vadd.xlane.f32.xlu1 %v8055_v59 }
0x11a1   :  { %v8063_v31 = vpop.xlane.xlu0 %8062 }
0x11a2   :  { %v8066_v7 = vmul.f32 0.03125, %v8063_v31 }
0x11a4   :  { %v8077_v45 = vrot.slane %v8066_v7, 1 }
0x11a6   :  { %v11244_v60 = vsub.f32 %v8026_v57, %v8077_v45 }
0x11a8   :  { %v8107_v8 = vmul.f32 %v11244_v60, %v11244_v60 }
0x11a9   :  { %v8060_v17 = vpop.xlane.xlu1 %8059 }
0x11aa   :  { %v8065_v1 = vmul.f32 0.03125, %v8060_v17  ;;  %v8132_v28 = vrot.slane %v8107_v8, 7 }
0x11ac   :  { %v8142_v47 = vsel %vm7628_vm14, %v8132_v28, 0.0  ;;  %v8070_v29 = vrot.slane %v8065_v1, 1  ;;  %v8071_v10 = vrot.slane %v8065_v1, 2  ;;  %v8072_v35 = vrot.slane %v8065_v1, 3 }
0x11ad   :  { %8143 = vadd.xlane.f32.xlu1 %v8142_v47  ;;  %v8073_v54 = vrot.slane %v8065_v1, 4  ;;  %v8074_v6 = vrot.slane %v8065_v1, 5  ;;  %v8075_v55 = vrot.slane %v8065_v1, 6  ;;  %v8076_v52 = vrot.slane %v8065_v1, 7  ;;  %v8057_v58 = vpop.xlane.xlu1 %8056 }
0x11ae   :  { %v11249_v39 = vsub.f32 %v8018_v44, %v8070_v29  ;;  %v11251_v48 = vsub.f32 %v8019_v25, %v8071_v10  ;;  %v11253_v46 = vsub.f32 %v8020_v26, %v8072_v35  ;;  %v8064_v57 = vmul.f32 0.03125, %v8057_v58 }
0x11af   :  { %v11255_v50 = vsub.f32 %v8021_v32, %v8073_v54  ;;  %v11257_v42 = vsub.f32 %v8022_v24, %v8074_v6  ;;  %v11259_v49 = vsub.f32 %v8023_v38, %v8075_v55  ;;  %v11261_v34 = vsub.f32 %v8024_v5, %v8076_v52 }
0x11b0   :  { %v8099_v41 = vmul.f32 %v11249_v39, %v11249_v39  ;;  %v8100_v62 = vmul.f32 %v11251_v48, %v11251_v48  ;;  %v8101_v9 = vmul.f32 %v11253_v46, %v11253_v46  ;;  %v11277_v44 = vsub.f32 %v8025_v12, %v8065_v1 }
0x11b1   :  { %v8102_v14 = vmul.f32 %v11255_v50, %v11255_v50  ;;  %v8103_v3 = vmul.f32 %v11257_v42, %v11257_v42  ;;  %v8104_v61 = vmul.f32 %v11259_v49, %v11259_v49  ;;  %v8105_v11 = vmul.f32 %v11261_v34, %v11261_v34 }
0x11b2   :  { %v8118_v4 = vrot.slane %v8099_v41, 7  ;;  %v8119_v53 = vrot.slane %v8100_v62, 6  ;;  %v8121_v21 = vrot.slane %v8101_v9, 5  ;;  %v11282_v63 = vsub.f32 %v8017_v37, %v8064_v57  ;;  %v8397_v37 = vld [vmem:[%s11344_s15] ss:$0 sm:$0xff] }
0x11b3   :  { %v8123_v26 = vrot.slane %v8102_v14, 4  ;;  %v8125_v56 = vrot.slane %v8103_v3, 3  ;;  %v8127_v38 = vrot.slane %v8104_v61, 2  ;;  %v8129_v2 = vrot.slane %v8105_v11, 1 }
0x11b4   :  { %v8120_v25 = vsel %vm447_vm1, %v8119_v53, %v8118_v4  ;;  %v8106_v23 = vmul.f32 %v11277_v44, %v11277_v44  ;;  %v8098_v15 = vmul.f32 %v11282_v63, %v11282_v63 }
0x11b5   :  { %v8122_v32 = vsel %vm450_vm2, %v8121_v21, %v8120_v25 }
0x11b6   :  { %v8124_v24 = vsel %vm453_vm3, %v8123_v26, %v8122_v32  ;;  %v8136_v43 = vsel %vm7621_vm13, %v8098_v15, 0.0 }
0x11b7   :  { %v8126_v0 = vsel %vm456_vm4, %v8125_v56, %v8124_v24 }
0x11b8   :  { %v8128_v5 = vsel %vm459_vm5, %v8127_v38, %v8126_v0 }
0x11b9   :  { %v8130_v33 = vsel %vm462_vm6, %v8129_v2, %v8128_v5 }
0x11ba   :  { %v8131_v27 = vsel %vm464_vm7, %v8106_v23, %v8130_v33 }
0x11bb   :  { %v8139_v40 = vsel %vm111_vm0, %v8131_v27, 0.0 }
0x11bc   :  { %8140 = vadd.xlane.f32.xlu0 %v8139_v40 }
0x11c0   :  { %8137 = vadd.xlane.f32.xlu0 %v8136_v43 }
0x123a   :  { %v8144_v30 = vpop.xlane.xlu1 %8143 }
0x123b   :  { %v8147_v22 = vmul.f32 0.03125, %v8144_v30 }
0x123d   :  { %v8150_v18 = vadd.f32 1e-05, %v8147_v22 }
0x123f   :  { %9380 = vrsqrt.f32 %v8150_v18 }
0x1249   :  { %v9381_v19 = vpop.eup %9380  ;;  %v8141_v36 = vpop.xlane.xlu0 %8140 }
0x124a   :  { %v8164_v12 = vrot.slane %v9381_v19, 1  ;;  %v8146_v13 = vmul.f32 0.03125, %v8141_v36 }
0x124c   :  { %v8184_v16 = vmul.f32 %v8164_v12, %v11244_v60  ;;  %v8149_v51 = vadd.f32 1e-05, %v8146_v13 }
0x124d   :  { %v8138_v59 = vpop.xlane.xlu0 %8137 }
0x124e   :  { %v8200_v31 = vmul.f32 %v8396_v20, %v8184_v16  ;;  %9382 = vrsqrt.f32 %v8149_v51  ;;  %v8145_v7 = vmul.f32 0.03125, %v8138_v59 }
0x1250   :  { %v8216_v45 = vadd.f32 %v8397_v37, %v8200_v31  ;;  %v8148_v8 = vadd.f32 1e-05, %v8145_v7 }
0x1252   :  { %v8241_v17 = vrot.slane %v8216_v45, 7  ;;  %9384 = vrsqrt.f32 %v8148_v8 }
0x1254   :  { %8247 = vst.msk [vmem:[%s11345_s16 + $0x9] sm:$0x1] %vm7628_vm14, %v8241_v17 }
0x1258   :  { %v9383_v1 = vpop.eup %9382 }
0x1259   :  { %v8157_v60 = vrot.slane %v9383_v1, 1  ;;  %v8158_v28 = vrot.slane %v9383_v1, 2  ;;  %v8159_v47 = vrot.slane %v9383_v1, 3  ;;  %v8160_v29 = vrot.slane %v9383_v1, 4 }
0x125a   :  { %v8161_v10 = vrot.slane %v9383_v1, 5  ;;  %v8162_v35 = vrot.slane %v9383_v1, 6  ;;  %v8163_v54 = vrot.slane %v9383_v1, 7  ;;  %v8183_v57 = vmul.f32 %v9383_v1, %v11277_v44 }
0x125b   :  { %v8176_v6 = vmul.f32 %v8157_v60, %v11249_v39  ;;  %v8177_v55 = vmul.f32 %v8158_v28, %v11251_v48  ;;  %v8178_v52 = vmul.f32 %v8159_v47, %v11253_v46  ;;  %v8179_v58 = vmul.f32 %v8160_v29, %v11255_v50 }
0x125c   :  { %v8180_v41 = vmul.f32 %v8161_v10, %v11257_v42  ;;  %v8181_v62 = vmul.f32 %v8162_v35, %v11259_v49  ;;  %v8182_v9 = vmul.f32 %v8163_v54, %v11261_v34  ;;  %v9385_v14 = vpop.eup %9384  ;;  %v8199_v0 = vmul.f32 %v8396_v20, %v8183_v57 }
0x125d   :  { %v8192_v3 = vmul.f32 %v8396_v20, %v8176_v6  ;;  %v8193_v61 = vmul.f32 %v8396_v20, %v8177_v55  ;;  %v8194_v4 = vmul.f32 %v8396_v20, %v8178_v52  ;;  %v8195_v53 = vmul.f32 %v8396_v20, %v8179_v58 }
0x125e   :  { %v8196_v39 = vmul.f32 %v8396_v20, %v8180_v41  ;;  %v8197_v11 = vmul.f32 %v8396_v20, %v8181_v62  ;;  %v8198_v48 = vmul.f32 %v8396_v20, %v8182_v9  ;;  %v8175_v42 = vmul.f32 %v9385_v14, %v11282_v63 }
0x125f   :  { %v8208_v21 = vadd.f32 %v8397_v37, %v8192_v3  ;;  %v8209_v46 = vadd.f32 %v8397_v37, %v8193_v61  ;;  %v8210_v25 = vadd.f32 %v8397_v37, %v8194_v4  ;;  %v8211_v50 = vadd.f32 %v8397_v37, %v8195_v53 }
0x1260   :  { %v8212_v26 = vadd.f32 %v8397_v37, %v8196_v39  ;;  %v8213_v49 = vadd.f32 %v8397_v37, %v8197_v11  ;;  %v8214_v24 = vadd.f32 %v8397_v37, %v8198_v48  ;;  %v8191_v38 = vmul.f32 %v8396_v20, %v8175_v42 }
0x1261   :  { %v8227_v32 = vrot.slane %v8208_v21, 7  ;;  %v8228_v34 = vrot.slane %v8209_v46, 6  ;;  %v8230_v56 = vrot.slane %v8210_v25, 5  ;;  %v8232_v44 = vrot.slane %v8211_v50, 4 }
0x1262   :  { %v8234_v5 = vrot.slane %v8212_v26, 3  ;;  %v8207_v33 = vadd.f32 %v8397_v37, %v8191_v38  ;;  %v8236_v40 = vrot.slane %v8213_v49, 2  ;;  %v8238_v63 = vrot.slane %v8214_v24, 1 }
0x1263   :  { %v8229_v2 = vsel %vm447_vm1, %v8228_v34, %v8227_v32  ;;  %v8215_v43 = vadd.f32 %v8397_v37, %v8199_v0 }
0x1264   :  { %v8231_v23 = vsel %vm450_vm2, %v8230_v56, %v8229_v2  ;;  %8245 = vst.msk [vmem:[%s11345_s16 - $0x7] sm:$0x80] %vm7621_vm13, %v8207_v33 }
0x1265   :  { %v8233_v27 = vsel %vm453_vm3, %v8232_v44, %v8231_v23 }
0x1266   :  { %v8235_v15 = vsel %vm456_vm4, %v8234_v5, %v8233_v27 }
0x1267   :  { %v8237_v30 = vsel %vm459_vm5, %v8236_v40, %v8235_v15 }
0x1268   :  { %v8239_v22 = vsel %vm462_vm6, %v8238_v63, %v8237_v30 }
0x1269   :  { %v8240_v18 = vsel %vm464_vm7, %v8215_v43, %v8239_v22 }
0x126a   :  { %8246 = vst.msk [vmem:[%s11345_s16 + $0x1] sm:$0xff] %vm111_vm0, %v8240_v18 }

</bundles_post_ra>
